<compile_context>
chip_gen: v7x
topology: tpu7x:2x2x1
jax: 0.10.0
libtpu: 0.0.40
codegen_flags: <defaults>
</compile_context>

<pallas_src>
import functools

import numpy as np
import jax
import jax.numpy as jnp
from jax.experimental import pallas as pl
from jax.experimental.pallas import tpu as pltpu


LANE = 128
_EPS = 1e-5
# ConvTranspose3d(k=3, s=2, p=1, op=1): for each output parity, the taps of the
# conv-equivalent (flipped) kernel; input offsets are (0,) / (0, +1).
_PARITY_TAPS = {0: (1,), 1: (0, 2)}


def _round_up(x, m):
    return (x + m - 1) // m * m


def _pick_tm(M):
    """Row-tile size: large tiles for HBM-roofline efficiency, but keep >=2
    tiles on the parallel grid axis when M allows (v7x has 2 TensorCores)."""
    m128 = _round_up(M, 128)
    if m128 >= 1024:
        return 512
    if m128 >= 512:
        return 256
    return 128


# ----------------------------------------------------------------------------
# Pallas kernels
# ----------------------------------------------------------------------------
def _matmul_stats_kernel(a_ref, b_ref, y_ref, s_ref, q_ref):
    """(tm, K) @ (K, 128) on the MXU (bf16 in, f32 accumulate) with a fused
    BatchNorm-statistics epilogue (per-tile column sum and sum of squares)."""
    y = jnp.dot(a_ref[...], b_ref[...], preferred_element_type=jnp.float32)
    y_ref[...] = y
    s = jnp.sum(y, axis=0, keepdims=True)        # (1, 128)
    q = jnp.sum(y * y, axis=0, keepdims=True)    # (1, 128)
    # Stats outputs are (1, 8, 128) blocks to keep the last two dims (8, 128)
    # aligned; only sublane row 0 is consumed by the wrapper.
    s_ref[...] = jnp.broadcast_to(s[None, :, :], (1, 8, 128))
    q_ref[...] = jnp.broadcast_to(q[None, :, :], (1, 8, 128))


def _bn_act_kernel(y_ref, s_ref, b_ref, o_ref, *, relu):
    out = y_ref[...] * s_ref[...] + b_ref[...]
    if relu:
        out = jnp.maximum(out, 0.0)
    o_ref[...] = out.astype(o_ref.dtype)


def _bn_act_res_kernel(y_ref, s_ref, b_ref, r_ref, o_ref, *, relu):
    out = y_ref[...] * s_ref[...] + b_ref[...] + r_ref[...].astype(jnp.float32)
    if relu:
        out = jnp.maximum(out, 0.0)
    o_ref[...] = out.astype(o_ref.dtype)


# ----------------------------------------------------------------------------
# Pallas wrappers
# ----------------------------------------------------------------------------
def matmul_stats_pallas(a, b, tm):
    """a: (Mp, Kp) bf16, b: (Kp, 128) bf16, Mp % tm == 0.
    Returns y (Mp, 128) f32, col_sum (128,), col_sumsq (128,)."""
    Mp, Kp = a.shape
    Kp2, Np = b.shape
    assert Kp == Kp2 and Np == LANE and Mp % tm == 0
    G = Mp // tm

    y, s, q = pl.pallas_call(
        _matmul_stats_kernel,
        out_shape=(jax.ShapeDtypeStruct((Mp, LANE), jnp.float32),
                   jax.ShapeDtypeStruct((G, 8, LANE), jnp.float32),
                   jax.ShapeDtypeStruct((G, 8, LANE), jnp.float32)),
        grid_spec=pltpu.PrefetchScalarGridSpec(
            num_scalar_prefetch=0,
            grid=(G,),
            in_specs=[
                pl.BlockSpec((tm, Kp), lambda i: (i, 0)),
                pl.BlockSpec((Kp, LANE), lambda i: (0, 0)),
            ],
            out_specs=[
                pl.BlockSpec((tm, LANE), lambda i: (i, 0)),
                pl.BlockSpec((1, 8, LANE), lambda i: (i, 0, 0)),
                pl.BlockSpec((1, 8, LANE), lambda i: (i, 0, 0)),
            ],
        ),
        compiler_params=pltpu.CompilerParams(
            dimension_semantics=("parallel",)),
    )(a, b)
    return y, jnp.sum(s[:, 0, :], axis=0), jnp.sum(q[:, 0, :], axis=0)


def bn_act_pallas(y, scale, bias, residual=None, *, relu, tm, out_dtype):
    """Fused per-channel affine (+ optional residual) (+ optional ReLU) on the
    padded (Mp, 128) matmul output.  Output dtype selectable (bf16 for
    intermediate activations, f32 for the module output)."""
    Mp, C128 = y.shape
    assert C128 == LANE and Mp % tm == 0
    s2 = scale.reshape(1, LANE).astype(jnp.float32)
    b2 = bias.reshape(1, LANE).astype(jnp.float32)

    in_specs = [
        pl.BlockSpec((tm, LANE), lambda i: (i, 0)),
        pl.BlockSpec((1, LANE), lambda i: (0, 0)),
        pl.BlockSpec((1, LANE), lambda i: (0, 0)),
    ]
    args = [y, s2, b2]
    if residual is not None:
        in_specs.append(pl.BlockSpec((tm, LANE), lambda i: (i, 0)))
        args.append(residual)
        kern = functools.partial(_bn_act_res_kernel, relu=relu)
    else:
        kern = functools.partial(_bn_act_kernel, relu=relu)

    return pl.pallas_call(
        kern,
        out_shape=jax.ShapeDtypeStruct((Mp, LANE), out_dtype),
        grid_spec=pltpu.PrefetchScalarGridSpec(
            num_scalar_prefetch=0,
            grid=(Mp // tm,),
            in_specs=in_specs,
            out_specs=pl.BlockSpec((tm, LANE), lambda i: (i, 0)),
        ),
        compiler_params=pltpu.CompilerParams(
            dimension_semantics=("parallel",)),
    )(*args)


# ----------------------------------------------------------------------------
# im2col glue (bf16), conv / deconv blocks
# ----------------------------------------------------------------------------
def _im2col(x, kD, kH, kW, stride, pad):
    """x: (N, D, H, W, C) bf16 -> patch matrix (N*Do*Ho*Wo, kD*kH*kW*C) bf16."""
    N, D, H, W, C = x.shape
    if pad > 0:
        x = jnp.pad(x, ((0, 0), (pad, pad), (pad, pad), (pad, pad), (0, 0)))
    Do = (D + 2 * pad - kD) // stride + 1
    Ho = (H + 2 * pad - kH) // stride + 1
    Wo = (W + 2 * pad - kW) // stride + 1
    cols = []
    for kd in range(kD):
        for kh in range(kH):
            for kw in range(kW):
                cols.append(
                    x[:, kd:kd + (Do - 1) * stride + 1:stride,
                         kh:kh + (Ho - 1) * stride + 1:stride,
                         kw:kw + (Wo - 1) * stride + 1:stride, :])
    p = jnp.stack(cols, axis=-2)                       # (N,Do,Ho,Wo,kvol,C)
    return p.reshape(N * Do * Ho * Wo, kD * kH * kW * C), (N, Do, Ho, Wo)


def _finalize_bn(col_sum, col_sq, m_total, gamma_p, beta_p, eps=_EPS):
    mean = col_sum / m_total
    var = jnp.maximum(col_sq / m_total - mean * mean, 0.0)   # biased variance
    scale = gamma_p * jax.lax.rsqrt(var + eps)
    bias = beta_p - mean * scale
    return scale, bias


def conv_block(x, wp, gamma_p, beta_p, *, ksize, stride, pad, cout, relu,
               out_dtype=jnp.bfloat16):
    """Conv3d(bias=False) + BatchNorm3d(training batch stats) [+ ReLU].
    x: (N,D,H,W,Cin) bf16; wp: pre-packed (Kp,128) bf16 weight matrix;
    gamma_p/beta_p: (128,) f32 (zero-padded)."""
    kD, kH, kW = ksize
    a, (N, Do, Ho, Wo) = _im2col(x, kD, kH, kW, stride, pad)
    M, K = a.shape
    Kp = wp.shape[0]
    tm = _pick_tm(M)
    Mp = _round_up(M, tm)
    a_p = jnp.pad(a, ((0, Mp - M), (0, Kp - K)))

    y, col_sum, col_sq = matmul_stats_pallas(a_p, wp, tm)
    scale, bias = _finalize_bn(col_sum, col_sq, M, gamma_p, beta_p)

    out = bn_act_pallas(y, scale, bias, None, relu=relu, tm=tm,
                        out_dtype=out_dtype)
    return out[:M, :cout].reshape(N, Do, Ho, Wo, cout)


def deconv_block(x, wp_list, gamma_p, beta_p, *, cout, residual,
                 out_dtype=jnp.bfloat16):
    """ConvTranspose3d(k=3, s=2, p=1, op=1, bias=False) + BatchNorm3d
    + residual + ReLU via sub-pixel (output-parity) decomposition.
    `wp_list` holds 8 pre-packed (128,128) bf16 per-parity weight matrices
    built from the conv-equivalent (flipped) kernel layout."""
    N, D, H, W, _ = x.shape
    M_sub = N * D * H * W
    M_full = 8 * M_sub
    tm = _pick_tm(M_sub)
    Mp = _round_up(M_sub, tm)

    # Pass 1: raw per-parity convs (bf16 MXU) + aggregated BN statistics.
    raw = []
    tot_s = jnp.zeros((LANE,), jnp.float32)
    tot_q = jnp.zeros((LANE,), jnp.float32)
    idx = 0
    for pd in (0, 1):
        for ph in (0, 1):
            for pw in (0, 1):
                xp = x if (pd + ph + pw) == 0 else jnp.pad(
                    x, ((0, 0), (0, pd), (0, ph), (0, pw), (0, 0)))
                a, _dims = _im2col(xp, 1 + pd, 1 + ph, 1 + pw, 1, 0)
                K = a.shape[1]
                wp = wp_list[idx]
                a_p = jnp.pad(a, ((0, Mp - M_sub), (0, wp.shape[0] - K)))
                y, s, q = matmul_stats_pallas(a_p, wp, tm)
                raw.append(y)
                tot_s = tot_s + s
                tot_q = tot_q + q
                idx += 1

    scale, bias = _finalize_bn(tot_s, tot_q, M_full, gamma_p, beta_p)

    # Pass 2: fused BN + residual + ReLU per parity, then interleave.
    outs = []
    idx = 0
    for pd in (0, 1):
        for ph in (0, 1):
            for pw in (0, 1):
                r = residual[:, pd::2, ph::2, pw::2, :]
                r = r.reshape(M_sub, -1).astype(jnp.bfloat16)
                r = jnp.pad(r, ((0, Mp - M_sub), (0, LANE - r.shape[1])))
                o = bn_act_pallas(raw[idx], scale, bias, r, relu=True,
                                  tm=tm, out_dtype=out_dtype)
                outs.append(o[:M_sub, :cout].reshape(N, D, H, W, cout))
                idx += 1

    stacked = jnp.stack(outs, axis=0).reshape(2, 2, 2, N, D, H, W, cout)
    full = jnp.transpose(stacked, (3, 4, 0, 5, 1, 6, 2, 7))
    return full.reshape(N, 2 * D, 2 * H, 2 * W, cout)


# ----------------------------------------------------------------------------
# Parameter initialization / packing (done once, outside the hot path)
# ----------------------------------------------------------------------------
def _pack_conv_weight(w):
    """(kD,kH,kW,Cin,Cout) f32 -> (round_up(kvol*Cin,128), 128) bf16."""
    kD, kH, kW, Cin, Cout = w.shape
    K = kD * kH * kW * Cin
    Kp = _round_up(K, LANE)
    m = w.reshape(K, Cout).astype(jnp.bfloat16)
    return jnp.pad(m, ((0, Kp - K), (0, LANE - Cout)))


def _pack_deconv_weight(w):
    """Conv-equivalent (flipped) deconv kernel (3,3,3,Cin,Cout) -> list of 8
    packed per-parity weight matrices (order: pd, ph, pw in {0,1})."""
    # TODO(synk): real PyTorch ConvTranspose3d weights (Cin,Cout,kD,kH,kW)
    # must be spatially flipped + channel-transposed into this layout first.
    packed = []
    for pd in (0, 1):
        for ph in (0, 1):
            for pw in (0, 1):
                td, th, tw = (_PARITY_TAPS[pd], _PARITY_TAPS[ph],
                              _PARITY_TAPS[pw])
                sub = w[np.array(td)][:, np.array(th)][:, :, np.array(tw)]
                packed.append(_pack_conv_weight(sub))
    return packed


def _pad_vec(v):
    return jnp.pad(v.astype(jnp.float32), (0, LANE - v.shape[0]))


def init_params(key, C):
    def wconv(k, shape):
        return jax.random.normal(k, shape, jnp.float32) * 0.05

    ks = jax.random.split(key, 8)
    raw = {}
    raw["w1"] = wconv(ks[0], (3, 3, 3, C, 2 * C))
    raw["w2"] = wconv(ks[1], (3, 3, 3, 2 * C, 2 * C))
    raw["w3"] = wconv(ks[2], (3, 3, 3, 2 * C, 4 * C))
    raw["w4"] = wconv(ks[3], (3, 3, 3, 4 * C, 4 * C))
    raw["w5"] = wconv(ks[4], (3, 3, 3, 4 * C, 2 * C))   # deconv (conv-equiv)
    raw["w6"] = wconv(ks[5], (3, 3, 3, 2 * C, C))       # deconv (conv-equiv)
    raw["wr1"] = wconv(ks[6], (1, 1, 1, C, C))
    raw["wr2"] = wconv(ks[7], (1, 1, 1, 2 * C, 2 * C))
    for name, c in (("1", 2 * C), ("2", 2 * C), ("3", 4 * C), ("4", 4 * C),
                    ("5", 2 * C), ("6", C), ("r1", C), ("r2", 2 * C)):
        raw["g" + name] = jnp.ones((c,), jnp.float32)
        raw["b" + name] = jnp.zeros((c,), jnp.float32)
    return raw


def pack_params(raw):
    p = {}
    for name in ("w1", "w2", "w3", "w4", "wr1", "wr2"):
        p[name] = _pack_conv_weight(raw[name])
    for name in ("w5", "w6"):
        p[name] = _pack_deconv_weight(raw[name])
    for name in ("1", "2", "3", "4", "5", "6", "r1", "r2"):
        p["g" + name] = _pad_vec(raw["g" + name])
        p["b" + name] = _pad_vec(raw["b" + name])
    return p


# ----------------------------------------------------------------------------
# hourglass forward
# ----------------------------------------------------------------------------
def hourglass_forward(x_ncdhw, p, C):
    # NCDHW (PyTorch) -> NDHWC (TPU channels-last), bf16 activations.
    x = jnp.transpose(x_ncdhw, (0, 2, 3, 4, 1)).astype(jnp.bfloat16)

    c1 = conv_block(x, p["w1"], p["g1"], p["b1"], ksize=(3, 3, 3), stride=2,
                    pad=1, cout=2 * C, relu=True)
    c2 = conv_block(c1, p["w2"], p["g2"], p["b2"], ksize=(3, 3, 3), stride=1,
                    pad=1, cout=2 * C, relu=True)
    c3 = conv_block(c2, p["w3"], p["g3"], p["b3"], ksize=(3, 3, 3), stride=2,
                    pad=1, cout=4 * C, relu=True)
    c4 = conv_block(c3, p["w4"], p["g4"], p["b4"], ksize=(3, 3, 3), stride=1,
                    pad=1, cout=4 * C, relu=True)

    r2 = conv_block(c2, p["wr2"], p["gr2"], p["br2"], ksize=(1, 1, 1), stride=1,
                    pad=0, cout=2 * C, relu=False)
    r1 = conv_block(x, p["wr1"], p["gr1"], p["br1"], ksize=(1, 1, 1), stride=1,
                    pad=0, cout=C, relu=False)

    c5 = deconv_block(c4, p["w5"], p["g5"], p["b5"], cout=2 * C, residual=r2)
    c6 = deconv_block(c5, p["w6"], p["g6"], p["b6"], cout=C, residual=r1,
                      out_dtype=jnp.float32)

    # back to NCDHW
    return jnp.transpose(c6, (0, 4, 1, 2, 3))


if __name__ == "__main__":
    key = jax.random.PRNGKey(0)
    C = 4                      # in_channels
    N, D, H, W = 2, 8, 16, 16  # cost-volume style input (divisible by 4)

    x = jax.random.normal(jax.random.fold_in(key, 99), (N, C, D, H, W),
                          jnp.float32)
    params = pack_params(init_params(key, C))

    fwd = jax.jit(hourglass_forward, static_argnums=2)
    out = jax.block_until_ready(fwd(x, params, C))

    assert out.shape == (N, C, D, H, W), out.shape
    assert out.dtype == jnp.float32
    assert bool(jnp.all(jnp.isfinite(out)))
    print("KERNEL_OK")
</pallas_src>

<mosaic_0001>
module attributes {stable_mosaic.version = 11 : i64} {
  func.func @_matmul_stats_kernel(%arg0: i32, %arg1: memref<256x128xbf16, #tpu.memory_space<vmem>>, %arg2: memref<128x128xbf16, #tpu.memory_space<vmem>>, %arg3: memref<256x128xf32, #tpu.memory_space<vmem>>, %arg4: memref<1x8x128xf32, #tpu.memory_space<vmem>>, %arg5: memref<1x8x128xf32, #tpu.memory_space<vmem>>) attributes {dimension_semantics = [#tpu.dimension_semantics<parallel>], iteration_bounds = array<i64: 2>, scalar_prefetch = 0 : i64, scratch_operands = 0 : i64, tpu.core_type = #tpu.core_type<tc>, window_params = [{transform_indices = @transform_0, window_bounds = array<i64: 256, 128>}, {pipeline_mode = #tpu.pipeline_mode<synchronous>, transform_indices = @transform_1, window_bounds = array<i64: 128, 128>}, {transform_indices = @transform_2, window_bounds = array<i64: 256, 128>}, {transform_indices = @transform_3, window_bounds = array<i64: 1, 8, 128>}, {transform_indices = @transform_4, window_bounds = array<i64: 1, 8, 128>}]} {
    %c0 = arith.constant 0 : index
    %c0_0 = arith.constant 0 : index
    %0 = vector.load %arg1[%c0, %c0_0] : memref<256x128xbf16, #tpu.memory_space<vmem>>, vector<256x128xbf16>
    %c0_1 = arith.constant 0 : index
    %c0_2 = arith.constant 0 : index
    %1 = vector.load %arg2[%c0_1, %c0_2] : memref<128x128xbf16, #tpu.memory_space<vmem>>, vector<128x128xbf16>
    %cst = arith.constant dense<0.000000e+00> : vector<256x128xf32>
    %2 = tpu.matmul %0, %1, %cst {dimension_numbers = #tpu.dot_dimension_numbers<[1], [0], [0], [1], [0, 0, 1, 1], [], []>} : vector<256x128xbf16>, vector<128x128xbf16>, vector<256x128xf32> -> vector<256x128xf32>
    %c0_3 = arith.constant 0 : index
    %c0_4 = arith.constant 0 : index
    %3 = vector.load %arg3[%c0_3, %c0_4] : memref<256x128xf32, #tpu.memory_space<vmem>>, vector<256x128xf32>
    tpu.vector_store %arg3[%c0_3, %c0_4], %2 {strides = array<i32>} : memref<256x128xf32, #tpu.memory_space<vmem>>, vector<256x128xf32>,
    %cst_5 = arith.constant dense<0.000000e+00> : vector<128xf32>
    %4 = vector.multi_reduction <add>, %2, %cst_5 [0] : vector<256x128xf32> to vector<128xf32>
    %5 = vector.shape_cast %4 : vector<128xf32> to vector<1x128xf32>
    %6 = arith.mulf %2, %2 : vector<256x128xf32>
    %cst_6 = arith.constant dense<0.000000e+00> : vector<128xf32>
    %7 = vector.multi_reduction <add>, %6, %cst_6 [0] : vector<256x128xf32> to vector<128xf32>
    %8 = vector.shape_cast %7 : vector<128xf32> to vector<1x128xf32>
    %9 = vector.shape_cast %5 : vector<1x128xf32> to vector<1x1x128xf32>
    %10 = vector.shape_cast %9 : vector<1x1x128xf32> to vector<1x1x128xf32>
    %11 = vector.broadcast %10 : vector<1x1x128xf32> to vector<1x8x128xf32>
    %c0_7 = arith.constant 0 : index
    %c0_8 = arith.constant 0 : index
    %c0_9 = arith.constant 0 : index
    %12 = vector.load %arg4[%c0_7, %c0_8, %c0_9] : memref<1x8x128xf32, #tpu.memory_space<vmem>>, vector<1x8x128xf32>
    tpu.vector_store %arg4[%c0_7, %c0_8, %c0_9], %11 {strides = array<i32>} : memref<1x8x128xf32, #tpu.memory_space<vmem>>, vector<1x8x128xf32>,
    %13 = vector.shape_cast %8 : vector<1x128xf32> to vector<1x1x128xf32>
    %14 = vector.shape_cast %13 : vector<1x1x128xf32> to vector<1x1x128xf32>
    %15 = vector.broadcast %14 : vector<1x1x128xf32> to vector<1x8x128xf32>
    %c0_10 = arith.constant 0 : index
    %c0_11 = arith.constant 0 : index
    %c0_12 = arith.constant 0 : index
    %16 = vector.load %arg5[%c0_10, %c0_11, %c0_12] : memref<1x8x128xf32, #tpu.memory_space<vmem>>, vector<1x8x128xf32>
    tpu.vector_store %arg5[%c0_10, %c0_11, %c0_12], %15 {strides = array<i32>} : memref<1x8x128xf32, #tpu.memory_space<vmem>>, vector<1x8x128xf32>,
    return
  }
  func.func @transform_0(%arg0: i32) -> (i32, i32) {
    %c0_i32 = arith.constant 0 : i32
    %c0_i32_0 = arith.constant 0 : i32
    return %arg0, %c0_i32 : i32, i32
  }
  func.func @transform_1(%arg0: i32) -> (i32, i32) {
    %c0_i32 = arith.constant 0 : i32
    %c0_i32_0 = arith.constant 0 : i32
    %c0_i32_1 = arith.constant 0 : i32
    return %c0_i32, %c0_i32_0 : i32, i32
  }
  func.func @transform_2(%arg0: i32) -> (i32, i32) {
    %c0_i32 = arith.constant 0 : i32
    %c0_i32_0 = arith.constant 0 : i32
    return %arg0, %c0_i32 : i32, i32
  }
  func.func @transform_3(%arg0: i32) -> (i32, i32, i32) {
    %c0_i32 = arith.constant 0 : i32
    %c0_i32_0 = arith.constant 0 : i32
    %c0_i32_1 = arith.constant 0 : i32
    return %arg0, %c0_i32, %c0_i32_0 : i32, i32, i32
  }
  func.func @transform_4(%arg0: i32) -> (i32, i32, i32) {
    %c0_i32 = arith.constant 0 : i32
    %c0_i32_0 = arith.constant 0 : i32
    %c0_i32_1 = arith.constant 0 : i32
    return %arg0, %c0_i32, %c0_i32_0 : i32, i32, i32
  }
}

module attributes {stable_mosaic.version = 11 : i64} {
  func.func @_bn_act_kernel(%arg0: i32, %arg1: memref<256x128xf32, #tpu.memory_space<vmem>>, %arg2: memref<1x128xf32, #tpu.memory_space<vmem>>, %arg3: memref<1x128xf32, #tpu.memory_space<vmem>>, %arg4: memref<256x128xbf16, #tpu.memory_space<vmem>>) attributes {dimension_semantics = [#tpu.dimension_semantics<parallel>], iteration_bounds = array<i64: 2>, scalar_prefetch = 0 : i64, scratch_operands = 0 : i64, tpu.core_type = #tpu.core_type<tc>, window_params = [{transform_indices = @transform_0, window_bounds = array<i64: 256, 128>}, {pipeline_mode = #tpu.pipeline_mode<synchronous>, transform_indices = @transform_1, window_bounds = array<i64: 1, 128>}, {pipeline_mode = #tpu.pipeline_mode<synchronous>, transform_indices = @transform_2, window_bounds = array<i64: 1, 128>}, {transform_indices = @transform_3, window_bounds = array<i64: 256, 128>}]} {
    %c0 = arith.constant 0 : index
    %c0_0 = arith.constant 0 : index
    %0 = vector.load %arg1[%c0, %c0_0] : memref<256x128xf32, #tpu.memory_space<vmem>>, vector<256x128xf32>
    %c0_1 = arith.constant 0 : index
    %c0_2 = arith.constant 0 : index
    %1 = vector.load %arg2[%c0_1, %c0_2] : memref<1x128xf32, #tpu.memory_space<vmem>>, vector<1x128xf32>
    %2 = vector.broadcast %1 : vector<1x128xf32> to vector<256x128xf32>
    %3 = arith.mulf %0, %2 : vector<256x128xf32>
    %c0_3 = arith.constant 0 : index
    %c0_4 = arith.constant 0 : index
    %4 = vector.load %arg3[%c0_3, %c0_4] : memref<1x128xf32, #tpu.memory_space<vmem>>, vector<1x128xf32>
    %5 = vector.broadcast %4 : vector<1x128xf32> to vector<256x128xf32>
    %6 = arith.addf %3, %5 : vector<256x128xf32>
    %cst = arith.constant 0.000000e+00 : f32
    %7 = vector.broadcast %cst : f32 to vector<256x128xf32>
    %8 = arith.maximumf %6, %7 : vector<256x128xf32>
    %9 = arith.truncf %8 : vector<256x128xf32> to vector<256x128xbf16>
    %c0_5 = arith.constant 0 : index
    %c0_6 = arith.constant 0 : index
    %10 = vector.load %arg4[%c0_5, %c0_6] : memref<256x128xbf16, #tpu.memory_space<vmem>>, vector<256x128xbf16>
    tpu.vector_store %arg4[%c0_5, %c0_6], %9 {strides = array<i32>} : memref<256x128xbf16, #tpu.memory_space<vmem>>, vector<256x128xbf16>,
    return
  }
  func.func @transform_0(%arg0: i32) -> (i32, i32) {
    %c0_i32 = arith.constant 0 : i32
    %c0_i32_0 = arith.constant 0 : i32
    return %arg0, %c0_i32 : i32, i32
  }
  func.func @transform_1(%arg0: i32) -> (i32, i32) {
    %c0_i32 = arith.constant 0 : i32
    %c0_i32_0 = arith.constant 0 : i32
    %c0_i32_1 = arith.constant 0 : i32
    return %c0_i32, %c0_i32_0 : i32, i32
  }
  func.func @transform_2(%arg0: i32) -> (i32, i32) {
    %c0_i32 = arith.constant 0 : i32
    %c0_i32_0 = arith.constant 0 : i32
    %c0_i32_1 = arith.constant 0 : i32
    return %c0_i32, %c0_i32_0 : i32, i32
  }
  func.func @transform_3(%arg0: i32) -> (i32, i32) {
    %c0_i32 = arith.constant 0 : i32
    %c0_i32_0 = arith.constant 0 : i32
    return %arg0, %c0_i32 : i32, i32
  }
}

module attributes {stable_mosaic.version = 11 : i64} {
  func.func @_matmul_stats_kernel(%arg0: i32, %arg1: memref<256x256xbf16, #tpu.memory_space<vmem>>, %arg2: memref<256x128xbf16, #tpu.memory_space<vmem>>, %arg3: memref<256x128xf32, #tpu.memory_space<vmem>>, %arg4: memref<1x8x128xf32, #tpu.memory_space<vmem>>, %arg5: memref<1x8x128xf32, #tpu.memory_space<vmem>>) attributes {dimension_semantics = [#tpu.dimension_semantics<parallel>], iteration_bounds = array<i64: 2>, scalar_prefetch = 0 : i64, scratch_operands = 0 : i64, tpu.core_type = #tpu.core_type<tc>, window_params = [{transform_indices = @transform_0, window_bounds = array<i64: 256, 256>}, {pipeline_mode = #tpu.pipeline_mode<synchronous>, transform_indices = @transform_1, window_bounds = array<i64: 256, 128>}, {transform_indices = @transform_2, window_bounds = array<i64: 256, 128>}, {transform_indices = @transform_3, window_bounds = array<i64: 1, 8, 128>}, {transform_indices = @transform_4, window_bounds = array<i64: 1, 8, 128>}]} {
    %c0 = arith.constant 0 : index
    %c0_0 = arith.constant 0 : index
    %0 = vector.load %arg1[%c0, %c0_0] : memref<256x256xbf16, #tpu.memory_space<vmem>>, vector<256x256xbf16>
    %c0_1 = arith.constant 0 : index
    %c0_2 = arith.constant 0 : index
    %1 = vector.load %arg2[%c0_1, %c0_2] : memref<256x128xbf16, #tpu.memory_space<vmem>>, vector<256x128xbf16>
    %cst = arith.constant dense<0.000000e+00> : vector<256x128xf32>
    %2 = tpu.matmul %0, %1, %cst {dimension_numbers = #tpu.dot_dimension_numbers<[1], [0], [0], [1], [0, 0, 1, 1], [], []>} : vector<256x256xbf16>, vector<256x128xbf16>, vector<256x128xf32> -> vector<256x128xf32>
    %c0_3 = arith.constant 0 : index
    %c0_4 = arith.constant 0 : index
    %3 = vector.load %arg3[%c0_3, %c0_4] : memref<256x128xf32, #tpu.memory_space<vmem>>, vector<256x128xf32>
    tpu.vector_store %arg3[%c0_3, %c0_4], %2 {strides = array<i32>} : memref<256x128xf32, #tpu.memory_space<vmem>>, vector<256x128xf32>,
    %cst_5 = arith.constant dense<0.000000e+00> : vector<128xf32>
    %4 = vector.multi_reduction <add>, %2, %cst_5 [0] : vector<256x128xf32> to vector<128xf32>
    %5 = vector.shape_cast %4 : vector<128xf32> to vector<1x128xf32>
    %6 = arith.mulf %2, %2 : vector<256x128xf32>
    %cst_6 = arith.constant dense<0.000000e+00> : vector<128xf32>
    %7 = vector.multi_reduction <add>, %6, %cst_6 [0] : vector<256x128xf32> to vector<128xf32>
    %8 = vector.shape_cast %7 : vector<128xf32> to vector<1x128xf32>
    %9 = vector.shape_cast %5 : vector<1x128xf32> to vector<1x1x128xf32>
    %10 = vector.shape_cast %9 : vector<1x1x128xf32> to vector<1x1x128xf32>
    %11 = vector.broadcast %10 : vector<1x1x128xf32> to vector<1x8x128xf32>
    %c0_7 = arith.constant 0 : index
    %c0_8 = arith.constant 0 : index
    %c0_9 = arith.constant 0 : index
    %12 = vector.load %arg4[%c0_7, %c0_8, %c0_9] : memref<1x8x128xf32, #tpu.memory_space<vmem>>, vector<1x8x128xf32>
    tpu.vector_store %arg4[%c0_7, %c0_8, %c0_9], %11 {strides = array<i32>} : memref<1x8x128xf32, #tpu.memory_space<vmem>>, vector<1x8x128xf32>,
    %13 = vector.shape_cast %8 : vector<1x128xf32> to vector<1x1x128xf32>
    %14 = vector.shape_cast %13 : vector<1x1x128xf32> to vector<1x1x128xf32>
    %15 = vector.broadcast %14 : vector<1x1x128xf32> to vector<1x8x128xf32>
    %c0_10 = arith.constant 0 : index
    %c0_11 = arith.constant 0 : index
    %c0_12 = arith.constant 0 : index
    %16 = vector.load %arg5[%c0_10, %c0_11, %c0_12] : memref<1x8x128xf32, #tpu.memory_space<vmem>>, vector<1x8x128xf32>
    tpu.vector_store %arg5[%c0_10, %c0_11, %c0_12], %15 {strides = array<i32>} : memref<1x8x128xf32, #tpu.memory_space<vmem>>, vector<1x8x128xf32>,
    return
  }
  func.func @transform_0(%arg0: i32) -> (i32, i32) {
    %c0_i32 = arith.constant 0 : i32
    %c0_i32_0 = arith.constant 0 : i32
    return %arg0, %c0_i32 : i32, i32
  }
  func.func @transform_1(%arg0: i32) -> (i32, i32) {
    %c0_i32 = arith.constant 0 : i32
    %c0_i32_0 = arith.constant 0 : i32
    %c0_i32_1 = arith.constant 0 : i32
    return %c0_i32, %c0_i32_0 : i32, i32
  }
  func.func @transform_2(%arg0: i32) -> (i32, i32) {
    %c0_i32 = arith.constant 0 : i32
    %c0_i32_0 = arith.constant 0 : i32
    return %arg0, %c0_i32 : i32, i32
  }
  func.func @transform_3(%arg0: i32) -> (i32, i32, i32) {
    %c0_i32 = arith.constant 0 : i32
    %c0_i32_0 = arith.constant 0 : i32
    %c0_i32_1 = arith.constant 0 : i32
    return %arg0, %c0_i32, %c0_i32_0 : i32, i32, i32
  }
  func.func @transform_4(%arg0: i32) -> (i32, i32, i32) {
    %c0_i32 = arith.constant 0 : i32
    %c0_i32_0 = arith.constant 0 : i32
    %c0_i32_1 = arith.constant 0 : i32
    return %arg0, %c0_i32, %c0_i32_0 : i32, i32, i32
  }
}

module attributes {stable_mosaic.version = 11 : i64} {
  func.func @_bn_act_kernel(%arg0: i32, %arg1: memref<256x128xf32, #tpu.memory_space<vmem>>, %arg2: memref<1x128xf32, #tpu.memory_space<vmem>>, %arg3: memref<1x128xf32, #tpu.memory_space<vmem>>, %arg4: memref<256x128xbf16, #tpu.memory_space<vmem>>) attributes {dimension_semantics = [#tpu.dimension_semantics<parallel>], iteration_bounds = array<i64: 2>, scalar_prefetch = 0 : i64, scratch_operands = 0 : i64, tpu.core_type = #tpu.core_type<tc>, window_params = [{transform_indices = @transform_0, window_bounds = array<i64: 256, 128>}, {pipeline_mode = #tpu.pipeline_mode<synchronous>, transform_indices = @transform_1, window_bounds = array<i64: 1, 128>}, {pipeline_mode = #tpu.pipeline_mode<synchronous>, transform_indices = @transform_2, window_bounds = array<i64: 1, 128>}, {transform_indices = @transform_3, window_bounds = array<i64: 256, 128>}]} {
    %c0 = arith.constant 0 : index
    %c0_0 = arith.constant 0 : index
    %0 = vector.load %arg1[%c0, %c0_0] : memref<256x128xf32, #tpu.memory_space<vmem>>, vector<256x128xf32>
    %c0_1 = arith.constant 0 : index
    %c0_2 = arith.constant 0 : index
    %1 = vector.load %arg2[%c0_1, %c0_2] : memref<1x128xf32, #tpu.memory_space<vmem>>, vector<1x128xf32>
    %2 = vector.broadcast %1 : vector<1x128xf32> to vector<256x128xf32>
    %3 = arith.mulf %0, %2 : vector<256x128xf32>
    %c0_3 = arith.constant 0 : index
    %c0_4 = arith.constant 0 : index
    %4 = vector.load %arg3[%c0_3, %c0_4] : memref<1x128xf32, #tpu.memory_space<vmem>>, vector<1x128xf32>
    %5 = vector.broadcast %4 : vector<1x128xf32> to vector<256x128xf32>
    %6 = arith.addf %3, %5 : vector<256x128xf32>
    %7 = arith.truncf %6 : vector<256x128xf32> to vector<256x128xbf16>
    %c0_5 = arith.constant 0 : index
    %c0_6 = arith.constant 0 : index
    %8 = vector.load %arg4[%c0_5, %c0_6] : memref<256x128xbf16, #tpu.memory_space<vmem>>, vector<256x128xbf16>
    tpu.vector_store %arg4[%c0_5, %c0_6], %7 {strides = array<i32>} : memref<256x128xbf16, #tpu.memory_space<vmem>>, vector<256x128xbf16>,
    return
  }
  func.func @transform_0(%arg0: i32) -> (i32, i32) {
    %c0_i32 = arith.constant 0 : i32
    %c0_i32_0 = arith.constant 0 : i32
    return %arg0, %c0_i32 : i32, i32
  }
  func.func @transform_1(%arg0: i32) -> (i32, i32) {
    %c0_i32 = arith.constant 0 : i32
    %c0_i32_0 = arith.constant 0 : i32
    %c0_i32_1 = arith.constant 0 : i32
    return %c0_i32, %c0_i32_0 : i32, i32
  }
  func.func @transform_2(%arg0: i32) -> (i32, i32) {
    %c0_i32 = arith.constant 0 : i32
    %c0_i32_0 = arith.constant 0 : i32
    %c0_i32_1 = arith.constant 0 : i32
    return %c0_i32, %c0_i32_0 : i32, i32
  }
  func.func @transform_3(%arg0: i32) -> (i32, i32) {
    %c0_i32 = arith.constant 0 : i32
    %c0_i32_0 = arith.constant 0 : i32
    return %arg0, %c0_i32 : i32, i32
  }
}

module attributes {stable_mosaic.version = 11 : i64} {
  func.func @_matmul_stats_kernel(%arg0: i32, %arg1: memref<128x256xbf16, #tpu.memory_space<vmem>>, %arg2: memref<256x128xbf16, #tpu.memory_space<vmem>>, %arg3: memref<128x128xf32, #tpu.memory_space<vmem>>, %arg4: memref<1x8x128xf32, #tpu.memory_space<vmem>>, %arg5: memref<1x8x128xf32, #tpu.memory_space<vmem>>) attributes {dimension_semantics = [#tpu.dimension_semantics<parallel>], iteration_bounds = array<i64: 1>, scalar_prefetch = 0 : i64, scratch_operands = 0 : i64, tpu.core_type = #tpu.core_type<tc>, window_params = [{transform_indices = @transform_0, window_bounds = array<i64: 128, 256>}, {pipeline_mode = #tpu.pipeline_mode<synchronous>, transform_indices = @transform_1, window_bounds = array<i64: 256, 128>}, {transform_indices = @transform_2, window_bounds = array<i64: 128, 128>}, {transform_indices = @transform_3, window_bounds = array<i64: 1, 8, 128>}, {transform_indices = @transform_4, window_bounds = array<i64: 1, 8, 128>}]} {
    %c0 = arith.constant 0 : index
    %c0_0 = arith.constant 0 : index
    %0 = vector.load %arg1[%c0, %c0_0] : memref<128x256xbf16, #tpu.memory_space<vmem>>, vector<128x256xbf16>
    %c0_1 = arith.constant 0 : index
    %c0_2 = arith.constant 0 : index
    %1 = vector.load %arg2[%c0_1, %c0_2] : memref<256x128xbf16, #tpu.memory_space<vmem>>, vector<256x128xbf16>
    %cst = arith.constant dense<0.000000e+00> : vector<128x128xf32>
    %2 = tpu.matmul %0, %1, %cst {dimension_numbers = #tpu.dot_dimension_numbers<[1], [0], [0], [1], [0, 0, 1, 1], [], []>} : vector<128x256xbf16>, vector<256x128xbf16>, vector<128x128xf32> -> vector<128x128xf32>
    %c0_3 = arith.constant 0 : index
    %c0_4 = arith.constant 0 : index
    %3 = vector.load %arg3[%c0_3, %c0_4] : memref<128x128xf32, #tpu.memory_space<vmem>>, vector<128x128xf32>
    tpu.vector_store %arg3[%c0_3, %c0_4], %2 {strides = array<i32>} : memref<128x128xf32, #tpu.memory_space<vmem>>, vector<128x128xf32>,
    %cst_5 = arith.constant dense<0.000000e+00> : vector<128xf32>
    %4 = vector.multi_reduction <add>, %2, %cst_5 [0] : vector<128x128xf32> to vector<128xf32>
    %5 = vector.shape_cast %4 : vector<128xf32> to vector<1x128xf32>
    %6 = arith.mulf %2, %2 : vector<128x128xf32>
    %cst_6 = arith.constant dense<0.000000e+00> : vector<128xf32>
    %7 = vector.multi_reduction <add>, %6, %cst_6 [0] : vector<128x128xf32> to vector<128xf32>
    %8 = vector.shape_cast %7 : vector<128xf32> to vector<1x128xf32>
    %9 = vector.shape_cast %5 : vector<1x128xf32> to vector<1x1x128xf32>
    %10 = vector.shape_cast %9 : vector<1x1x128xf32> to vector<1x1x128xf32>
    %11 = vector.broadcast %10 : vector<1x1x128xf32> to vector<1x8x128xf32>
    %c0_7 = arith.constant 0 : index
    %c0_8 = arith.constant 0 : index
    %c0_9 = arith.constant 0 : index
    %12 = vector.load %arg4[%c0_7, %c0_8, %c0_9] : memref<1x8x128xf32, #tpu.memory_space<vmem>>, vector<1x8x128xf32>
    tpu.vector_store %arg4[%c0_7, %c0_8, %c0_9], %11 {strides = array<i32>} : memref<1x8x128xf32, #tpu.memory_space<vmem>>, vector<1x8x128xf32>,
    %13 = vector.shape_cast %8 : vector<1x128xf32> to vector<1x1x128xf32>
    %14 = vector.shape_cast %13 : vector<1x1x128xf32> to vector<1x1x128xf32>
    %15 = vector.broadcast %14 : vector<1x1x128xf32> to vector<1x8x128xf32>
    %c0_10 = arith.constant 0 : index
    %c0_11 = arith.constant 0 : index
    %c0_12 = arith.constant 0 : index
    %16 = vector.load %arg5[%c0_10, %c0_11, %c0_12] : memref<1x8x128xf32, #tpu.memory_space<vmem>>, vector<1x8x128xf32>
    tpu.vector_store %arg5[%c0_10, %c0_11, %c0_12], %15 {strides = array<i32>} : memref<1x8x128xf32, #tpu.memory_space<vmem>>, vector<1x8x128xf32>,
    return
  }
  func.func @transform_0(%arg0: i32) -> (i32, i32) {
    %c0_i32 = arith.constant 0 : i32
    %c0_i32_0 = arith.constant 0 : i32
    return %arg0, %c0_i32 : i32, i32
  }
  func.func @transform_1(%arg0: i32) -> (i32, i32) {
    %c0_i32 = arith.constant 0 : i32
    %c0_i32_0 = arith.constant 0 : i32
    %c0_i32_1 = arith.constant 0 : i32
    return %c0_i32, %c0_i32_0 : i32, i32
  }
  func.func @transform_2(%arg0: i32) -> (i32, i32) {
    %c0_i32 = arith.constant 0 : i32
    %c0_i32_0 = arith.constant 0 : i32
    return %arg0, %c0_i32 : i32, i32
  }
  func.func @transform_3(%arg0: i32) -> (i32, i32, i32) {
    %c0_i32 = arith.constant 0 : i32
    %c0_i32_0 = arith.constant 0 : i32
    %c0_i32_1 = arith.constant 0 : i32
    return %arg0, %c0_i32, %c0_i32_0 : i32, i32, i32
  }
  func.func @transform_4(%arg0: i32) -> (i32, i32, i32) {
    %c0_i32 = arith.constant 0 : i32
    %c0_i32_0 = arith.constant 0 : i32
    %c0_i32_1 = arith.constant 0 : i32
    return %arg0, %c0_i32, %c0_i32_0 : i32, i32, i32
  }
}

module attributes {stable_mosaic.version = 11 : i64} {
  func.func @_bn_act_kernel(%arg0: i32, %arg1: memref<128x128xf32, #tpu.memory_space<vmem>>, %arg2: memref<1x128xf32, #tpu.memory_space<vmem>>, %arg3: memref<1x128xf32, #tpu.memory_space<vmem>>, %arg4: memref<128x128xbf16, #tpu.memory_space<vmem>>) attributes {dimension_semantics = [#tpu.dimension_semantics<parallel>], iteration_bounds = array<i64: 1>, scalar_prefetch = 0 : i64, scratch_operands = 0 : i64, tpu.core_type = #tpu.core_type<tc>, window_params = [{transform_indices = @transform_0, window_bounds = array<i64: 128, 128>}, {pipeline_mode = #tpu.pipeline_mode<synchronous>, transform_indices = @transform_1, window_bounds = array<i64: 1, 128>}, {pipeline_mode = #tpu.pipeline_mode<synchronous>, transform_indices = @transform_2, window_bounds = array<i64: 1, 128>}, {transform_indices = @transform_3, window_bounds = array<i64: 128, 128>}]} {
    %c0 = arith.constant 0 : index
    %c0_0 = arith.constant 0 : index
    %0 = vector.load %arg1[%c0, %c0_0] : memref<128x128xf32, #tpu.memory_space<vmem>>, vector<128x128xf32>
    %c0_1 = arith.constant 0 : index
    %c0_2 = arith.constant 0 : index
    %1 = vector.load %arg2[%c0_1, %c0_2] : memref<1x128xf32, #tpu.memory_space<vmem>>, vector<1x128xf32>
    %2 = vector.broadcast %1 : vector<1x128xf32> to vector<128x128xf32>
    %3 = arith.mulf %0, %2 : vector<128x128xf32>
    %c0_3 = arith.constant 0 : index
    %c0_4 = arith.constant 0 : index
    %4 = vector.load %arg3[%c0_3, %c0_4] : memref<1x128xf32, #tpu.memory_space<vmem>>, vector<1x128xf32>
    %5 = vector.broadcast %4 : vector<1x128xf32> to vector<128x128xf32>
    %6 = arith.addf %3, %5 : vector<128x128xf32>
    %cst = arith.constant 0.000000e+00 : f32
    %7 = vector.broadcast %cst : f32 to vector<128x128xf32>
    %8 = arith.maximumf %6, %7 : vector<128x128xf32>
    %9 = arith.truncf %8 : vector<128x128xf32> to vector<128x128xbf16>
    %c0_5 = arith.constant 0 : index
    %c0_6 = arith.constant 0 : index
    %10 = vector.load %arg4[%c0_5, %c0_6] : memref<128x128xbf16, #tpu.memory_space<vmem>>, vector<128x128xbf16>
    tpu.vector_store %arg4[%c0_5, %c0_6], %9 {strides = array<i32>} : memref<128x128xbf16, #tpu.memory_space<vmem>>, vector<128x128xbf16>,
    return
  }
  func.func @transform_0(%arg0: i32) -> (i32, i32) {
    %c0_i32 = arith.constant 0 : i32
    %c0_i32_0 = arith.constant 0 : i32
    return %arg0, %c0_i32 : i32, i32
  }
  func.func @transform_1(%arg0: i32) -> (i32, i32) {
    %c0_i32 = arith.constant 0 : i32
    %c0_i32_0 = arith.constant 0 : i32
    %c0_i32_1 = arith.constant 0 : i32
    return %c0_i32, %c0_i32_0 : i32, i32
  }
  func.func @transform_2(%arg0: i32) -> (i32, i32) {
    %c0_i32 = arith.constant 0 : i32
    %c0_i32_0 = arith.constant 0 : i32
    %c0_i32_1 = arith.constant 0 : i32
    return %c0_i32, %c0_i32_0 : i32, i32
  }
  func.func @transform_3(%arg0: i32) -> (i32, i32) {
    %c0_i32 = arith.constant 0 : i32
    %c0_i32_0 = arith.constant 0 : i32
    return %arg0, %c0_i32 : i32, i32
  }
}

module attributes {stable_mosaic.version = 11 : i64} {
  func.func @_matmul_stats_kernel(%arg0: i32, %arg1: memref<128x512xbf16, #tpu.memory_space<vmem>>, %arg2: memref<512x128xbf16, #tpu.memory_space<vmem>>, %arg3: memref<128x128xf32, #tpu.memory_space<vmem>>, %arg4: memref<1x8x128xf32, #tpu.memory_space<vmem>>, %arg5: memref<1x8x128xf32, #tpu.memory_space<vmem>>) attributes {dimension_semantics = [#tpu.dimension_semantics<parallel>], iteration_bounds = array<i64: 1>, scalar_prefetch = 0 : i64, scratch_operands = 0 : i64, tpu.core_type = #tpu.core_type<tc>, window_params = [{transform_indices = @transform_0, window_bounds = array<i64: 128, 512>}, {pipeline_mode = #tpu.pipeline_mode<synchronous>, transform_indices = @transform_1, window_bounds = array<i64: 512, 128>}, {transform_indices = @transform_2, window_bounds = array<i64: 128, 128>}, {transform_indices = @transform_3, window_bounds = array<i64: 1, 8, 128>}, {transform_indices = @transform_4, window_bounds = array<i64: 1, 8, 128>}]} {
    %c0 = arith.constant 0 : index
    %c0_0 = arith.constant 0 : index
    %0 = vector.load %arg1[%c0, %c0_0] : memref<128x512xbf16, #tpu.memory_space<vmem>>, vector<128x512xbf16>
    %c0_1 = arith.constant 0 : index
    %c0_2 = arith.constant 0 : index
    %1 = vector.load %arg2[%c0_1, %c0_2] : memref<512x128xbf16, #tpu.memory_space<vmem>>, vector<512x128xbf16>
    %cst = arith.constant dense<0.000000e+00> : vector<128x128xf32>
    %2 = tpu.matmul %0, %1, %cst {dimension_numbers = #tpu.dot_dimension_numbers<[1], [0], [0], [1], [0, 0, 1, 1], [], []>} : vector<128x512xbf16>, vector<512x128xbf16>, vector<128x128xf32> -> vector<128x128xf32>
    %c0_3 = arith.constant 0 : index
    %c0_4 = arith.constant 0 : index
    %3 = vector.load %arg3[%c0_3, %c0_4] : memref<128x128xf32, #tpu.memory_space<vmem>>, vector<128x128xf32>
    tpu.vector_store %arg3[%c0_3, %c0_4], %2 {strides = array<i32>} : memref<128x128xf32, #tpu.memory_space<vmem>>, vector<128x128xf32>,
    %cst_5 = arith.constant dense<0.000000e+00> : vector<128xf32>
    %4 = vector.multi_reduction <add>, %2, %cst_5 [0] : vector<128x128xf32> to vector<128xf32>
    %5 = vector.shape_cast %4 : vector<128xf32> to vector<1x128xf32>
    %6 = arith.mulf %2, %2 : vector<128x128xf32>
    %cst_6 = arith.constant dense<0.000000e+00> : vector<128xf32>
    %7 = vector.multi_reduction <add>, %6, %cst_6 [0] : vector<128x128xf32> to vector<128xf32>
    %8 = vector.shape_cast %7 : vector<128xf32> to vector<1x128xf32>
    %9 = vector.shape_cast %5 : vector<1x128xf32> to vector<1x1x128xf32>
    %10 = vector.shape_cast %9 : vector<1x1x128xf32> to vector<1x1x128xf32>
    %11 = vector.broadcast %10 : vector<1x1x128xf32> to vector<1x8x128xf32>
    %c0_7 = arith.constant 0 : index
    %c0_8 = arith.constant 0 : index
    %c0_9 = arith.constant 0 : index
    %12 = vector.load %arg4[%c0_7, %c0_8, %c0_9] : memref<1x8x128xf32, #tpu.memory_space<vmem>>, vector<1x8x128xf32>
    tpu.vector_store %arg4[%c0_7, %c0_8, %c0_9], %11 {strides = array<i32>} : memref<1x8x128xf32, #tpu.memory_space<vmem>>, vector<1x8x128xf32>,
    %13 = vector.shape_cast %8 : vector<1x128xf32> to vector<1x1x128xf32>
    %14 = vector.shape_cast %13 : vector<1x1x128xf32> to vector<1x1x128xf32>
    %15 = vector.broadcast %14 : vector<1x1x128xf32> to vector<1x8x128xf32>
    %c0_10 = arith.constant 0 : index
    %c0_11 = arith.constant 0 : index
    %c0_12 = arith.constant 0 : index
    %16 = vector.load %arg5[%c0_10, %c0_11, %c0_12] : memref<1x8x128xf32, #tpu.memory_space<vmem>>, vector<1x8x128xf32>
    tpu.vector_store %arg5[%c0_10, %c0_11, %c0_12], %15 {strides = array<i32>} : memref<1x8x128xf32, #tpu.memory_space<vmem>>, vector<1x8x128xf32>,
    return
  }
  func.func @transform_0(%arg0: i32) -> (i32, i32) {
    %c0_i32 = arith.constant 0 : i32
    %c0_i32_0 = arith.constant 0 : i32
    return %arg0, %c0_i32 : i32, i32
  }
  func.func @transform_1(%arg0: i32) -> (i32, i32) {
    %c0_i32 = arith.constant 0 : i32
    %c0_i32_0 = arith.constant 0 : i32
    %c0_i32_1 = arith.constant 0 : i32
    return %c0_i32, %c0_i32_0 : i32, i32
  }
  func.func @transform_2(%arg0: i32) -> (i32, i32) {
    %c0_i32 = arith.constant 0 : i32
    %c0_i32_0 = arith.constant 0 : i32
    return %arg0, %c0_i32 : i32, i32
  }
  func.func @transform_3(%arg0: i32) -> (i32, i32, i32) {
    %c0_i32 = arith.constant 0 : i32
    %c0_i32_0 = arith.constant 0 : i32
    %c0_i32_1 = arith.constant 0 : i32
    return %arg0, %c0_i32, %c0_i32_0 : i32, i32, i32
  }
  func.func @transform_4(%arg0: i32) -> (i32, i32, i32) {
    %c0_i32 = arith.constant 0 : i32
    %c0_i32_0 = arith.constant 0 : i32
    %c0_i32_1 = arith.constant 0 : i32
    return %arg0, %c0_i32, %c0_i32_0 : i32, i32, i32
  }
}

module attributes {stable_mosaic.version = 11 : i64} {
  func.func @_matmul_stats_kernel(%arg0: i32, %arg1: memref<128x128xbf16, #tpu.memory_space<vmem>>, %arg2: memref<128x128xbf16, #tpu.memory_space<vmem>>, %arg3: memref<128x128xf32, #tpu.memory_space<vmem>>, %arg4: memref<1x8x128xf32, #tpu.memory_space<vmem>>, %arg5: memref<1x8x128xf32, #tpu.memory_space<vmem>>) attributes {dimension_semantics = [#tpu.dimension_semantics<parallel>], iteration_bounds = array<i64: 1>, scalar_prefetch = 0 : i64, scratch_operands = 0 : i64, tpu.core_type = #tpu.core_type<tc>, window_params = [{transform_indices = @transform_0, window_bounds = array<i64: 128, 128>}, {pipeline_mode = #tpu.pipeline_mode<synchronous>, transform_indices = @transform_1, window_bounds = array<i64: 128, 128>}, {transform_indices = @transform_2, window_bounds = array<i64: 128, 128>}, {transform_indices = @transform_3, window_bounds = array<i64: 1, 8, 128>}, {transform_indices = @transform_4, window_bounds = array<i64: 1, 8, 128>}]} {
    %c0 = arith.constant 0 : index
    %c0_0 = arith.constant 0 : index
    %0 = vector.load %arg1[%c0, %c0_0] : memref<128x128xbf16, #tpu.memory_space<vmem>>, vector<128x128xbf16>
    %c0_1 = arith.constant 0 : index
    %c0_2 = arith.constant 0 : index
    %1 = vector.load %arg2[%c0_1, %c0_2] : memref<128x128xbf16, #tpu.memory_space<vmem>>, vector<128x128xbf16>
    %cst = arith.constant dense<0.000000e+00> : vector<128x128xf32>
    %2 = tpu.matmul %0, %1, %cst {dimension_numbers = #tpu.dot_dimension_numbers<[1], [0], [0], [1], [0, 0, 1, 1], [], []>} : vector<128x128xbf16>, vector<128x128xbf16>, vector<128x128xf32> -> vector<128x128xf32>
    %c0_3 = arith.constant 0 : index
    %c0_4 = arith.constant 0 : index
    %3 = vector.load %arg3[%c0_3, %c0_4] : memref<128x128xf32, #tpu.memory_space<vmem>>, vector<128x128xf32>
    tpu.vector_store %arg3[%c0_3, %c0_4], %2 {strides = array<i32>} : memref<128x128xf32, #tpu.memory_space<vmem>>, vector<128x128xf32>,
    %cst_5 = arith.constant dense<0.000000e+00> : vector<128xf32>
    %4 = vector.multi_reduction <add>, %2, %cst_5 [0] : vector<128x128xf32> to vector<128xf32>
    %5 = vector.shape_cast %4 : vector<128xf32> to vector<1x128xf32>
    %6 = arith.mulf %2, %2 : vector<128x128xf32>
    %cst_6 = arith.constant dense<0.000000e+00> : vector<128xf32>
    %7 = vector.multi_reduction <add>, %6, %cst_6 [0] : vector<128x128xf32> to vector<128xf32>
    %8 = vector.shape_cast %7 : vector<128xf32> to vector<1x128xf32>
    %9 = vector.shape_cast %5 : vector<1x128xf32> to vector<1x1x128xf32>
    %10 = vector.shape_cast %9 : vector<1x1x128xf32> to vector<1x1x128xf32>
    %11 = vector.broadcast %10 : vector<1x1x128xf32> to vector<1x8x128xf32>
    %c0_7 = arith.constant 0 : index
    %c0_8 = arith.constant 0 : index
    %c0_9 = arith.constant 0 : index
    %12 = vector.load %arg4[%c0_7, %c0_8, %c0_9] : memref<1x8x128xf32, #tpu.memory_space<vmem>>, vector<1x8x128xf32>
    tpu.vector_store %arg4[%c0_7, %c0_8, %c0_9], %11 {strides = array<i32>} : memref<1x8x128xf32, #tpu.memory_space<vmem>>, vector<1x8x128xf32>,
    %13 = vector.shape_cast %8 : vector<1x128xf32> to vector<1x1x128xf32>
    %14 = vector.shape_cast %13 : vector<1x1x128xf32> to vector<1x1x128xf32>
    %15 = vector.broadcast %14 : vector<1x1x128xf32> to vector<1x8x128xf32>
    %c0_10 = arith.constant 0 : index
    %c0_11 = arith.constant 0 : index
    %c0_12 = arith.constant 0 : index
    %16 = vector.load %arg5[%c0_10, %c0_11, %c0_12] : memref<1x8x128xf32, #tpu.memory_space<vmem>>, vector<1x8x128xf32>
    tpu.vector_store %arg5[%c0_10, %c0_11, %c0_12], %15 {strides = array<i32>} : memref<1x8x128xf32, #tpu.memory_space<vmem>>, vector<1x8x128xf32>,
    return
  }
  func.func @transform_0(%arg0: i32) -> (i32, i32) {
    %c0_i32 = arith.constant 0 : i32
    %c0_i32_0 = arith.constant 0 : i32
    return %arg0, %c0_i32 : i32, i32
  }
  func.func @transform_1(%arg0: i32) -> (i32, i32) {
    %c0_i32 = arith.constant 0 : i32
    %c0_i32_0 = arith.constant 0 : i32
    %c0_i32_1 = arith.constant 0 : i32
    return %c0_i32, %c0_i32_0 : i32, i32
  }
  func.func @transform_2(%arg0: i32) -> (i32, i32) {
    %c0_i32 = arith.constant 0 : i32
    %c0_i32_0 = arith.constant 0 : i32
    return %arg0, %c0_i32 : i32, i32
  }
  func.func @transform_3(%arg0: i32) -> (i32, i32, i32) {
    %c0_i32 = arith.constant 0 : i32
    %c0_i32_0 = arith.constant 0 : i32
    %c0_i32_1 = arith.constant 0 : i32
    return %arg0, %c0_i32, %c0_i32_0 : i32, i32, i32
  }
  func.func @transform_4(%arg0: i32) -> (i32, i32, i32) {
    %c0_i32 = arith.constant 0 : i32
    %c0_i32_0 = arith.constant 0 : i32
    %c0_i32_1 = arith.constant 0 : i32
    return %arg0, %c0_i32, %c0_i32_0 : i32, i32, i32
  }
}

module attributes {stable_mosaic.version = 11 : i64} {
  func.func @_bn_act_res_kernel(%arg0: i32, %arg1: memref<128x128xf32, #tpu.memory_space<vmem>>, %arg2: memref<1x128xf32, #tpu.memory_space<vmem>>, %arg3: memref<1x128xf32, #tpu.memory_space<vmem>>, %arg4: memref<128x128xbf16, #tpu.memory_space<vmem>>, %arg5: memref<128x128xbf16, #tpu.memory_space<vmem>>) attributes {dimension_semantics = [#tpu.dimension_semantics<parallel>], iteration_bounds = array<i64: 1>, scalar_prefetch = 0 : i64, scratch_operands = 0 : i64, tpu.core_type = #tpu.core_type<tc>, window_params = [{transform_indices = @transform_0, window_bounds = array<i64: 128, 128>}, {pipeline_mode = #tpu.pipeline_mode<synchronous>, transform_indices = @transform_1, window_bounds = array<i64: 1, 128>}, {pipeline_mode = #tpu.pipeline_mode<synchronous>, transform_indices = @transform_2, window_bounds = array<i64: 1, 128>}, {transform_indices = @transform_3, window_bounds = array<i64: 128, 128>}, {transform_indices = @transform_4, window_bounds = array<i64: 128, 128>}]} {
    %c0 = arith.constant 0 : index
    %c0_0 = arith.constant 0 : index
    %0 = vector.load %arg1[%c0, %c0_0] : memref<128x128xf32, #tpu.memory_space<vmem>>, vector<128x128xf32>
    %c0_1 = arith.constant 0 : index
    %c0_2 = arith.constant 0 : index
    %1 = vector.load %arg2[%c0_1, %c0_2] : memref<1x128xf32, #tpu.memory_space<vmem>>, vector<1x128xf32>
    %2 = vector.broadcast %1 : vector<1x128xf32> to vector<128x128xf32>
    %3 = arith.mulf %0, %2 : vector<128x128xf32>
    %c0_3 = arith.constant 0 : index
    %c0_4 = arith.constant 0 : index
    %4 = vector.load %arg3[%c0_3, %c0_4] : memref<1x128xf32, #tpu.memory_space<vmem>>, vector<1x128xf32>
    %5 = vector.broadcast %4 : vector<1x128xf32> to vector<128x128xf32>
    %6 = arith.addf %3, %5 : vector<128x128xf32>
    %c0_5 = arith.constant 0 : index
    %c0_6 = arith.constant 0 : index
    %7 = vector.load %arg4[%c0_5, %c0_6] : memref<128x128xbf16, #tpu.memory_space<vmem>>, vector<128x128xbf16>
    %8 = arith.extf %7 : vector<128x128xbf16> to vector<128x128xf32>
    %9 = arith.addf %6, %8 : vector<128x128xf32>
    %cst = arith.constant 0.000000e+00 : f32
    %10 = vector.broadcast %cst : f32 to vector<128x128xf32>
    %11 = arith.maximumf %9, %10 : vector<128x128xf32>
    %12 = arith.truncf %11 : vector<128x128xf32> to vector<128x128xbf16>
    %c0_7 = arith.constant 0 : index
    %c0_8 = arith.constant 0 : index
    %13 = vector.load %arg5[%c0_7, %c0_8] : memref<128x128xbf16, #tpu.memory_space<vmem>>, vector<128x128xbf16>
    tpu.vector_store %arg5[%c0_7, %c0_8], %12 {strides = array<i32>} : memref<128x128xbf16, #tpu.memory_space<vmem>>, vector<128x128xbf16>,
    return
  }
  func.func @transform_0(%arg0: i32) -> (i32, i32) {
    %c0_i32 = arith.constant 0 : i32
    %c0_i32_0 = arith.constant 0 : i32
    return %arg0, %c0_i32 : i32, i32
  }
  func.func @transform_1(%arg0: i32) -> (i32, i32) {
    %c0_i32 = arith.constant 0 : i32
    %c0_i32_0 = arith.constant 0 : i32
    %c0_i32_1 = arith.constant 0 : i32
    return %c0_i32, %c0_i32_0 : i32, i32
  }
  func.func @transform_2(%arg0: i32) -> (i32, i32) {
    %c0_i32 = arith.constant 0 : i32
    %c0_i32_0 = arith.constant 0 : i32
    %c0_i32_1 = arith.constant 0 : i32
    return %c0_i32, %c0_i32_0 : i32, i32
  }
  func.func @transform_3(%arg0: i32) -> (i32, i32) {
    %c0_i32 = arith.constant 0 : i32
    %c0_i32_0 = arith.constant 0 : i32
    return %arg0, %c0_i32 : i32, i32
  }
  func.func @transform_4(%arg0: i32) -> (i32, i32) {
    %c0_i32 = arith.constant 0 : i32
    %c0_i32_0 = arith.constant 0 : i32
    return %arg0, %c0_i32 : i32, i32
  }
}

module attributes {stable_mosaic.version = 11 : i64} {
  func.func @_matmul_stats_kernel(%arg0: i32, %arg1: memref<512x128xbf16, #tpu.memory_space<vmem>>, %arg2: memref<128x128xbf16, #tpu.memory_space<vmem>>, %arg3: memref<512x128xf32, #tpu.memory_space<vmem>>, %arg4: memref<1x8x128xf32, #tpu.memory_space<vmem>>, %arg5: memref<1x8x128xf32, #tpu.memory_space<vmem>>) attributes {dimension_semantics = [#tpu.dimension_semantics<parallel>], iteration_bounds = array<i64: 8>, scalar_prefetch = 0 : i64, scratch_operands = 0 : i64, tpu.core_type = #tpu.core_type<tc>, window_params = [{transform_indices = @transform_0, window_bounds = array<i64: 512, 128>}, {pipeline_mode = #tpu.pipeline_mode<synchronous>, transform_indices = @transform_1, window_bounds = array<i64: 128, 128>}, {transform_indices = @transform_2, window_bounds = array<i64: 512, 128>}, {transform_indices = @transform_3, window_bounds = array<i64: 1, 8, 128>}, {transform_indices = @transform_4, window_bounds = array<i64: 1, 8, 128>}]} {
    %c0 = arith.constant 0 : index
    %c0_0 = arith.constant 0 : index
    %0 = vector.load %arg1[%c0, %c0_0] : memref<512x128xbf16, #tpu.memory_space<vmem>>, vector<512x128xbf16>
    %c0_1 = arith.constant 0 : index
    %c0_2 = arith.constant 0 : index
    %1 = vector.load %arg2[%c0_1, %c0_2] : memref<128x128xbf16, #tpu.memory_space<vmem>>, vector<128x128xbf16>
    %cst = arith.constant dense<0.000000e+00> : vector<512x128xf32>
    %2 = tpu.matmul %0, %1, %cst {dimension_numbers = #tpu.dot_dimension_numbers<[1], [0], [0], [1], [0, 0, 1, 1], [], []>} : vector<512x128xbf16>, vector<128x128xbf16>, vector<512x128xf32> -> vector<512x128xf32>
    %c0_3 = arith.constant 0 : index
    %c0_4 = arith.constant 0 : index
    %3 = vector.load %arg3[%c0_3, %c0_4] : memref<512x128xf32, #tpu.memory_space<vmem>>, vector<512x128xf32>
    tpu.vector_store %arg3[%c0_3, %c0_4], %2 {strides = array<i32>} : memref<512x128xf32, #tpu.memory_space<vmem>>, vector<512x128xf32>,
    %cst_5 = arith.constant dense<0.000000e+00> : vector<128xf32>
    %4 = vector.multi_reduction <add>, %2, %cst_5 [0] : vector<512x128xf32> to vector<128xf32>
    %5 = vector.shape_cast %4 : vector<128xf32> to vector<1x128xf32>
    %6 = arith.mulf %2, %2 : vector<512x128xf32>
    %cst_6 = arith.constant dense<0.000000e+00> : vector<128xf32>
    %7 = vector.multi_reduction <add>, %6, %cst_6 [0] : vector<512x128xf32> to vector<128xf32>
    %8 = vector.shape_cast %7 : vector<128xf32> to vector<1x128xf32>
    %9 = vector.shape_cast %5 : vector<1x128xf32> to vector<1x1x128xf32>
    %10 = vector.shape_cast %9 : vector<1x1x128xf32> to vector<1x1x128xf32>
    %11 = vector.broadcast %10 : vector<1x1x128xf32> to vector<1x8x128xf32>
    %c0_7 = arith.constant 0 : index
    %c0_8 = arith.constant 0 : index
    %c0_9 = arith.constant 0 : index
    %12 = vector.load %arg4[%c0_7, %c0_8, %c0_9] : memref<1x8x128xf32, #tpu.memory_space<vmem>>, vector<1x8x128xf32>
    tpu.vector_store %arg4[%c0_7, %c0_8, %c0_9], %11 {strides = array<i32>} : memref<1x8x128xf32, #tpu.memory_space<vmem>>, vector<1x8x128xf32>,
    %13 = vector.shape_cast %8 : vector<1x128xf32> to vector<1x1x128xf32>
    %14 = vector.shape_cast %13 : vector<1x1x128xf32> to vector<1x1x128xf32>
    %15 = vector.broadcast %14 : vector<1x1x128xf32> to vector<1x8x128xf32>
    %c0_10 = arith.constant 0 : index
    %c0_11 = arith.constant 0 : index
    %c0_12 = arith.constant 0 : index
    %16 = vector.load %arg5[%c0_10, %c0_11, %c0_12] : memref<1x8x128xf32, #tpu.memory_space<vmem>>, vector<1x8x128xf32>
    tpu.vector_store %arg5[%c0_10, %c0_11, %c0_12], %15 {strides = array<i32>} : memref<1x8x128xf32, #tpu.memory_space<vmem>>, vector<1x8x128xf32>,
    return
  }
  func.func @transform_0(%arg0: i32) -> (i32, i32) {
    %c0_i32 = arith.constant 0 : i32
    %c0_i32_0 = arith.constant 0 : i32
    return %arg0, %c0_i32 : i32, i32
  }
  func.func @transform_1(%arg0: i32) -> (i32, i32) {
    %c0_i32 = arith.constant 0 : i32
    %c0_i32_0 = arith.constant 0 : i32
    %c0_i32_1 = arith.constant 0 : i32
    return %c0_i32, %c0_i32_0 : i32, i32
  }
  func.func @transform_2(%arg0: i32) -> (i32, i32) {
    %c0_i32 = arith.constant 0 : i32
    %c0_i32_0 = arith.constant 0 : i32
    return %arg0, %c0_i32 : i32, i32
  }
  func.func @transform_3(%arg0: i32) -> (i32, i32, i32) {
    %c0_i32 = arith.constant 0 : i32
    %c0_i32_0 = arith.constant 0 : i32
    %c0_i32_1 = arith.constant 0 : i32
    return %arg0, %c0_i32, %c0_i32_0 : i32, i32, i32
  }
  func.func @transform_4(%arg0: i32) -> (i32, i32, i32) {
    %c0_i32 = arith.constant 0 : i32
    %c0_i32_0 = arith.constant 0 : i32
    %c0_i32_1 = arith.constant 0 : i32
    return %arg0, %c0_i32, %c0_i32_0 : i32, i32, i32
  }
}

module attributes {stable_mosaic.version = 11 : i64} {
  func.func @_bn_act_kernel(%arg0: i32, %arg1: memref<512x128xf32, #tpu.memory_space<vmem>>, %arg2: memref<1x128xf32, #tpu.memory_space<vmem>>, %arg3: memref<1x128xf32, #tpu.memory_space<vmem>>, %arg4: memref<512x128xbf16, #tpu.memory_space<vmem>>) attributes {dimension_semantics = [#tpu.dimension_semantics<parallel>], iteration_bounds = array<i64: 8>, scalar_prefetch = 0 : i64, scratch_operands = 0 : i64, tpu.core_type = #tpu.core_type<tc>, window_params = [{transform_indices = @transform_0, window_bounds = array<i64: 512, 128>}, {pipeline_mode = #tpu.pipeline_mode<synchronous>, transform_indices = @transform_1, window_bounds = array<i64: 1, 128>}, {pipeline_mode = #tpu.pipeline_mode<synchronous>, transform_indices = @transform_2, window_bounds = array<i64: 1, 128>}, {transform_indices = @transform_3, window_bounds = array<i64: 512, 128>}]} {
    %c0 = arith.constant 0 : index
    %c0_0 = arith.constant 0 : index
    %0 = vector.load %arg1[%c0, %c0_0] : memref<512x128xf32, #tpu.memory_space<vmem>>, vector<512x128xf32>
    %c0_1 = arith.constant 0 : index
    %c0_2 = arith.constant 0 : index
    %1 = vector.load %arg2[%c0_1, %c0_2] : memref<1x128xf32, #tpu.memory_space<vmem>>, vector<1x128xf32>
    %2 = vector.broadcast %1 : vector<1x128xf32> to vector<512x128xf32>
    %3 = arith.mulf %0, %2 : vector<512x128xf32>
    %c0_3 = arith.constant 0 : index
    %c0_4 = arith.constant 0 : index
    %4 = vector.load %arg3[%c0_3, %c0_4] : memref<1x128xf32, #tpu.memory_space<vmem>>, vector<1x128xf32>
    %5 = vector.broadcast %4 : vector<1x128xf32> to vector<512x128xf32>
    %6 = arith.addf %3, %5 : vector<512x128xf32>
    %7 = arith.truncf %6 : vector<512x128xf32> to vector<512x128xbf16>
    %c0_5 = arith.constant 0 : index
    %c0_6 = arith.constant 0 : index
    %8 = vector.load %arg4[%c0_5, %c0_6] : memref<512x128xbf16, #tpu.memory_space<vmem>>, vector<512x128xbf16>
    tpu.vector_store %arg4[%c0_5, %c0_6], %7 {strides = array<i32>} : memref<512x128xbf16, #tpu.memory_space<vmem>>, vector<512x128xbf16>,
    return
  }
  func.func @transform_0(%arg0: i32) -> (i32, i32) {
    %c0_i32 = arith.constant 0 : i32
    %c0_i32_0 = arith.constant 0 : i32
    return %arg0, %c0_i32 : i32, i32
  }
  func.func @transform_1(%arg0: i32) -> (i32, i32) {
    %c0_i32 = arith.constant 0 : i32
    %c0_i32_0 = arith.constant 0 : i32
    %c0_i32_1 = arith.constant 0 : i32
    return %c0_i32, %c0_i32_0 : i32, i32
  }
  func.func @transform_2(%arg0: i32) -> (i32, i32) {
    %c0_i32 = arith.constant 0 : i32
    %c0_i32_0 = arith.constant 0 : i32
    %c0_i32_1 = arith.constant 0 : i32
    return %c0_i32, %c0_i32_0 : i32, i32
  }
  func.func @transform_3(%arg0: i32) -> (i32, i32) {
    %c0_i32 = arith.constant 0 : i32
    %c0_i32_0 = arith.constant 0 : i32
    return %arg0, %c0_i32 : i32, i32
  }
}

module attributes {stable_mosaic.version = 11 : i64} {
  func.func @_bn_act_res_kernel(%arg0: i32, %arg1: memref<256x128xf32, #tpu.memory_space<vmem>>, %arg2: memref<1x128xf32, #tpu.memory_space<vmem>>, %arg3: memref<1x128xf32, #tpu.memory_space<vmem>>, %arg4: memref<256x128xbf16, #tpu.memory_space<vmem>>, %arg5: memref<256x128xf32, #tpu.memory_space<vmem>>) attributes {dimension_semantics = [#tpu.dimension_semantics<parallel>], iteration_bounds = array<i64: 2>, scalar_prefetch = 0 : i64, scratch_operands = 0 : i64, tpu.core_type = #tpu.core_type<tc>, window_params = [{transform_indices = @transform_0, window_bounds = array<i64: 256, 128>}, {pipeline_mode = #tpu.pipeline_mode<synchronous>, transform_indices = @transform_1, window_bounds = array<i64: 1, 128>}, {pipeline_mode = #tpu.pipeline_mode<synchronous>, transform_indices = @transform_2, window_bounds = array<i64: 1, 128>}, {transform_indices = @transform_3, window_bounds = array<i64: 256, 128>}, {transform_indices = @transform_4, window_bounds = array<i64: 256, 128>}]} {
    %c0 = arith.constant 0 : index
    %c0_0 = arith.constant 0 : index
    %0 = vector.load %arg1[%c0, %c0_0] : memref<256x128xf32, #tpu.memory_space<vmem>>, vector<256x128xf32>
    %c0_1 = arith.constant 0 : index
    %c0_2 = arith.constant 0 : index
    %1 = vector.load %arg2[%c0_1, %c0_2] : memref<1x128xf32, #tpu.memory_space<vmem>>, vector<1x128xf32>
    %2 = vector.broadcast %1 : vector<1x128xf32> to vector<256x128xf32>
    %3 = arith.mulf %0, %2 : vector<256x128xf32>
    %c0_3 = arith.constant 0 : index
    %c0_4 = arith.constant 0 : index
    %4 = vector.load %arg3[%c0_3, %c0_4] : memref<1x128xf32, #tpu.memory_space<vmem>>, vector<1x128xf32>
    %5 = vector.broadcast %4 : vector<1x128xf32> to vector<256x128xf32>
    %6 = arith.addf %3, %5 : vector<256x128xf32>
    %c0_5 = arith.constant 0 : index
    %c0_6 = arith.constant 0 : index
    %7 = vector.load %arg4[%c0_5, %c0_6] : memref<256x128xbf16, #tpu.memory_space<vmem>>, vector<256x128xbf16>
    %8 = arith.extf %7 : vector<256x128xbf16> to vector<256x128xf32>
    %9 = arith.addf %6, %8 : vector<256x128xf32>
    %cst = arith.constant 0.000000e+00 : f32
    %10 = vector.broadcast %cst : f32 to vector<256x128xf32>
    %11 = arith.maximumf %9, %10 : vector<256x128xf32>
    %c0_7 = arith.constant 0 : index
    %c0_8 = arith.constant 0 : index
    %12 = vector.load %arg5[%c0_7, %c0_8] : memref<256x128xf32, #tpu.memory_space<vmem>>, vector<256x128xf32>
    tpu.vector_store %arg5[%c0_7, %c0_8], %11 {strides = array<i32>} : memref<256x128xf32, #tpu.memory_space<vmem>>, vector<256x128xf32>,
    return
  }
  func.func @transform_0(%arg0: i32) -> (i32, i32) {
    %c0_i32 = arith.constant 0 : i32
    %c0_i32_0 = arith.constant 0 : i32
    return %arg0, %c0_i32 : i32, i32
  }
  func.func @transform_1(%arg0: i32) -> (i32, i32) {
    %c0_i32 = arith.constant 0 : i32
    %c0_i32_0 = arith.constant 0 : i32
    %c0_i32_1 = arith.constant 0 : i32
    return %c0_i32, %c0_i32_0 : i32, i32
  }
  func.func @transform_2(%arg0: i32) -> (i32, i32) {
    %c0_i32 = arith.constant 0 : i32
    %c0_i32_0 = arith.constant 0 : i32
    %c0_i32_1 = arith.constant 0 : i32
    return %c0_i32, %c0_i32_0 : i32, i32
  }
  func.func @transform_3(%arg0: i32) -> (i32, i32) {
    %c0_i32 = arith.constant 0 : i32
    %c0_i32_0 = arith.constant 0 : i32
    return %arg0, %c0_i32 : i32, i32
  }
  func.func @transform_4(%arg0: i32) -> (i32, i32) {
    %c0_i32 = arith.constant 0 : i32
    %c0_i32_0 = arith.constant 0 : i32
    return %arg0, %c0_i32 : i32, i32
  }
}

</mosaic_0001>

<bundles_post_ra>
// kernel: hourglass_forward.45
= control target key start
LH: loop header
LB: loop body
LE: loop exit
PB: predicated region body
PF: predicated region fallthrough
CT: control target
= control target key end

     0   :  { %s740_s12 = smov 0   ;;  %s887_s0 = inlined_call_operand.vmem [shape: f32[512,128], index: 0, kind: input, shape index: {}]   ;;  %s888_s1 = inlined_call_operand.vmem [shape: f32[1,128], index: 1, kind: input, shape index: {}]   ;;  %s889_s2 = inlined_call_operand.vmem [shape: f32[1,128], index: 2, kind: input, shape index: {}]   ;;  %s890_s3 = inlined_call_operand.vmem [shape: bf16[512,128], index: 3, kind: output, shape index: {}]  }
   0x1 LB: > { %s532_s13 = sadd.s32 4294967295, %s718_s12   ;;  %p536_p0 = scmp.ge.s32.totalorder %s718_s12, 1  ;;  %s718_s12 = sphi %s740_s12, %s13_s12  }
   0x2   : > { %p138_p1 = scmp.lt.s32.totalorder %s718_s12, 3 }
   0x4   : > { %p139_p2 = pnand %p536_p0, %p138_p1 }
   0x5   : > { %s537_s14 = sshll.u32 (!%p139_p2), %s532_s13, 5  ;;  %v754_v0 = vld [vmem:[%s888_s1] ss:$0 sm:$0xff] (!%p139_p2) }
   0x6   : > { %142 = sbr.rel (%p139_p2) target bundleno = 51 (0x33), region = 32  ;;  %p163_p3 = scmp.lt.s32.totalorder (!%p139_p2), %s537_s14, 63  ;;  %v764_v1 = vld [vmem:[%s889_s2] ss:$0 sm:$0xff] (!%p139_p2) }
   0xd   : > { %s892_s14 = smov (!%p163_p3, %s537_s14), 63 }
   0xe   : > { %s538_s15 = sshll.u32 %s892_s14, 3  ;;  %s540_s23 = sshll.u32 %s892_s14, 2 }
   0xf   : > { %s759_s20 = scalar_lea.vmem %s887_s0, %s538_s15  ;;  %s796_s26 = scalar_lea.vmem %s890_s3, %s540_s23 }
  0x10   : > { %v174_v2 = vld [vmem:[%s759_s20] sm:$0xff]  ;;  %v175_v3 = vld [vmem:[%s759_s20 + $0x8] sm:$0xff]  ;;  %v176_v4 = vld [vmem:[%s759_s20 + $0x10] sm:$0xff] }
  0x11   : > { %v213_v5 = vmul.f32 %v754_v0, %v174_v2  ;;  %v214_v6 = vmul.f32 %v754_v0, %v175_v3  ;;  %v177_v7 = vld [vmem:[%s759_s20 + $0x18] sm:$0xff]  ;;  %v215_v8 = vmul.f32 %v754_v0, %v176_v4  ;;  %v178_v9 = vld [vmem:[%s759_s20 + $0x20] sm:$0xff]  ;;  %v179_v10 = vld [vmem:[%s759_s20 + $0x28] sm:$0xff] }
  0x12   : > { %v216_v11 = vmul.f32 %v754_v0, %v177_v7  ;;  %v217_v12 = vmul.f32 %v754_v0, %v178_v9  ;;  %v218_v13 = vmul.f32 %v754_v0, %v179_v10  ;;  %v180_v14 = vld [vmem:[%s759_s20 + $0x30] sm:$0xff]  ;;  %v181_v15 = vld [vmem:[%s759_s20 + $0x38] sm:$0xff]  ;;  %v182_v24 = vld [vmem:[%s759_s20 + $0x40] sm:$0xff] }
  0x13   : > { %v252_v16 = vadd.f32 %v764_v1, %v213_v5  ;;  %v253_v17 = vadd.f32 %v764_v1, %v214_v6  ;;  %v254_v18 = vadd.f32 %v764_v1, %v215_v8  ;;  %v219_v19 = vmul.f32 %v754_v0, %v180_v14  ;;  %v183_v25 = vld [vmem:[%s759_s20 + $0x48] sm:$0xff]  ;;  %v184_v30 = vld [vmem:[%s759_s20 + $0x50] sm:$0xff]  ;;  %v185_v35 = vld [vmem:[%s759_s20 + $0x58] sm:$0xff] }
  0x14   : > { %v255_v20 = vadd.f32 %v764_v1, %v216_v11  ;;  %v256_v21 = vadd.f32 %v764_v1, %v217_v12  ;;  %v257_v22 = vadd.f32 %v764_v1, %v218_v13  ;;  %v220_v23 = vmul.f32 %v754_v0, %v181_v15  ;;  %v186_v36 = vld [vmem:[%s759_s20 + $0x60] sm:$0xff]  ;;  %v187_v41 = vld [vmem:[%s759_s20 + $0x68] sm:$0xff]  ;;  %v188_v42 = vld [vmem:[%s759_s20 + $0x70] sm:$0xff] }
  0x15   : > { %v284_v26 = vmax.f32 %v252_v16, 0.0  ;;  %v285_v27 = vmax.f32 %v253_v17, 0.0  ;;  %v286_v28 = vmax.f32 %v254_v18, 0.0  ;;  %v258_v29 = vadd.f32 %v764_v1, %v219_v19  ;;  %v189_v51 = vld [vmem:[%s759_s20 + $0x78] sm:$0xff]  ;;  %v190_v56 = vld [vmem:[%s759_s20 + $0x80] sm:$0xff]  ;;  %v191_v61 = vld [vmem:[%s759_s20 + $0x88] sm:$0xff] }
  0x16   : > { %v287_v31 = vmax.f32 %v255_v20, 0.0  ;;  %v288_v32 = vmax.f32 %v256_v21, 0.0  ;;  %v289_v33 = vmax.f32 %v257_v22, 0.0  ;;  %v259_v34 = vadd.f32 %v764_v1, %v220_v23  ;;  %v192_v4 = vld [vmem:[%s759_s20 + $0x90] sm:$0xff]  ;;  %v193_v5 = vld [vmem:[%s759_s20 + $0x98] sm:$0xff]  ;;  %v194_v10 = vld [vmem:[%s759_s20 + $0xa0] sm:$0xff] }
  0x17   : > { %v612_v37 = vpack.c.bf16 %v285_v27, %v284_v26  ;;  %v290_v38 = vmax.f32 %v258_v29, 0.0  ;;  %v221_v39 = vmul.f32 %v754_v0, %v182_v24  ;;  %v222_v40 = vmul.f32 %v754_v0, %v183_v25  ;;  %v195_v15 = vld [vmem:[%s759_s20 + $0xa8] sm:$0xff]  ;;  %v196_v20 = vld [vmem:[%s759_s20 + $0xb0] sm:$0xff]  ;;  %v197_v25 = vld [vmem:[%s759_s20 + $0xb8] sm:$0xff] }
  0x18   : > { %v617_v43 = vpack.c.bf16 %v287_v31, %v286_v28  ;;  %v622_v44 = vpack.c.bf16 %v289_v33, %v288_v32  ;;  %v291_v45 = vmax.f32 %v259_v34, 0.0  ;;  %v223_v46 = vmul.f32 %v754_v0, %v184_v30  ;;  %v198_v30 = vld [vmem:[%s759_s20 + $0xc0] sm:$0xff] }
  0x19   : > { %613 = vst [vmem:[%s796_s26] sm:$0xff] %v612_v37   ;;  %v260_v47 = vadd.f32 %v764_v1, %v221_v39  ;;  %v261_v48 = vadd.f32 %v764_v1, %v222_v40  ;;  %v224_v49 = vmul.f32 %v754_v0, %v185_v35  ;;  %v225_v50 = vmul.f32 %v754_v0, %v186_v36  ;;  %v199_v35 = vld [vmem:[%s759_s20 + $0xc8] sm:$0xff]  ;;  %v200_v40 = vld [vmem:[%s759_s20 + $0xd0] sm:$0xff] }
  0x1a   : > { %689 = vst [vmem:[%s796_s26 + $0x8] sm:$0xff] %v617_v43   ;;  %690 = vst [vmem:[%s796_s26 + $0x10] sm:$0xff] %v622_v44   ;;  %v627_v52 = vpack.c.bf16 %v291_v45, %v290_v38  ;;  %v262_v53 = vadd.f32 %v764_v1, %v223_v46  ;;  %v226_v54 = vmul.f32 %v754_v0, %v187_v41  ;;  %v201_v41 = vld [vmem:[%s759_s20 + $0xd8] sm:$0xff]  ;;  %v202_v46 = vld [vmem:[%s759_s20 + $0xe0] sm:$0xff] }
  0x1b   : > { %v227_v55 = vmul.f32 %v754_v0, %v188_v42  ;;  %v292_v57 = vmax.f32 %v260_v47, 0.0  ;;  %v293_v58 = vmax.f32 %v261_v48, 0.0  ;;  %v263_v59 = vadd.f32 %v764_v1, %v224_v49 }
  0x1c   : > { %v264_v60 = vadd.f32 %v764_v1, %v225_v50  ;;  %691 = vst [vmem:[%s796_s26 + $0x18] sm:$0xff] %v627_v52   ;;  %v294_v62 = vmax.f32 %v262_v53, 0.0  ;;  %v265_v63 = vadd.f32 %v764_v1, %v226_v54  ;;  %v228_v2 = vmul.f32 %v754_v0, %v189_v51  ;;  %v203_v51 = vld [vmem:[%s759_s20 + $0xe8] sm:$0xff] }
  0x1d   : > { %v266_v3 = vadd.f32 %v764_v1, %v227_v55  ;;  %v632_v6 = vpack.c.bf16 %v293_v58, %v292_v57  ;;  %v295_v7 = vmax.f32 %v263_v59, 0.0  ;;  %v229_v9 = vmul.f32 %v754_v0, %v190_v56  ;;  %v204_v56 = vld [vmem:[%s759_s20 + $0xf0] sm:$0xff] }
  0x1e   : > { %v296_v8 = vmax.f32 %v264_v60, 0.0  ;;  %v297_v11 = vmax.f32 %v265_v63, 0.0  ;;  %v267_v12 = vadd.f32 %v764_v1, %v228_v2  ;;  %v230_v14 = vmul.f32 %v754_v0, %v191_v61  ;;  %v205_v61 = vld [vmem:[%s759_s20 + $0xf8] sm:$0xff] }
  0x1f   : > { %v298_v13 = vmax.f32 %v266_v3, 0.0  ;;  %692 = vst [vmem:[%s796_s26 + $0x20] sm:$0xff] %v632_v6   ;;  %v637_v16 = vpack.c.bf16 %v295_v7, %v294_v62  ;;  %v268_v17 = vadd.f32 %v764_v1, %v229_v9  ;;  %v231_v18 = vmul.f32 %v754_v0, %v192_v4 }
  0x20   : > { %v232_v19 = vmul.f32 %v754_v0, %v193_v5  ;;  %v642_v21 = vpack.c.bf16 %v297_v11, %v296_v8  ;;  %v299_v22 = vmax.f32 %v267_v12, 0.0  ;;  %v269_v23 = vadd.f32 %v764_v1, %v230_v14 }
  0x21   : > { %v233_v24 = vmul.f32 %v754_v0, %v194_v10  ;;  %693 = vst [vmem:[%s796_s26 + $0x28] sm:$0xff] %v637_v16   ;;  %v300_v26 = vmax.f32 %v268_v17, 0.0  ;;  %v270_v27 = vadd.f32 %v764_v1, %v231_v18  ;;  %v234_v29 = vmul.f32 %v754_v0, %v195_v15 }
  0x22   : > { %v271_v28 = vadd.f32 %v764_v1, %v232_v19  ;;  %694 = vst [vmem:[%s796_s26 + $0x30] sm:$0xff] %v642_v21   ;;  %v647_v31 = vpack.c.bf16 %v299_v22, %v298_v13  ;;  %v301_v32 = vmax.f32 %v269_v23, 0.0  ;;  %v235_v34 = vmul.f32 %v754_v0, %v196_v20 }
  0x23   : > { %v272_v33 = vadd.f32 %v764_v1, %v233_v24  ;;  %v302_v36 = vmax.f32 %v270_v27, 0.0  ;;  %v273_v38 = vadd.f32 %v764_v1, %v234_v29  ;;  %v236_v39 = vmul.f32 %v754_v0, %v197_v25 }
  0x24   : > { %v303_v37 = vmax.f32 %v271_v28, 0.0  ;;  %695 = vst [vmem:[%s796_s26 + $0x38] sm:$0xff] %v647_v31   ;;  %v652_v42 = vpack.c.bf16 %v301_v32, %v300_v26  ;;  %v274_v44 = vadd.f32 %v764_v1, %v235_v34  ;;  %v237_v45 = vmul.f32 %v754_v0, %v198_v30 }
  0x25   : > { %v304_v43 = vmax.f32 %v272_v33, 0.0  ;;  %v305_v48 = vmax.f32 %v273_v38, 0.0  ;;  %v275_v49 = vadd.f32 %v764_v1, %v236_v39  ;;  %v238_v50 = vmul.f32 %v754_v0, %v199_v35 }
  0x26   : > { %v657_v47 = vpack.c.bf16 %v303_v37, %v302_v36  ;;  %696 = vst [vmem:[%s796_s26 + $0x40] sm:$0xff] %v652_v42   ;;  %v306_v52 = vmax.f32 %v274_v44, 0.0  ;;  %v276_v53 = vadd.f32 %v764_v1, %v237_v45  ;;  %v239_v54 = vmul.f32 %v754_v0, %v200_v40 }
  0x27   : > { %v240_v55 = vmul.f32 %v754_v0, %v201_v41  ;;  %v662_v57 = vpack.c.bf16 %v305_v48, %v304_v43  ;;  %v307_v58 = vmax.f32 %v275_v49, 0.0  ;;  %v277_v59 = vadd.f32 %v764_v1, %v238_v50 }
  0x28   : > { %697 = vst [vmem:[%s796_s26 + $0x48] sm:$0xff] %v657_v47   ;;  %v241_v60 = vmul.f32 %v754_v0, %v202_v46  ;;  %v308_v62 = vmax.f32 %v276_v53, 0.0  ;;  %v278_v63 = vadd.f32 %v764_v1, %v239_v54  ;;  %v242_v3 = vmul.f32 %v754_v0, %v203_v51 }
  0x29   : > { %v279_v2 = vadd.f32 %v764_v1, %v240_v55  ;;  %698 = vst [vmem:[%s796_s26 + $0x50] sm:$0xff] %v662_v57   ;;  %v667_v4 = vpack.c.bf16 %v307_v58, %v306_v52  ;;  %v309_v5 = vmax.f32 %v277_v59, 0.0  ;;  %v243_v7 = vmul.f32 %v754_v0, %v204_v56 }
  0x2a   : > { %v280_v6 = vadd.f32 %v764_v1, %v241_v60  ;;  %v310_v8 = vmax.f32 %v278_v63, 0.0  ;;  %v281_v10 = vadd.f32 %v764_v1, %v242_v3  ;;  %v244_v11 = vmul.f32 %v754_v0, %v205_v61 }
  0x2b   : > { %v311_v9 = vmax.f32 %v279_v2, 0.0  ;;  %699 = vst [vmem:[%s796_s26 + $0x58] sm:$0xff] %v667_v4   ;;  %v672_v12 = vpack.c.bf16 %v309_v5, %v308_v62  ;;  %v282_v14 = vadd.f32 %v764_v1, %v243_v7 }
  0x2c   : > { %v312_v13 = vmax.f32 %v280_v6, 0.0  ;;  %v313_v16 = vmax.f32 %v281_v10, 0.0  ;;  %v283_v17 = vadd.f32 %v764_v1, %v244_v11 }
  0x2d   : > { %v677_v15 = vpack.c.bf16 %v311_v9, %v310_v8  ;;  %700 = vst [vmem:[%s796_s26 + $0x60] sm:$0xff] %v672_v12   ;;  %v314_v18 = vmax.f32 %v282_v14, 0.0 }
  0x2e   : > { %v682_v19 = vpack.c.bf16 %v313_v16, %v312_v13  ;;  %v315_v20 = vmax.f32 %v283_v17, 0.0 }
  0x2f   : > { %701 = vst [vmem:[%s796_s26 + $0x68] sm:$0xff] %v677_v15  }
  0x30   : > { %702 = vst [vmem:[%s796_s26 + $0x70] sm:$0xff] %v682_v19   ;;  %v687_v21 = vpack.c.bf16 %v315_v20, %v314_v18 }
  0x32   : > { %703 = vst [vmem:[%s796_s26 + $0x78] sm:$0xff] %v687_v21  }
  0x33 PF: > { %s13_s12 = sadd.s32 1, %s718_s12  }
  0x34   : > { %p10_p4 = scmp.ge.s32.totalorder %s13_s12, 4  }
  0x36   :  { %12 = sbr.rel (!%p10_p4) target bundleno = 1 (0x1), region = 62 }

// kernel: hourglass_forward.44
= control target key start
LH: loop header
LB: loop body
LE: loop exit
PB: predicated region body
PF: predicated region fallthrough
CT: control target
= control target key end

     0   :  { %s1024_s15 = smov 0   ;;  %s1216_s0 = inlined_call_operand.vmem [shape: bf16[512,128], index: 0, kind: input, shape index: {}]   ;;  %s1217_s1 = inlined_call_operand.vmem [shape: bf16[128,128], index: 1, kind: input, shape index: {}]   ;;  %s1218_s2 = inlined_call_operand.vmem [shape: f32[512,128], index: 2, kind: output, shape index: {0}]   ;;  %s1219_s3 = inlined_call_operand.vmem [shape: f32[2,8,128], index: 3, kind: output, shape index: {1}]   ;;  %s1220_s4 = inlined_call_operand.vmem [shape: f32[2,8,128], index: 4, kind: output, shape index: {2}]  }
   0x1 LB: > { %s1030_s16 = sadd.s32 4294967295, %s997_s15   ;;  %p838_p0 = scmp.ge.s32.totalorder %s997_s15, 1  ;;  %s997_s15 = sphi %s1024_s15, %s15_s15  }
   0x2   : > { %p168_p1 = scmp.lt.s32.totalorder %s997_s15, 3 }
   0x4   : > { %p169_p2 = pnand %p838_p0, %p168_p1 }
   0x5   : > { %v967_v0 = vld [vmem:[%s1217_s1] sm:$0xff] (!%p169_p2)   ;;  %s839_s19 = sshll.u32 (!%p169_p2), %s1030_s16, 5  ;;  %v968_v1 = vld [vmem:[%s1217_s1 + $0x8] sm:$0xff] (!%p169_p2)   ;;  %v969_v2 = vld [vmem:[%s1217_s1 + $0x10] sm:$0xff] (!%p169_p2)   ;;  %p214_p4 = scmp.lt.s32.totalorder (!%p169_p2), %s1030_s16, 1 }
   0x6   : > { %172 = sbr.rel (%p169_p2) target bundleno = 330 (0x14a), region = 28  ;;  %p203_p3 = scmp.lt.s32.totalorder (!%p169_p2), %s839_s19, 63  ;;  %895 = vmatprep.subr.bf16.mxu0 (!%p169_p2), %v967_v0  ;;  %943 = vmatprep.subr.bf16.mxu1 (!%p169_p2), %v967_v0  ;;  %v970_v3 = vld [vmem:[%s1217_s1 + $0x18] sm:$0xff] (!%p169_p2)   ;;  %v971_v5 = vld [vmem:[%s1217_s1 + $0x20] sm:$0xff] (!%p169_p2)   ;;  %v972_v6 = vld [vmem:[%s1217_s1 + $0x28] sm:$0xff] (!%p169_p2)  }
   0x7   : > { %896 = vmatpush3.bf16.msra.mxu0 (!%p169_p2), %v967_v0  ;;  %951 = vmatpush3.bf16.msra.mxu1 (!%p169_p2), %v967_v0  ;;  %v973_v8 = vld [vmem:[%s1217_s1 + $0x30] sm:$0xff] (!%p169_p2)   ;;  %v974_v9 = vld [vmem:[%s1217_s1 + $0x38] sm:$0xff] (!%p169_p2)  }
   0x8   : > { %897 = vmatprep.subr.bf16.mxu0 (!%p169_p2), %v968_v1  ;;  %944 = vmatprep.subr.bf16.mxu1 (!%p169_p2), %v968_v1 }
   0xb   : > { %898 = vmatpush3.bf16.msra.mxu0 (!%p169_p2), %v968_v1  ;;  %952 = vmatpush3.bf16.msra.mxu1 (!%p169_p2), %v968_v1 }
   0xc   : > { %899 = vmatprep.subr.bf16.mxu0 (!%p169_p2), %v969_v2  ;;  %945 = vmatprep.subr.bf16.mxu1 (!%p169_p2), %v969_v2 }
   0xd   : > { %s1222_s19 = smov (!%p203_p3, %s839_s19), 63  ;;  %s1224_s16 = smov (!%p214_p4, %s1030_s16), 1 }
   0xe   : > { %s840_s24 = sshll.u32 %s1222_s19, 2  ;;  %s842_s12 = sshll.u32 %s1222_s19, 3 }
   0xf   : > { %s1050_s27 = scalar_lea.vmem %s1216_s0, %s840_s24  ;;  %900 = vmatpush3.bf16.msra.mxu0 %v969_v2  ;;  %953 = vmatpush3.bf16.msra.mxu1 %v969_v2  ;;  %s1087_s17 = scalar_lea.vmem %s1218_s2, %s842_s12 }
  0x10   : > { %v975_v4 = vld [vmem:[%s1050_s27] sm:$0xff]   ;;  %901 = vmatprep.subr.bf16.mxu0 %v970_v3  ;;  %946 = vmatprep.subr.bf16.mxu1 %v970_v3  ;;  %v976_v10 = vld [vmem:[%s1050_s27 + $0x8] sm:$0xff]   ;;  %v977_v12 = vld [vmem:[%s1050_s27 + $0x10] sm:$0xff]   ;;  %s843_s18 = sshll.u32 %s1224_s16, 3 }
  0x11   : > { %911 = vmatprep.mubr.bf16.mxu0 %v975_v4  ;;  %v983_v7 = vld [vmem:[%s1050_s27 + $0x40] sm:$0xff]   ;;  %v984_v11 = vld [vmem:[%s1050_s27 + $0x48] sm:$0xff]   ;;  %v985_v13 = vld [vmem:[%s1050_s27 + $0x50] sm:$0xff]   ;;  %s217_s21 = scalar_lea.vmem %s1219_s3, %s843_s18  ;;  %s221_s24 = scalar_lea.vmem %s1220_s4, %s843_s18 }
  0x12   : > { %927 = vmatprep.mubr.bf16.mxu1 %v983_v7  ;;  %v978_v14 = vld [vmem:[%s1050_s27 + $0x18] sm:$0xff]   ;;  %v979_v16 = vld [vmem:[%s1050_s27 + $0x20] sm:$0xff]   ;;  %v980_v18 = vld [vmem:[%s1050_s27 + $0x28] sm:$0xff]  }
  0x13   : > { %902 = vmatpush3.bf16.msra.mxu0 %v970_v3  ;;  %954 = vmatpush3.bf16.msra.mxu1 %v970_v3  ;;  %v986_v15 = vld [vmem:[%s1050_s27 + $0x58] sm:$0xff]   ;;  %v987_v17 = vld [vmem:[%s1050_s27 + $0x60] sm:$0xff]   ;;  %v988_v19 = vld [vmem:[%s1050_s27 + $0x68] sm:$0xff]  }
  0x14   : > { %903 = vmatprep.subr.bf16.mxu0 %v971_v5  ;;  %947 = vmatprep.subr.bf16.mxu1 %v971_v5  ;;  %v981_v20 = vld [vmem:[%s1050_s27 + $0x30] sm:$0xff]   ;;  %v982_v22 = vld [vmem:[%s1050_s27 + $0x38] sm:$0xff]  }
  0x15   : > { %v989_v21 = vld [vmem:[%s1050_s27 + $0x70] sm:$0xff]   ;;  %v990_v23 = vld [vmem:[%s1050_s27 + $0x78] sm:$0xff]  }
  0x17   : > { %904 = vmatpush3.bf16.msra.mxu0 %v971_v5  ;;  %955 = vmatpush3.bf16.msra.mxu1 %v971_v5 }
  0x18   : > { %905 = vmatprep.subr.bf16.mxu0 %v972_v6  ;;  %948 = vmatprep.subr.bf16.mxu1 %v972_v6 }
  0x1b   : > { %906 = vmatpush3.bf16.msra.mxu0 %v972_v6  ;;  %956 = vmatpush3.bf16.msra.mxu1 %v972_v6 }
  0x1c   : > { %907 = vmatprep.subr.bf16.mxu0 %v973_v8  ;;  %949 = vmatprep.subr.bf16.mxu1 %v973_v8 }
  0x1f   : > { %908 = vmatpush3.bf16.msra.mxu0 %v973_v8  ;;  %957 = vmatpush3.bf16.msra.mxu1 %v973_v8 }
  0x20   : > { %909 = vmatprep.subr.bf16.mxu0 %v974_v9  ;;  %950 = vmatprep.subr.bf16.mxu1 %v974_v9 }
  0x23   : > { %910 = vmatpush3.bf16.msra.mxu0 %v974_v9  ;;  %958 = vmatpush3.bf16.msra.mxu1 %v974_v9 }
  0x26   : > { %912 = vmatmul.mubr.bf16.vlgmr.msra.gmra.mrb[0].mxu0 %v976_v10  ;;  %928 = vmatmul.mubr.bf16.vlgmr.msra.gmra.mrb[0].mxu1 %v984_v11 }
  0x27   : > { %915 = vmatprep.mubr.bf16.mxu0 %v977_v12  ;;  %931 = vmatprep.mubr.bf16.mxu1 %v985_v13 }
  0x2e   : > { %916 = vmatmul.mubr.bf16.gmra.mrb[4].mxu0 %v978_v14  ;;  %932 = vmatmul.mubr.bf16.gmra.mrb[4].mxu1 %v986_v15 }
  0x2f   : > { %919 = vmatprep.mubr.bf16.mxu0 %v979_v16  ;;  %935 = vmatprep.mubr.bf16.mxu1 %v987_v17 }
  0x36   : > { %920 = vmatmul.mubr.bf16.gmra.mrb[8].mxu0 %v980_v18  ;;  %936 = vmatmul.mubr.bf16.gmra.mrb[8].mxu1 %v988_v19 }
  0x37   : > { %923 = vmatprep.mubr.bf16.mxu0 %v981_v20  ;;  %939 = vmatprep.mubr.bf16.mxu1 %v989_v21 }
  0x3e   : > { %924 = vmatmul.mubr.bf16.gmra.mrb[12].mxu0 %v982_v22  ;;  %940 = vmatmul.mubr.bf16.gmra.mrb[12].mxu1 %v990_v23 }
  0xf9   : > { %v913_v24 = vpop.f32.mrb[0].mxu0  ;;  %v1089_v25 = vpop.f32.mrb[0].mxu1 }
  0xfa   : > { %578 = vst [vmem:[%s1087_s17 + $0x10] sm:$0xff] %v913_v24  ;;  %v449_v26 = vpop.f32.mrb[1].mxu0  ;;  %594 = vst [vmem:[%s1087_s17 + $0x90] sm:$0xff] %v1089_v25  ;;  %v1094_v27 = vpop.f32.mrb[1].mxu1  ;;  %v647_v35 = vmul.f32 %v913_v24, %v913_v24 }
  0xfb   : > { %576 = vst [vmem:[%s1087_s17] sm:$0xff] %v449_v26  ;;  %v914_v28 = vpop.f32.mrb[2].mxu0  ;;  %592 = vst [vmem:[%s1087_s17 + $0x80] sm:$0xff] %v1094_v27  ;;  %v1099_v29 = vpop.f32.mrb[2].mxu1  ;;  %v645_v32 = vmul.f32 %v449_v26, %v449_v26 }
  0xfc   : > { %579 = vst [vmem:[%s1087_s17 + $0x18] sm:$0xff] %v914_v28  ;;  %v452_v30 = vpop.f32.mrb[3].mxu0  ;;  %595 = vst [vmem:[%s1087_s17 + $0x98] sm:$0xff] %v1099_v29  ;;  %v1104_v31 = vpop.f32.mrb[3].mxu1  ;;  %v648_v38 = vmul.f32 %v914_v28, %v914_v28 }
  0xfd   : > { %577 = vst [vmem:[%s1087_s17 + $0x8] sm:$0xff] %v452_v30  ;;  %v608_v33 = vadd.f32 %v452_v30, %v449_v26  ;;  %v646_v34 = vmul.f32 %v452_v30, %v452_v30  ;;  %593 = vst [vmem:[%s1087_s17 + $0x88] sm:$0xff] %v1104_v31 }
  0xff   : > { %v609_v36 = vadd.f32 %v913_v24, %v608_v33  ;;  %v677_v37 = vadd.f32 %v646_v34, %v645_v32 }
 0x101   : > { %v678_v39 = vadd.f32 %v677_v37, %v647_v35  ;;  %v917_v40 = vpop.f32.mrb[4].mxu0  ;;  %v610_v41 = vadd.f32 %v914_v28, %v609_v36  ;;  %v1109_v42 = vpop.f32.mrb[4].mxu1 }
 0x102   : > { %582 = vst [vmem:[%s1087_s17 + $0x30] sm:$0xff] %v917_v40  ;;  %v465_v43 = vpop.f32.mrb[5].mxu0  ;;  %598 = vst [vmem:[%s1087_s17 + $0xb0] sm:$0xff] %v1109_v42  ;;  %v1114_v44 = vpop.f32.mrb[5].mxu1  ;;  %v651_v55 = vmul.f32 %v917_v40, %v917_v40 }
 0x103   : > { %580 = vst [vmem:[%s1087_s17 + $0x20] sm:$0xff] %v465_v43  ;;  %v611_v45 = vadd.f32 %v610_v41, %v465_v43  ;;  %v649_v46 = vmul.f32 %v465_v43, %v465_v43  ;;  %v679_v47 = vadd.f32 %v678_v39, %v648_v38  ;;  %v918_v48 = vpop.f32.mrb[6].mxu0  ;;  %596 = vst [vmem:[%s1087_s17 + $0xa0] sm:$0xff] %v1114_v44  ;;  %v1119_v49 = vpop.f32.mrb[6].mxu1 }
 0x104   : > { %583 = vst [vmem:[%s1087_s17 + $0x38] sm:$0xff] %v918_v48  ;;  %v468_v50 = vpop.f32.mrb[7].mxu0  ;;  %599 = vst [vmem:[%s1087_s17 + $0xb8] sm:$0xff] %v1119_v49  ;;  %v1124_v51 = vpop.f32.mrb[7].mxu1  ;;  %v652_v58 = vmul.f32 %v918_v48, %v918_v48  ;;  %v661_v41 = vmul.f32 %v1094_v27, %v1094_v27 }
 0x105   : > { %v680_v52 = vadd.f32 %v679_v47, %v649_v46  ;;  %581 = vst [vmem:[%s1087_s17 + $0x28] sm:$0xff] %v468_v50  ;;  %v612_v53 = vadd.f32 %v611_v45, %v468_v50  ;;  %v650_v54 = vmul.f32 %v468_v50, %v468_v50  ;;  %597 = vst [vmem:[%s1087_s17 + $0xa8] sm:$0xff] %v1124_v51 }
 0x106   : > { %v663_v50 = vmul.f32 %v1089_v25, %v1089_v25 }
 0x107   : > { %v613_v56 = vadd.f32 %v917_v40, %v612_v53  ;;  %v681_v57 = vadd.f32 %v680_v52, %v650_v54  ;;  %v664_v54 = vmul.f32 %v1099_v29, %v1099_v29 }
 0x109   : > { %v682_v59 = vadd.f32 %v681_v57, %v651_v55  ;;  %v921_v60 = vpop.f32.mrb[8].mxu0  ;;  %v614_v61 = vadd.f32 %v918_v48, %v613_v56  ;;  %v1129_v62 = vpop.f32.mrb[8].mxu1  ;;  %v662_v48 = vmul.f32 %v1104_v31, %v1104_v31 }
 0x10a   : > { %586 = vst [vmem:[%s1087_s17 + $0x50] sm:$0xff] %v921_v60  ;;  %v481_v63 = vpop.f32.mrb[9].mxu0  ;;  %602 = vst [vmem:[%s1087_s17 + $0xd0] sm:$0xff] %v1129_v62  ;;  %v1134_v0 = vpop.f32.mrb[9].mxu1  ;;  %v655_v11 = vmul.f32 %v921_v60, %v921_v60 }
 0x10b   : > { %584 = vst [vmem:[%s1087_s17 + $0x40] sm:$0xff] %v481_v63  ;;  %v615_v1 = vadd.f32 %v614_v61, %v481_v63  ;;  %v653_v2 = vmul.f32 %v481_v63, %v481_v63  ;;  %v683_v3 = vadd.f32 %v682_v59, %v652_v58  ;;  %v922_v4 = vpop.f32.mrb[10].mxu0  ;;  %600 = vst [vmem:[%s1087_s17 + $0xc0] sm:$0xff] %v1134_v0  ;;  %v1139_v5 = vpop.f32.mrb[10].mxu1 }
 0x10c   : > { %587 = vst [vmem:[%s1087_s17 + $0x58] sm:$0xff] %v922_v4  ;;  %v484_v6 = vpop.f32.mrb[11].mxu0  ;;  %603 = vst [vmem:[%s1087_s17 + $0xd8] sm:$0xff] %v1139_v5  ;;  %v1144_v7 = vpop.f32.mrb[11].mxu1  ;;  %v656_v14 = vmul.f32 %v922_v4, %v922_v4 }
 0x10d   : > { %v684_v8 = vadd.f32 %v683_v3, %v653_v2  ;;  %585 = vst [vmem:[%s1087_s17 + $0x48] sm:$0xff] %v484_v6  ;;  %v616_v9 = vadd.f32 %v615_v1, %v484_v6  ;;  %v654_v10 = vmul.f32 %v484_v6, %v484_v6  ;;  %601 = vst [vmem:[%s1087_s17 + $0xc8] sm:$0xff] %v1144_v7 }
 0x10f   : > { %v617_v12 = vadd.f32 %v921_v60, %v616_v9  ;;  %v685_v13 = vadd.f32 %v684_v8, %v654_v10  ;;  %v666_v60 = vmul.f32 %v1124_v51, %v1124_v51  ;;  %v670_v8 = vmul.f32 %v1144_v7, %v1144_v7 }
 0x111   : > { %v686_v15 = vadd.f32 %v685_v13, %v655_v11  ;;  %v925_v16 = vpop.f32.mrb[12].mxu0  ;;  %v618_v17 = vadd.f32 %v922_v4, %v617_v12  ;;  %v1149_v18 = vpop.f32.mrb[12].mxu1 }
 0x112   : > { %590 = vst [vmem:[%s1087_s17 + $0x70] sm:$0xff] %v925_v16  ;;  %v497_v19 = vpop.f32.mrb[13].mxu0  ;;  %606 = vst [vmem:[%s1087_s17 + $0xf0] sm:$0xff] %v1149_v18  ;;  %v561_v20 = vpop.f32.mrb[13].mxu1  ;;  %v659_v35 = vmul.f32 %v925_v16, %v925_v16 }
 0x113   : > { %588 = vst [vmem:[%s1087_s17 + $0x60] sm:$0xff] %v497_v19  ;;  %v619_v21 = vadd.f32 %v618_v17, %v497_v19  ;;  %v657_v22 = vmul.f32 %v497_v19, %v497_v19  ;;  %v687_v23 = vadd.f32 %v686_v15, %v656_v14  ;;  %v926_v24 = vpop.f32.mrb[14].mxu0  ;;  %604 = vst [vmem:[%s1087_s17 + $0xe0] sm:$0xff] %v561_v20  ;;  %v1156_v26 = vpop.f32.mrb[14].mxu1 }
 0x114   : > { %591 = vst [vmem:[%s1087_s17 + $0x78] sm:$0xff] %v926_v24  ;;  %v500_v28 = vpop.f32.mrb[15].mxu0  ;;  %607 = vst [vmem:[%s1087_s17 + $0xf8] sm:$0xff] %v1156_v26  ;;  %v564_v30 = vpop.f32.mrb[15].mxu1  ;;  %v660_v38 = vmul.f32 %v926_v24, %v926_v24  ;;  %v673_v12 = vmul.f32 %v561_v20, %v561_v20  ;;  %v675_v17 = vmul.f32 %v1149_v18, %v1149_v18 }
 0x115   : > { %v688_v32 = vadd.f32 %v687_v23, %v657_v22  ;;  %589 = vst [vmem:[%s1087_s17 + $0x68] sm:$0xff] %v500_v28  ;;  %v620_v33 = vadd.f32 %v619_v21, %v500_v28  ;;  %v658_v34 = vmul.f32 %v500_v28, %v500_v28  ;;  %605 = vst [vmem:[%s1087_s17 + $0xe8] sm:$0xff] %v564_v30 }
 0x116   : > { %v676_v21 = vmul.f32 %v1156_v26, %v1156_v26 }
 0x117   : > { %v621_v36 = vadd.f32 %v925_v16, %v620_v33  ;;  %v689_v37 = vadd.f32 %v688_v32, %v658_v34 }
 0x119   : > { %v690_v39 = vadd.f32 %v689_v37, %v659_v35  ;;  %v622_v40 = vadd.f32 %v926_v24, %v621_v36 }
 0x11b   : > { %v623_v43 = vadd.f32 %v622_v40, %v1094_v27  ;;  %v691_v45 = vadd.f32 %v690_v39, %v660_v38  ;;  %v665_v27 = vmul.f32 %v1114_v44, %v1114_v44 }
 0x11d   : > { %v692_v46 = vadd.f32 %v691_v45, %v661_v41  ;;  %v624_v47 = vadd.f32 %v623_v43, %v1104_v31 }
 0x11f   : > { %v625_v52 = vadd.f32 %v1089_v25, %v624_v47  ;;  %v693_v53 = vadd.f32 %v692_v46, %v662_v48  ;;  %v667_v25 = vmul.f32 %v1109_v42, %v1109_v42 }
 0x121   : > { %v694_v55 = vadd.f32 %v693_v53, %v663_v50  ;;  %v626_v56 = vadd.f32 %v1099_v29, %v625_v52  ;;  %v668_v29 = vmul.f32 %v1119_v49, %v1119_v49 }
 0x123   : > { %v627_v57 = vadd.f32 %v626_v56, %v1114_v44  ;;  %v695_v58 = vadd.f32 %v694_v55, %v664_v54  ;;  %v669_v44 = vmul.f32 %v1134_v0, %v1134_v0 }
 0x125   : > { %v696_v59 = vadd.f32 %v695_v58, %v665_v27  ;;  %v628_v31 = vadd.f32 %v627_v57, %v1124_v51 }
 0x127   : > { %v629_v61 = vadd.f32 %v1109_v42, %v628_v31  ;;  %v697_v63 = vadd.f32 %v696_v59, %v666_v60  ;;  %v671_v42 = vmul.f32 %v1129_v62, %v1129_v62 }
 0x129   : > { %v698_v1 = vadd.f32 %v697_v63, %v667_v25  ;;  %v630_v2 = vadd.f32 %v1119_v49, %v629_v61  ;;  %v672_v49 = vmul.f32 %v1139_v5, %v1139_v5 }
 0x12b   : > { %v631_v3 = vadd.f32 %v630_v2, %v1134_v0  ;;  %v699_v4 = vadd.f32 %v698_v1, %v668_v29 }
 0x12d   : > { %v700_v6 = vadd.f32 %v699_v4, %v669_v44  ;;  %v632_v51 = vadd.f32 %v631_v3, %v1144_v7  ;;  %v674_v7 = vmul.f32 %v564_v30, %v564_v30 }
 0x12f   : > { %v633_v9 = vadd.f32 %v1129_v62, %v632_v51  ;;  %v701_v10 = vadd.f32 %v700_v6, %v670_v8 }
 0x131   : > { %v702_v11 = vadd.f32 %v701_v10, %v671_v42  ;;  %v634_v0 = vadd.f32 %v1139_v5, %v633_v9 }
 0x133   : > { %v635_v13 = vadd.f32 %v634_v0, %v561_v20  ;;  %v703_v14 = vadd.f32 %v702_v11, %v672_v49 }
 0x135   : > { %v704_v15 = vadd.f32 %v703_v14, %v673_v12  ;;  %v636_v16 = vadd.f32 %v635_v13, %v564_v30 }
 0x137   : > { %v637_v19 = vadd.f32 %v1149_v18, %v636_v16  ;;  %v705_v62 = vadd.f32 %v704_v15, %v674_v7 }
 0x139   : > { %v638_v22 = vadd.f32 %v1156_v26, %v637_v19  ;;  %v706_v5 = vadd.f32 %v705_v62, %v675_v17 }
 0x13b   : > { %v639_v23 = vrot.slane %v638_v22, 4  ;;  %v707_v24 = vadd.f32 %v706_v5, %v676_v21 }
 0x13d   : > { %v640_v20 = vadd.f32 %v639_v23, %v638_v22  ;;  %v708_v28 = vrot.slane %v707_v24, 4 }
 0x13f   : > { %v641_v32 = vrot.slane %v640_v20, 2  ;;  %v709_v30 = vadd.f32 %v708_v28, %v707_v24 }
 0x141   : > { %v642_v33 = vadd.f32 %v641_v32, %v640_v20  ;;  %v710_v34 = vrot.slane %v709_v30, 2 }
 0x143   : > { %v643_v35 = vrot.slane %v642_v33, 1  ;;  %v711_v18 = vadd.f32 %v710_v34, %v709_v30 }
 0x145   : > { %v644_v36 = vadd.f32 %v643_v35, %v642_v33  ;;  %v712_v37 = vrot.slane %v711_v18, 1 }
 0x147   : > { %v713_v26 = vadd.f32 %v712_v37, %v711_v18  ;;  %714 = vst [vmem:[%s217_s21] sm:$0xff] %v644_v36 }
 0x149   : > { %715 = vst [vmem:[%s221_s24] sm:$0xff] %v713_v26 }
 0x14a PF: > { %s15_s15 = sadd.s32 1, %s997_s15  }
 0x14b   : > { %p12_p5 = scmp.ge.s32.totalorder %s15_s15, 4  }
 0x14d   :  { %14 = sbr.rel (!%p12_p5) target bundleno = 1 (0x1), region = 82 }

// kernel: hourglass_forward.46
= control target key start
LH: loop header
LB: loop body
LE: loop exit
PB: predicated region body
PF: predicated region fallthrough
CT: control target
= control target key end

     0   :  { %s1261_s15 = smov 0   ;;  %s1496_s0 = inlined_call_operand.vmem [shape: bf16[512,256], index: 0, kind: input, shape index: {}]   ;;  %s1497_s1 = inlined_call_operand.vmem [shape: bf16[256,128], index: 1, kind: input, shape index: {}]   ;;  %s1498_s2 = inlined_call_operand.vmem [shape: f32[512,128], index: 2, kind: output, shape index: {0}]   ;;  %s1499_s3 = inlined_call_operand.vmem [shape: f32[2,8,128], index: 3, kind: output, shape index: {1}]   ;;  %s1500_s4 = inlined_call_operand.vmem [shape: f32[2,8,128], index: 4, kind: output, shape index: {2}]  }
   0x1 LB: > { %s1267_s16 = sadd.s32 4294967295, %s1234_s15   ;;  %p969_p0 = scmp.ge.s32.totalorder %s1234_s15, 1  ;;  %s1234_s15 = sphi %s1261_s15, %s15_s15  }
   0x2   : > { %p169_p1 = scmp.lt.s32.totalorder %s1234_s15, 3 }
   0x4   : > { %p170_p2 = pnand %p969_p0, %p169_p1 }
   0x5   : > { %v1164_v0 = vld [vmem:[%s1497_s1 + $0x40] sm:$0xff] (!%p170_p2)   ;;  %s970_s19 = sshll.u32 (!%p170_p2), %s1267_s16, 5  ;;  %v1166_v2 = vld [vmem:[%s1497_s1 + $0x48] sm:$0xff] (!%p170_p2)   ;;  %v1168_v4 = vld [vmem:[%s1497_s1 + $0x50] sm:$0xff] (!%p170_p2)   ;;  %p217_p4 = scmp.lt.s32.totalorder (!%p170_p2), %s1267_s16, 1 }
   0x6   : > { %173 = sbr.rel (%p170_p2) target bundleno = 360 (0x168), region = 28  ;;  %v1165_v1 = vld [vmem:[%s1497_s1] sm:$0xff] (!%p170_p2)   ;;  %1028 = vmatprep.subr.bf16.mxu0 (!%p170_p2), %v1164_v0  ;;  %1140 = vmatprep.subr.bf16.mxu1 (!%p170_p2), %v1164_v0  ;;  %v1167_v3 = vld [vmem:[%s1497_s1 + $0x8] sm:$0xff] (!%p170_p2)   ;;  %p205_p3 = scmp.lt.s32.totalorder (!%p170_p2), %s970_s19, 63  ;;  %v1169_v5 = vld [vmem:[%s1497_s1 + $0x10] sm:$0xff] (!%p170_p2)  }
   0x7   : > { %1029 = vmatpush3.bf16.msra.mxu0 (!%p170_p2), %v1165_v1  ;;  %1148 = vmatpush3.bf16.msra.mxu1 (!%p170_p2), %v1165_v1  ;;  %v1170_v6 = vld [vmem:[%s1497_s1 + $0x58] sm:$0xff] (!%p170_p2)   ;;  %v1172_v8 = vld [vmem:[%s1497_s1 + $0x60] sm:$0xff] (!%p170_p2)   ;;  %v1174_v10 = vld [vmem:[%s1497_s1 + $0x68] sm:$0xff] (!%p170_p2)  }
   0x8   : > { %1030 = vmatprep.subr.bf16.mxu0 (!%p170_p2), %v1166_v2  ;;  %1141 = vmatprep.subr.bf16.mxu1 (!%p170_p2), %v1166_v2  ;;  %v1171_v7 = vld [vmem:[%s1497_s1 + $0x18] sm:$0xff] (!%p170_p2)   ;;  %v1173_v9 = vld [vmem:[%s1497_s1 + $0x20] sm:$0xff] (!%p170_p2)   ;;  %v1175_v12 = vld [vmem:[%s1497_s1 + $0x28] sm:$0xff] (!%p170_p2)  }
   0x9   : > { %v1176_v13 = vld [vmem:[%s1497_s1 + $0x70] sm:$0xff] (!%p170_p2)   ;;  %v1178_v16 = vld [vmem:[%s1497_s1 + $0x78] sm:$0xff] (!%p170_p2)  }
   0xa   : > { %v1177_v15 = vld [vmem:[%s1497_s1 + $0x30] sm:$0xff] (!%p170_p2)   ;;  %v1179_v17 = vld [vmem:[%s1497_s1 + $0x38] sm:$0xff] (!%p170_p2)  }
   0xb   : > { %1031 = vmatpush3.bf16.msra.mxu0 (!%p170_p2), %v1167_v3  ;;  %1149 = vmatpush3.bf16.msra.mxu1 (!%p170_p2), %v1167_v3 }
   0xc   : > { %1032 = vmatprep.subr.bf16.mxu0 (!%p170_p2), %v1168_v4  ;;  %1142 = vmatprep.subr.bf16.mxu1 (!%p170_p2), %v1168_v4 }
   0xd   : > { %s1502_s19 = smov (!%p205_p3, %s970_s19), 63  ;;  %s1504_s16 = smov (!%p217_p4, %s1267_s16), 1 }
   0xe   : > { %s1027_s8 = sshll.u32 %s1502_s19, 3  ;;  %s975_s19 = sshll.u32 %s1504_s16, 3 }
   0xf   : > { %1033 = vmatpush3.bf16.msra.mxu0 %v1169_v5  ;;  %1150 = vmatpush3.bf16.msra.mxu1 %v1169_v5  ;;  %s1307_s13 = scalar_lea.vmem %s1496_s0, %s1027_s8  ;;  %s1367_s7 = scalar_lea.vmem %s1498_s2, %s1027_s8 }
  0x10   : > { %1034 = vmatprep.subr.bf16.mxu0 %v1170_v6  ;;  %1143 = vmatprep.subr.bf16.mxu1 %v1170_v6  ;;  %v1182_v11 = vld [vmem:[%s1307_s13 + $0x4] ss:$8 sps:$4 sm:$0xff]   ;;  %v1180_v18 = vld [vmem:[%s1307_s13] ss:$8 sps:$4 sm:$0xff]   ;;  %v1183_v19 = vld [vmem:[%s1307_s13 + $0x14] ss:$8 sps:$4 sm:$0xff]   ;;  %s220_s10 = scalar_lea.vmem %s1499_s3, %s975_s19 }
  0x11   : > { %578 = vmatprep.mubr.bf16.mxu0 %v1182_v11  ;;  %v1194_v14 = vld [vmem:[%s1307_s13 + $0x84] ss:$8 sps:$4 sm:$0xff]   ;;  %v1192_v20 = vld [vmem:[%s1307_s13 + $0x80] ss:$8 sps:$4 sm:$0xff]   ;;  %v1198_v21 = vld [vmem:[%s1307_s13 + $0x94] ss:$8 sps:$4 sm:$0xff]  }
  0x12   : > { %642 = vmatprep.mubr.bf16.mxu1 %v1194_v14  ;;  %v1185_v22 = vld [vmem:[%s1307_s13 + $0x10] ss:$8 sps:$4 sm:$0xff]   ;;  %v1186_v23 = vld [vmem:[%s1307_s13 + $0x24] ss:$8 sps:$4 sm:$0xff]   ;;  %v1188_v26 = vld [vmem:[%s1307_s13 + $0x20] ss:$8 sps:$4 sm:$0xff]  }
  0x13   : > { %1035 = vmatpush3.bf16.msra.mxu0 %v1171_v7  ;;  %1151 = vmatpush3.bf16.msra.mxu1 %v1171_v7  ;;  %v1200_v24 = vld [vmem:[%s1307_s13 + $0x90] ss:$8 sps:$4 sm:$0xff]   ;;  %v1204_v25 = vld [vmem:[%s1307_s13 + $0xa4] ss:$8 sps:$4 sm:$0xff]   ;;  %v1189_v27 = vld [vmem:[%s1307_s13 + $0x34] ss:$8 sps:$4 sm:$0xff]  }
  0x14   : > { %1036 = vmatprep.subr.bf16.mxu0 %v1172_v8  ;;  %1144 = vmatprep.subr.bf16.mxu1 %v1172_v8  ;;  %v1206_v28 = vld [vmem:[%s1307_s13 + $0xa0] ss:$8 sps:$4 sm:$0xff]   ;;  %v1210_v29 = vld [vmem:[%s1307_s13 + $0xb4] ss:$8 sps:$4 sm:$0xff]   ;;  %v1191_v30 = vld [vmem:[%s1307_s13 + $0x30] ss:$8 sps:$4 sm:$0xff]  }
  0x15   : > { %v1195_v31 = vld [vmem:[%s1307_s13 + $0x44] ss:$8 sps:$4 sm:$0xff]   ;;  %v1212_v32 = vld [vmem:[%s1307_s13 + $0xb0] ss:$8 sps:$4 sm:$0xff]   ;;  %v1197_v34 = vld [vmem:[%s1307_s13 + $0x40] ss:$8 sps:$4 sm:$0xff]  }
  0x16   : > { %v1216_v33 = vld [vmem:[%s1307_s13 + $0xc4] ss:$8 sps:$4 sm:$0xff]   ;;  %v1201_v35 = vld [vmem:[%s1307_s13 + $0x54] ss:$8 sps:$4 sm:$0xff]   ;;  %v1218_v36 = vld [vmem:[%s1307_s13 + $0xc0] ss:$8 sps:$4 sm:$0xff]  }
  0x17   : > { %1037 = vmatpush3.bf16.msra.mxu0 %v1173_v9  ;;  %1152 = vmatpush3.bf16.msra.mxu1 %v1173_v9  ;;  %v1219_v37 = vld [vmem:[%s1307_s13 + $0xd4] ss:$8 sps:$4 sm:$0xff]   ;;  %v1203_v38 = vld [vmem:[%s1307_s13 + $0x50] ss:$8 sps:$4 sm:$0xff]   ;;  %v1207_v39 = vld [vmem:[%s1307_s13 + $0x64] ss:$8 sps:$4 sm:$0xff]  }
  0x18   : > { %1038 = vmatprep.subr.bf16.mxu0 %v1174_v10  ;;  %1145 = vmatprep.subr.bf16.mxu1 %v1174_v10  ;;  %v1221_v40 = vld [vmem:[%s1307_s13 + $0xd0] ss:$8 sps:$4 sm:$0xff]   ;;  %v1222_v41 = vld [vmem:[%s1307_s13 + $0xe4] ss:$8 sps:$4 sm:$0xff]   ;;  %v1209_v42 = vld [vmem:[%s1307_s13 + $0x60] ss:$8 sps:$4 sm:$0xff]  }
  0x19   : > { %v1213_v43 = vld [vmem:[%s1307_s13 + $0x74] ss:$8 sps:$4 sm:$0xff]   ;;  %v1224_v44 = vld [vmem:[%s1307_s13 + $0xe0] ss:$8 sps:$4 sm:$0xff]   ;;  %v1215_v46 = vld [vmem:[%s1307_s13 + $0x70] ss:$8 sps:$4 sm:$0xff]  }
  0x1a   : > { %v1225_v45 = vld [vmem:[%s1307_s13 + $0xf4] ss:$8 sps:$4 sm:$0xff]   ;;  %v1227_v47 = vld [vmem:[%s1307_s13 + $0xf0] ss:$8 sps:$4 sm:$0xff]   ;;  %s224_s13 = scalar_lea.vmem %s1500_s4, %s975_s19 }
  0x1b   : > { %1039 = vmatpush3.bf16.msra.mxu0 %v1175_v12  ;;  %1153 = vmatpush3.bf16.msra.mxu1 %v1175_v12 }
  0x1c   : > { %1040 = vmatprep.subr.bf16.mxu0 %v1176_v13  ;;  %1146 = vmatprep.subr.bf16.mxu1 %v1176_v13 }
  0x1f   : > { %1041 = vmatpush3.bf16.msra.mxu0 %v1177_v15  ;;  %1154 = vmatpush3.bf16.msra.mxu1 %v1177_v15 }
  0x20   : > { %1042 = vmatprep.subr.bf16.mxu0 %v1178_v16  ;;  %1147 = vmatprep.subr.bf16.mxu1 %v1178_v16 }
  0x23   : > { %1043 = vmatpush3.bf16.msra.mxu0 %v1179_v17  ;;  %1155 = vmatpush3.bf16.msra.mxu1 %v1179_v17 }
  0x26   : > { %579 = vmatmul.mubr.bf16.vlgmr.msra.gmra.mrb[0].mxu0 %v1180_v18  ;;  %643 = vmatmul.mubr.bf16.vlgmr.msra.gmra.mrb[0].mxu1 %v1192_v20 }
  0x27   : > { %586 = vmatprep.mubr.bf16.mxu0 %v1183_v19  ;;  %650 = vmatprep.mubr.bf16.mxu1 %v1198_v21 }
  0x2e   : > { %587 = vmatmul.mubr.bf16.gmra.mrb[4].mxu0 %v1185_v22  ;;  %651 = vmatmul.mubr.bf16.gmra.mrb[4].mxu1 %v1200_v24 }
  0x2f   : > { %594 = vmatprep.mubr.bf16.mxu0 %v1186_v23  ;;  %658 = vmatprep.mubr.bf16.mxu1 %v1204_v25 }
  0x36   : > { %595 = vmatmul.mubr.bf16.gmra.mrb[8].mxu0 %v1188_v26  ;;  %659 = vmatmul.mubr.bf16.gmra.mrb[8].mxu1 %v1206_v28 }
  0x37   : > { %602 = vmatprep.mubr.bf16.mxu0 %v1189_v27  ;;  %666 = vmatprep.mubr.bf16.mxu1 %v1210_v29 }
  0x3e   : > { %603 = vmatmul.mubr.bf16.gmra.mrb[12].mxu0 %v1191_v30  ;;  %667 = vmatmul.mubr.bf16.gmra.mrb[12].mxu1 %v1212_v32 }
  0x3f   : > { %610 = vmatprep.mubr.bf16.mxu0 %v1195_v31  ;;  %674 = vmatprep.mubr.bf16.mxu1 %v1216_v33 }
  0x46   : > { %611 = vmatmul.mubr.bf16.gmra.mrb[16].mxu0 %v1197_v34  ;;  %675 = vmatmul.mubr.bf16.gmra.mrb[16].mxu1 %v1218_v36 }
  0x47   : > { %618 = vmatprep.mubr.bf16.mxu0 %v1201_v35  ;;  %682 = vmatprep.mubr.bf16.mxu1 %v1219_v37 }
  0x4e   : > { %619 = vmatmul.mubr.bf16.gmra.mrb[20].mxu0 %v1203_v38  ;;  %683 = vmatmul.mubr.bf16.gmra.mrb[20].mxu1 %v1221_v40 }
  0x4f   : > { %626 = vmatprep.mubr.bf16.mxu0 %v1207_v39  ;;  %690 = vmatprep.mubr.bf16.mxu1 %v1222_v41 }
  0x56   : > { %627 = vmatmul.mubr.bf16.gmra.mrb[24].mxu0 %v1209_v42  ;;  %691 = vmatmul.mubr.bf16.gmra.mrb[24].mxu1 %v1224_v44 }
  0x57   : > { %634 = vmatprep.mubr.bf16.mxu0 %v1213_v43  ;;  %698 = vmatprep.mubr.bf16.mxu1 %v1225_v45 }
  0x5e   : > { %635 = vmatmul.mubr.bf16.gmra.mrb[28].mxu0 %v1215_v46  ;;  %699 = vmatmul.mubr.bf16.gmra.mrb[28].mxu1 %v1227_v47 }
  0xf9   : > { %v1044_v48 = vpop.f32.mrb[0].mxu0  ;;  %v1092_v50 = vpop.f32.mrb[0].mxu1 }
  0xfa   : > { %v1045_v49 = vpop.f32.mrb[1].mxu0  ;;  %v1093_v53 = vpop.f32.mrb[1].mxu1 }
  0xfb   : > { %v1046_v51 = vadd.f32 %v1045_v49, %v1044_v48  ;;  %v1047_v52 = vpop.f32.mrb[2].mxu0  ;;  %v1369_v55 = vadd.f32 %v1093_v53, %v1092_v50  ;;  %v1095_v56 = vpop.f32.mrb[2].mxu1 }
  0xfc   : > { %v1048_v54 = vpop.f32.mrb[3].mxu0  ;;  %v1096_v58 = vpop.f32.mrb[3].mxu1 }
  0xfd   : > { %707 = vst [vmem:[%s1367_s7] sm:$0xff] %v1046_v51  ;;  %v1049_v57 = vadd.f32 %v1048_v54, %v1047_v52  ;;  %723 = vst [vmem:[%s1367_s7 + $0x80] sm:$0xff] %v1369_v55  ;;  %v1374_v59 = vadd.f32 %v1096_v58, %v1095_v56  ;;  %v776_v60 = vmul.f32 %v1046_v51, %v1046_v51 }
  0xff   : > { %708 = vst [vmem:[%s1367_s7 + $0x8] sm:$0xff] %v1049_v57  ;;  %v739_v61 = vadd.f32 %v1049_v57, %v1046_v51  ;;  %v777_v62 = vmul.f32 %v1049_v57, %v1049_v57  ;;  %724 = vst [vmem:[%s1367_s7 + $0x88] sm:$0xff] %v1374_v59 }
 0x101   : > { %v808_v63 = vadd.f32 %v777_v62, %v776_v60  ;;  %v1050_v0 = vpop.f32.mrb[4].mxu0  ;;  %v1098_v2 = vpop.f32.mrb[4].mxu1 }
 0x102   : > { %v1051_v1 = vpop.f32.mrb[5].mxu0  ;;  %v1099_v5 = vpop.f32.mrb[5].mxu1 }
 0x103   : > { %v1052_v3 = vadd.f32 %v1051_v1, %v1050_v0  ;;  %v1053_v4 = vpop.f32.mrb[6].mxu0  ;;  %v1379_v7 = vadd.f32 %v1099_v5, %v1098_v2  ;;  %v1101_v8 = vpop.f32.mrb[6].mxu1 }
 0x104   : > { %v1054_v6 = vpop.f32.mrb[7].mxu0  ;;  %v1102_v12 = vpop.f32.mrb[7].mxu1 }
 0x105   : > { %709 = vst [vmem:[%s1367_s7 + $0x10] sm:$0xff] %v1052_v3  ;;  %v740_v9 = vadd.f32 %v1052_v3, %v739_v61  ;;  %v778_v10 = vmul.f32 %v1052_v3, %v1052_v3  ;;  %v1055_v11 = vadd.f32 %v1054_v6, %v1053_v4  ;;  %725 = vst [vmem:[%s1367_s7 + $0x90] sm:$0xff] %v1379_v7 }
 0x106   : > { %v1384_v13 = vadd.f32 %v1102_v12, %v1101_v8 }
 0x107   : > { %v809_v14 = vadd.f32 %v808_v63, %v778_v10  ;;  %710 = vst [vmem:[%s1367_s7 + $0x18] sm:$0xff] %v1055_v11  ;;  %v741_v15 = vadd.f32 %v1055_v11, %v740_v9  ;;  %v779_v16 = vmul.f32 %v1055_v11, %v1055_v11 }
 0x108   : > { %726 = vst [vmem:[%s1367_s7 + $0x98] sm:$0xff] %v1384_v13 }
 0x109   : > { %v810_v17 = vadd.f32 %v809_v14, %v779_v16  ;;  %v1056_v18 = vpop.f32.mrb[8].mxu0  ;;  %v1104_v20 = vpop.f32.mrb[8].mxu1 }
 0x10a   : > { %v1057_v19 = vpop.f32.mrb[9].mxu0  ;;  %v1105_v23 = vpop.f32.mrb[9].mxu1 }
 0x10b   : > { %v1058_v21 = vadd.f32 %v1057_v19, %v1056_v18  ;;  %v1059_v22 = vpop.f32.mrb[10].mxu0  ;;  %v1389_v25 = vadd.f32 %v1105_v23, %v1104_v20  ;;  %v1107_v26 = vpop.f32.mrb[10].mxu1 }
 0x10c   : > { %v1060_v24 = vpop.f32.mrb[11].mxu0  ;;  %v1108_v30 = vpop.f32.mrb[11].mxu1 }
 0x10d   : > { %711 = vst [vmem:[%s1367_s7 + $0x20] sm:$0xff] %v1058_v21  ;;  %v742_v27 = vadd.f32 %v1058_v21, %v741_v15  ;;  %v780_v28 = vmul.f32 %v1058_v21, %v1058_v21  ;;  %v1061_v29 = vadd.f32 %v1060_v24, %v1059_v22  ;;  %727 = vst [vmem:[%s1367_s7 + $0xa0] sm:$0xff] %v1389_v25 }
 0x10e   : > { %v1394_v31 = vadd.f32 %v1108_v30, %v1107_v26 }
 0x10f   : > { %v811_v32 = vadd.f32 %v810_v17, %v780_v28  ;;  %712 = vst [vmem:[%s1367_s7 + $0x28] sm:$0xff] %v1061_v29  ;;  %v743_v33 = vadd.f32 %v1061_v29, %v742_v27  ;;  %v781_v34 = vmul.f32 %v1061_v29, %v1061_v29 }
 0x110   : > { %728 = vst [vmem:[%s1367_s7 + $0xa8] sm:$0xff] %v1394_v31 }
 0x111   : > { %v812_v35 = vadd.f32 %v811_v32, %v781_v34  ;;  %v1062_v36 = vpop.f32.mrb[12].mxu0  ;;  %v1110_v38 = vpop.f32.mrb[12].mxu1 }
 0x112   : > { %v1063_v37 = vpop.f32.mrb[13].mxu0  ;;  %v1111_v41 = vpop.f32.mrb[13].mxu1 }
 0x113   : > { %v1064_v39 = vadd.f32 %v1063_v37, %v1062_v36  ;;  %v1065_v40 = vpop.f32.mrb[14].mxu0  ;;  %v1399_v43 = vadd.f32 %v1111_v41, %v1110_v38  ;;  %v1113_v44 = vpop.f32.mrb[14].mxu1 }
 0x114   : > { %v1066_v42 = vpop.f32.mrb[15].mxu0  ;;  %v1114_v48 = vpop.f32.mrb[15].mxu1 }
 0x115   : > { %713 = vst [vmem:[%s1367_s7 + $0x30] sm:$0xff] %v1064_v39  ;;  %v744_v45 = vadd.f32 %v1064_v39, %v743_v33  ;;  %v782_v46 = vmul.f32 %v1064_v39, %v1064_v39  ;;  %v1067_v47 = vadd.f32 %v1066_v42, %v1065_v40  ;;  %729 = vst [vmem:[%s1367_s7 + $0xb0] sm:$0xff] %v1399_v43 }
 0x116   : > { %v1404_v49 = vadd.f32 %v1114_v48, %v1113_v44 }
 0x117   : > { %v813_v50 = vadd.f32 %v812_v35, %v782_v46  ;;  %714 = vst [vmem:[%s1367_s7 + $0x38] sm:$0xff] %v1067_v47  ;;  %v745_v51 = vadd.f32 %v1067_v47, %v744_v45  ;;  %v783_v52 = vmul.f32 %v1067_v47, %v1067_v47 }
 0x118   : > { %730 = vst [vmem:[%s1367_s7 + $0xb8] sm:$0xff] %v1404_v49 }
 0x119   : > { %v814_v53 = vadd.f32 %v813_v50, %v783_v52  ;;  %v1068_v54 = vpop.f32.mrb[16].mxu0  ;;  %v1116_v57 = vpop.f32.mrb[16].mxu1 }
 0x11a   : > { %v1069_v56 = vpop.f32.mrb[17].mxu0  ;;  %v1117_v61 = vpop.f32.mrb[17].mxu1 }
 0x11b   : > { %v1070_v58 = vadd.f32 %v1069_v56, %v1068_v54  ;;  %v1071_v60 = vpop.f32.mrb[18].mxu0  ;;  %v1409_v63 = vadd.f32 %v1117_v61, %v1116_v57  ;;  %v1119_v0 = vpop.f32.mrb[18].mxu1 }
 0x11c   : > { %v1072_v62 = vpop.f32.mrb[19].mxu0  ;;  %v1120_v4 = vpop.f32.mrb[19].mxu1 }
 0x11d   : > { %715 = vst [vmem:[%s1367_s7 + $0x40] sm:$0xff] %v1070_v58  ;;  %v746_v1 = vadd.f32 %v1070_v58, %v745_v51  ;;  %v784_v2 = vmul.f32 %v1070_v58, %v1070_v58  ;;  %v1073_v3 = vadd.f32 %v1072_v62, %v1071_v60  ;;  %731 = vst [vmem:[%s1367_s7 + $0xc0] sm:$0xff] %v1409_v63 }
 0x11e   : > { %v1414_v5 = vadd.f32 %v1120_v4, %v1119_v0 }
 0x11f   : > { %v815_v6 = vadd.f32 %v814_v53, %v784_v2  ;;  %716 = vst [vmem:[%s1367_s7 + $0x48] sm:$0xff] %v1073_v3  ;;  %v747_v8 = vadd.f32 %v1073_v3, %v746_v1  ;;  %v785_v9 = vmul.f32 %v1073_v3, %v1073_v3 }
 0x120   : > { %732 = vst [vmem:[%s1367_s7 + $0xc8] sm:$0xff] %v1414_v5 }
 0x121   : > { %v816_v10 = vadd.f32 %v815_v6, %v785_v9  ;;  %v1074_v11 = vpop.f32.mrb[20].mxu0  ;;  %v1122_v14 = vpop.f32.mrb[20].mxu1 }
 0x122   : > { %v1075_v12 = vpop.f32.mrb[21].mxu0  ;;  %v1123_v17 = vpop.f32.mrb[21].mxu1 }
 0x123   : > { %v1076_v15 = vadd.f32 %v1075_v12, %v1074_v11  ;;  %v1077_v16 = vpop.f32.mrb[22].mxu0  ;;  %v1419_v19 = vadd.f32 %v1123_v17, %v1122_v14  ;;  %v1125_v20 = vpop.f32.mrb[22].mxu1  ;;  %v793_v14 = vmul.f32 %v1374_v59, %v1374_v59  ;;  %v794_v17 = vmul.f32 %v1379_v7, %v1379_v7 }
 0x124   : > { %v1078_v18 = vpop.f32.mrb[23].mxu0  ;;  %v1126_v24 = vpop.f32.mrb[23].mxu1 }
 0x125   : > { %717 = vst [vmem:[%s1367_s7 + $0x50] sm:$0xff] %v1076_v15  ;;  %v748_v21 = vadd.f32 %v1076_v15, %v747_v8  ;;  %v786_v22 = vmul.f32 %v1076_v15, %v1076_v15  ;;  %v1079_v23 = vadd.f32 %v1078_v18, %v1077_v16  ;;  %733 = vst [vmem:[%s1367_s7 + $0xd0] sm:$0xff] %v1419_v19 }
 0x126   : > { %v1424_v26 = vadd.f32 %v1126_v24, %v1125_v20 }
 0x127   : > { %v817_v27 = vadd.f32 %v816_v10, %v786_v22  ;;  %718 = vst [vmem:[%s1367_s7 + $0x58] sm:$0xff] %v1079_v23  ;;  %v749_v28 = vadd.f32 %v1079_v23, %v748_v21  ;;  %v787_v29 = vmul.f32 %v1079_v23, %v1079_v23  ;;  %v792_v10 = vmul.f32 %v1369_v55, %v1369_v55 }
 0x128   : > { %734 = vst [vmem:[%s1367_s7 + $0xd8] sm:$0xff] %v1424_v26  ;;  %v795_v21 = vmul.f32 %v1384_v13, %v1384_v13 }
 0x129   : > { %v818_v30 = vadd.f32 %v817_v27, %v787_v29  ;;  %v1080_v32 = vpop.f32.mrb[24].mxu0  ;;  %v1128_v34 = vpop.f32.mrb[24].mxu1 }
 0x12a   : > { %v1081_v33 = vpop.f32.mrb[25].mxu0  ;;  %v1129_v37 = vpop.f32.mrb[25].mxu1 }
 0x12b   : > { %v1082_v35 = vadd.f32 %v1081_v33, %v1080_v32  ;;  %v1083_v36 = vpop.f32.mrb[26].mxu0  ;;  %v1429_v39 = vadd.f32 %v1129_v37, %v1128_v34  ;;  %v1131_v40 = vpop.f32.mrb[26].mxu1 }
 0x12c   : > { %v1084_v38 = vpop.f32.mrb[27].mxu0  ;;  %v1132_v45 = vpop.f32.mrb[27].mxu1 }
 0x12d   : > { %719 = vst [vmem:[%s1367_s7 + $0x60] sm:$0xff] %v1082_v35  ;;  %v750_v41 = vadd.f32 %v1082_v35, %v749_v28  ;;  %v788_v42 = vmul.f32 %v1082_v35, %v1082_v35  ;;  %v1085_v44 = vadd.f32 %v1084_v38, %v1083_v36  ;;  %735 = vst [vmem:[%s1367_s7 + $0xe0] sm:$0xff] %v1429_v39 }
 0x12e   : > { %v1434_v46 = vadd.f32 %v1132_v45, %v1131_v40  ;;  %v800_v35 = vmul.f32 %v1409_v63, %v1409_v63  ;;  %v801_v38 = vmul.f32 %v1414_v5, %v1414_v5 }
 0x12f   : > { %v819_v47 = vadd.f32 %v818_v30, %v788_v42  ;;  %720 = vst [vmem:[%s1367_s7 + $0x68] sm:$0xff] %v1085_v44  ;;  %v751_v48 = vadd.f32 %v1085_v44, %v750_v41  ;;  %v789_v50 = vmul.f32 %v1085_v44, %v1085_v44 }
 0x130   : > { %736 = vst [vmem:[%s1367_s7 + $0xe8] sm:$0xff] %v1434_v46 }
 0x131   : > { %v820_v51 = vadd.f32 %v819_v47, %v789_v50  ;;  %v1086_v52 = vpop.f32.mrb[28].mxu0  ;;  %v1134_v54 = vpop.f32.mrb[28].mxu1  ;;  %v805_v50 = vmul.f32 %v1434_v46, %v1434_v46 }
 0x132   : > { %v1087_v53 = vpop.f32.mrb[29].mxu0  ;;  %v1135_v58 = vpop.f32.mrb[29].mxu1 }
 0x133   : > { %v1088_v56 = vadd.f32 %v1087_v53, %v1086_v52  ;;  %v1089_v57 = vpop.f32.mrb[30].mxu0  ;;  %v1136_v61 = vadd.f32 %v1135_v58, %v1134_v54  ;;  %v1137_v62 = vpop.f32.mrb[30].mxu1 }
 0x134   : > { %v1090_v60 = vpop.f32.mrb[31].mxu0  ;;  %v1138_v3 = vpop.f32.mrb[31].mxu1 }
 0x135   : > { %721 = vst [vmem:[%s1367_s7 + $0x70] sm:$0xff] %v1088_v56  ;;  %v752_v0 = vadd.f32 %v1088_v56, %v751_v48  ;;  %v790_v1 = vmul.f32 %v1088_v56, %v1088_v56  ;;  %v1091_v2 = vadd.f32 %v1090_v60, %v1089_v57  ;;  %737 = vst [vmem:[%s1367_s7 + $0xf0] sm:$0xff] %v1136_v61 }
 0x136   : > { %v1139_v4 = vadd.f32 %v1138_v3, %v1137_v62 }
 0x137   : > { %v821_v6 = vadd.f32 %v820_v51, %v790_v1  ;;  %722 = vst [vmem:[%s1367_s7 + $0x78] sm:$0xff] %v1091_v2  ;;  %v753_v8 = vadd.f32 %v1091_v2, %v752_v0  ;;  %v791_v9 = vmul.f32 %v1091_v2, %v1091_v2 }
 0x138   : > { %738 = vst [vmem:[%s1367_s7 + $0xf8] sm:$0xff] %v1139_v4 }
 0x139   : > { %v754_v11 = vadd.f32 %v1369_v55, %v753_v8  ;;  %v822_v12 = vadd.f32 %v821_v6, %v791_v9  ;;  %v796_v55 = vmul.f32 %v1389_v25, %v1389_v25 }
 0x13b   : > { %v755_v15 = vadd.f32 %v1374_v59, %v754_v11  ;;  %v823_v16 = vadd.f32 %v822_v12, %v792_v10  ;;  %v797_v59 = vmul.f32 %v1394_v31, %v1394_v31 }
 0x13d   : > { %v756_v18 = vadd.f32 %v1379_v7, %v755_v15  ;;  %v824_v20 = vadd.f32 %v823_v16, %v793_v14  ;;  %v798_v7 = vmul.f32 %v1399_v43, %v1399_v43 }
 0x13f   : > { %v757_v22 = vadd.f32 %v1384_v13, %v756_v18  ;;  %v825_v23 = vadd.f32 %v824_v20, %v794_v17  ;;  %v799_v13 = vmul.f32 %v1404_v49, %v1404_v49 }
 0x141   : > { %v826_v24 = vadd.f32 %v825_v23, %v795_v21  ;;  %v758_v27 = vadd.f32 %v1389_v25, %v757_v22 }
 0x143   : > { %v759_v28 = vadd.f32 %v1394_v31, %v758_v27  ;;  %v827_v29 = vadd.f32 %v826_v24, %v796_v55 }
 0x145   : > { %v760_v30 = vadd.f32 %v1399_v43, %v759_v28  ;;  %v828_v32 = vadd.f32 %v827_v29, %v797_v59 }
 0x147   : > { %v761_v33 = vadd.f32 %v1404_v49, %v760_v30  ;;  %v829_v34 = vadd.f32 %v828_v32, %v798_v7  ;;  %v802_v49 = vmul.f32 %v1419_v19, %v1419_v19 }
 0x149   : > { %v762_v25 = vadd.f32 %v1409_v63, %v761_v33  ;;  %v830_v36 = vadd.f32 %v829_v34, %v799_v13  ;;  %v803_v63 = vmul.f32 %v1424_v26, %v1424_v26 }
 0x14b   : > { %v831_v31 = vadd.f32 %v830_v36, %v800_v35  ;;  %v763_v37 = vadd.f32 %v1414_v5, %v762_v25  ;;  %v804_v5 = vmul.f32 %v1429_v39, %v1429_v39 }
 0x14d   : > { %v832_v43 = vadd.f32 %v831_v31, %v801_v38  ;;  %v764_v40 = vadd.f32 %v1419_v19, %v763_v37  ;;  %v806_v19 = vmul.f32 %v1136_v61, %v1136_v61 }
 0x14f   : > { %v833_v41 = vadd.f32 %v832_v43, %v802_v49  ;;  %v765_v42 = vadd.f32 %v1424_v26, %v764_v40  ;;  %v807_v26 = vmul.f32 %v1139_v4, %v1139_v4 }
 0x151   : > { %v834_v44 = vadd.f32 %v833_v41, %v803_v63  ;;  %v766_v45 = vadd.f32 %v1429_v39, %v765_v42 }
 0x153   : > { %v835_v47 = vadd.f32 %v834_v44, %v804_v5  ;;  %v767_v48 = vadd.f32 %v1434_v46, %v766_v45 }
 0x155   : > { %v836_v51 = vadd.f32 %v835_v47, %v805_v50  ;;  %v768_v52 = vadd.f32 %v1136_v61, %v767_v48 }
 0x157   : > { %v837_v53 = vadd.f32 %v836_v51, %v806_v19  ;;  %v769_v54 = vadd.f32 %v1139_v4, %v768_v52 }
 0x159   : > { %v770_v56 = vrot.slane %v769_v54, 4  ;;  %v838_v57 = vadd.f32 %v837_v53, %v807_v26 }
 0x15b   : > { %v771_v58 = vadd.f32 %v770_v56, %v769_v54  ;;  %v839_v60 = vrot.slane %v838_v57, 4 }
 0x15d   : > { %v772_v62 = vrot.slane %v771_v58, 2  ;;  %v840_v39 = vadd.f32 %v839_v60, %v838_v57 }
 0x15f   : > { %v773_v0 = vadd.f32 %v772_v62, %v771_v58  ;;  %v841_v1 = vrot.slane %v840_v39, 2 }
 0x161   : > { %v774_v2 = vrot.slane %v773_v0, 1  ;;  %v842_v3 = vadd.f32 %v841_v1, %v840_v39 }
 0x163   : > { %v775_v46 = vadd.f32 %v774_v2, %v773_v0  ;;  %v843_v61 = vrot.slane %v842_v3, 1 }
 0x165   : > { %v844_v4 = vadd.f32 %v843_v61, %v842_v3  ;;  %845 = vst [vmem:[%s220_s10] sm:$0xff] %v775_v46 }
 0x167   : > { %846 = vst [vmem:[%s224_s13] sm:$0xff] %v844_v4 }
 0x168 PF: > { %s15_s15 = sadd.s32 1, %s1234_s15  }
 0x169   : > { %p12_p5 = scmp.ge.s32.totalorder %s15_s15, 4  }
 0x16b   :  { %14 = sbr.rel (!%p12_p5) target bundleno = 1 (0x1), region = 82 }

// kernel: hourglass_forward.53
= control target key start
LH: loop header
LB: loop body
LE: loop exit
PB: predicated region body
PF: predicated region fallthrough
CT: control target
= control target key end

     0   :  { %s708_s12 = smov 0   ;;  %s851_s0 = inlined_call_operand.vmem [shape: f32[512,128], index: 0, kind: input, shape index: {}]   ;;  %s852_s1 = inlined_call_operand.vmem [shape: f32[1,128], index: 1, kind: input, shape index: {}]   ;;  %s853_s2 = inlined_call_operand.vmem [shape: f32[1,128], index: 2, kind: input, shape index: {}]   ;;  %s854_s3 = inlined_call_operand.vmem [shape: bf16[512,128], index: 3, kind: output, shape index: {}]  }
   0x1 LB: > { %s500_s13 = sadd.s32 4294967295, %s686_s12   ;;  %p504_p0 = scmp.ge.s32.totalorder %s686_s12, 1  ;;  %s686_s12 = sphi %s708_s12, %s13_s12  }
   0x2   : > { %p138_p1 = scmp.lt.s32.totalorder %s686_s12, 3 }
   0x4   : > { %p139_p2 = pnand %p504_p0, %p138_p1 }
   0x5   : > { %s505_s14 = sshll.u32 (!%p139_p2), %s500_s13, 5  ;;  %v719_v0 = vld [vmem:[%s852_s1] ss:$0 sm:$0xff] (!%p139_p2) }
   0x6   : > { %142 = sbr.rel (%p139_p2) target bundleno = 42 (0x2a), region = 32  ;;  %p163_p3 = scmp.lt.s32.totalorder (!%p139_p2), %s505_s14, 63  ;;  %v729_v1 = vld [vmem:[%s853_s2] ss:$0 sm:$0xff] (!%p139_p2) }
   0xd   : > { %s856_s14 = smov (!%p163_p3, %s505_s14), 63 }
   0xe   : > { %s506_s15 = sshll.u32 %s856_s14, 3  ;;  %s508_s23 = sshll.u32 %s856_s14, 2 }
   0xf   : > { %s724_s20 = scalar_lea.vmem %s851_s0, %s506_s15  ;;  %s755_s26 = scalar_lea.vmem %s854_s3, %s508_s23 }
  0x10   : > { %v174_v2 = vld [vmem:[%s724_s20] sm:$0xff]  ;;  %v175_v3 = vld [vmem:[%s724_s20 + $0x8] sm:$0xff]  ;;  %v176_v4 = vld [vmem:[%s724_s20 + $0x10] sm:$0xff] }
  0x11   : > { %v213_v5 = vmul.f32 %v719_v0, %v174_v2  ;;  %v214_v6 = vmul.f32 %v719_v0, %v175_v3  ;;  %v177_v7 = vld [vmem:[%s724_s20 + $0x18] sm:$0xff]  ;;  %v215_v8 = vmul.f32 %v719_v0, %v176_v4  ;;  %v178_v9 = vld [vmem:[%s724_s20 + $0x20] sm:$0xff]  ;;  %v179_v10 = vld [vmem:[%s724_s20 + $0x28] sm:$0xff] }
  0x12   : > { %v216_v11 = vmul.f32 %v719_v0, %v177_v7  ;;  %v217_v12 = vmul.f32 %v719_v0, %v178_v9  ;;  %v218_v13 = vmul.f32 %v719_v0, %v179_v10  ;;  %v180_v14 = vld [vmem:[%s724_s20 + $0x30] sm:$0xff]  ;;  %v181_v15 = vld [vmem:[%s724_s20 + $0x38] sm:$0xff]  ;;  %v182_v16 = vld [vmem:[%s724_s20 + $0x40] sm:$0xff] }
  0x13   : > { %v252_v17 = vadd.f32 %v729_v1, %v213_v5  ;;  %v253_v18 = vadd.f32 %v729_v1, %v214_v6  ;;  %v254_v19 = vadd.f32 %v729_v1, %v215_v8  ;;  %v219_v20 = vmul.f32 %v719_v0, %v180_v14  ;;  %v183_v21 = vld [vmem:[%s724_s20 + $0x48] sm:$0xff]  ;;  %v184_v22 = vld [vmem:[%s724_s20 + $0x50] sm:$0xff]  ;;  %v185_v27 = vld [vmem:[%s724_s20 + $0x58] sm:$0xff] }
  0x14   : > { %v255_v23 = vadd.f32 %v729_v1, %v216_v11  ;;  %v256_v24 = vadd.f32 %v729_v1, %v217_v12  ;;  %v257_v25 = vadd.f32 %v729_v1, %v218_v13  ;;  %v220_v26 = vmul.f32 %v719_v0, %v181_v15  ;;  %v186_v28 = vld [vmem:[%s724_s20 + $0x60] sm:$0xff]  ;;  %v187_v33 = vld [vmem:[%s724_s20 + $0x68] sm:$0xff]  ;;  %v188_v34 = vld [vmem:[%s724_s20 + $0x70] sm:$0xff] }
  0x15   : > { %v580_v29 = vpack.c.bf16 %v253_v18, %v252_v17  ;;  %v258_v30 = vadd.f32 %v729_v1, %v219_v20  ;;  %v221_v31 = vmul.f32 %v719_v0, %v182_v16  ;;  %v222_v32 = vmul.f32 %v719_v0, %v183_v21  ;;  %v189_v39 = vld [vmem:[%s724_s20 + $0x78] sm:$0xff]  ;;  %v190_v44 = vld [vmem:[%s724_s20 + $0x80] sm:$0xff]  ;;  %v191_v45 = vld [vmem:[%s724_s20 + $0x88] sm:$0xff] }
  0x16   : > { %v585_v35 = vpack.c.bf16 %v255_v23, %v254_v19  ;;  %v590_v36 = vpack.c.bf16 %v257_v25, %v256_v24  ;;  %v259_v37 = vadd.f32 %v729_v1, %v220_v26  ;;  %v223_v38 = vmul.f32 %v719_v0, %v184_v22  ;;  %v192_v50 = vld [vmem:[%s724_s20 + $0x90] sm:$0xff]  ;;  %v193_v51 = vld [vmem:[%s724_s20 + $0x98] sm:$0xff]  ;;  %v194_v56 = vld [vmem:[%s724_s20 + $0xa0] sm:$0xff] }
  0x17   : > { %581 = vst [vmem:[%s755_s26] sm:$0xff] %v580_v29   ;;  %v260_v40 = vadd.f32 %v729_v1, %v221_v31  ;;  %v261_v41 = vadd.f32 %v729_v1, %v222_v32  ;;  %v224_v42 = vmul.f32 %v719_v0, %v185_v27  ;;  %v225_v43 = vmul.f32 %v719_v0, %v186_v28  ;;  %v195_v61 = vld [vmem:[%s724_s20 + $0xa8] sm:$0xff]  ;;  %v196_v4 = vld [vmem:[%s724_s20 + $0xb0] sm:$0xff]  ;;  %v197_v5 = vld [vmem:[%s724_s20 + $0xb8] sm:$0xff] }
  0x18   : > { %657 = vst [vmem:[%s755_s26 + $0x8] sm:$0xff] %v585_v35   ;;  %658 = vst [vmem:[%s755_s26 + $0x10] sm:$0xff] %v590_v36   ;;  %v595_v46 = vpack.c.bf16 %v259_v37, %v258_v30  ;;  %v262_v47 = vadd.f32 %v729_v1, %v223_v38  ;;  %v226_v48 = vmul.f32 %v719_v0, %v187_v33  ;;  %v198_v10 = vld [vmem:[%s724_s20 + $0xc0] sm:$0xff]  ;;  %v199_v11 = vld [vmem:[%s724_s20 + $0xc8] sm:$0xff] }
  0x19   : > { %v227_v49 = vmul.f32 %v719_v0, %v188_v34  ;;  %v600_v52 = vpack.c.bf16 %v261_v41, %v260_v40  ;;  %v263_v53 = vadd.f32 %v729_v1, %v224_v42  ;;  %v264_v54 = vadd.f32 %v729_v1, %v225_v43  ;;  %v200_v16 = vld [vmem:[%s724_s20 + $0xd0] sm:$0xff]  ;;  %v201_v17 = vld [vmem:[%s724_s20 + $0xd8] sm:$0xff]  ;;  %v202_v22 = vld [vmem:[%s724_s20 + $0xe0] sm:$0xff] }
  0x1a   : > { %v228_v55 = vmul.f32 %v719_v0, %v189_v39  ;;  %659 = vst [vmem:[%s755_s26 + $0x18] sm:$0xff] %v595_v46   ;;  %v265_v57 = vadd.f32 %v729_v1, %v226_v48  ;;  %v229_v59 = vmul.f32 %v719_v0, %v190_v44  ;;  %v230_v60 = vmul.f32 %v719_v0, %v191_v45  ;;  %v203_v27 = vld [vmem:[%s724_s20 + $0xe8] sm:$0xff]  ;;  %v204_v32 = vld [vmem:[%s724_s20 + $0xf0] sm:$0xff]  ;;  %v205_v33 = vld [vmem:[%s724_s20 + $0xf8] sm:$0xff] }
  0x1b   : > { %v266_v58 = vadd.f32 %v729_v1, %v227_v49  ;;  %660 = vst [vmem:[%s755_s26 + $0x20] sm:$0xff] %v600_v52   ;;  %v605_v62 = vpack.c.bf16 %v263_v53, %v262_v47  ;;  %v231_v2 = vmul.f32 %v719_v0, %v192_v50  ;;  %v232_v3 = vmul.f32 %v719_v0, %v193_v51 }
  0x1c   : > { %v267_v63 = vadd.f32 %v729_v1, %v228_v55  ;;  %v610_v6 = vpack.c.bf16 %v265_v57, %v264_v54  ;;  %v268_v7 = vadd.f32 %v729_v1, %v229_v59  ;;  %v269_v8 = vadd.f32 %v729_v1, %v230_v60 }
  0x1d   : > { %v233_v9 = vmul.f32 %v719_v0, %v194_v56  ;;  %661 = vst [vmem:[%s755_s26 + $0x28] sm:$0xff] %v605_v62   ;;  %v270_v13 = vadd.f32 %v729_v1, %v231_v2  ;;  %v271_v14 = vadd.f32 %v729_v1, %v232_v3  ;;  %v234_v15 = vmul.f32 %v719_v0, %v195_v61 }
  0x1e   : > { %v615_v12 = vpack.c.bf16 %v267_v63, %v266_v58  ;;  %662 = vst [vmem:[%s755_s26 + $0x30] sm:$0xff] %v610_v6   ;;  %v620_v18 = vpack.c.bf16 %v269_v8, %v268_v7  ;;  %v235_v20 = vmul.f32 %v719_v0, %v196_v4  ;;  %v236_v21 = vmul.f32 %v719_v0, %v197_v5 }
  0x1f   : > { %v272_v19 = vadd.f32 %v729_v1, %v233_v9  ;;  %v625_v23 = vpack.c.bf16 %v271_v14, %v270_v13  ;;  %v273_v24 = vadd.f32 %v729_v1, %v234_v15  ;;  %v237_v25 = vmul.f32 %v719_v0, %v198_v10 }
  0x20   : > { %663 = vst [vmem:[%s755_s26 + $0x38] sm:$0xff] %v615_v12   ;;  %v238_v26 = vmul.f32 %v719_v0, %v199_v11  ;;  %664 = vst [vmem:[%s755_s26 + $0x40] sm:$0xff] %v620_v18   ;;  %v274_v28 = vadd.f32 %v729_v1, %v235_v20  ;;  %v275_v29 = vadd.f32 %v729_v1, %v236_v21 }
  0x21   : > { %v239_v30 = vmul.f32 %v719_v0, %v200_v16  ;;  %v240_v31 = vmul.f32 %v719_v0, %v201_v17  ;;  %665 = vst [vmem:[%s755_s26 + $0x48] sm:$0xff] %v625_v23   ;;  %v630_v34 = vpack.c.bf16 %v273_v24, %v272_v19  ;;  %v276_v35 = vadd.f32 %v729_v1, %v237_v25 }
  0x22   : > { %v277_v36 = vadd.f32 %v729_v1, %v238_v26  ;;  %v241_v37 = vmul.f32 %v719_v0, %v202_v22  ;;  %v635_v38 = vpack.c.bf16 %v275_v29, %v274_v28  ;;  %v242_v41 = vmul.f32 %v719_v0, %v203_v27 }
  0x23   : > { %v278_v39 = vadd.f32 %v729_v1, %v239_v30  ;;  %v279_v40 = vadd.f32 %v729_v1, %v240_v31  ;;  %666 = vst [vmem:[%s755_s26 + $0x50] sm:$0xff] %v630_v34   ;;  %v243_v44 = vmul.f32 %v719_v0, %v204_v32  ;;  %v244_v45 = vmul.f32 %v719_v0, %v205_v33 }
  0x24   : > { %v640_v42 = vpack.c.bf16 %v277_v36, %v276_v35  ;;  %v280_v43 = vadd.f32 %v729_v1, %v241_v37  ;;  %667 = vst [vmem:[%s755_s26 + $0x58] sm:$0xff] %v635_v38   ;;  %v281_v47 = vadd.f32 %v729_v1, %v242_v41 }
  0x25   : > { %v645_v46 = vpack.c.bf16 %v279_v40, %v278_v39  ;;  %v282_v48 = vadd.f32 %v729_v1, %v243_v44  ;;  %v283_v49 = vadd.f32 %v729_v1, %v244_v45 }
  0x26   : > { %668 = vst [vmem:[%s755_s26 + $0x60] sm:$0xff] %v640_v42   ;;  %v650_v50 = vpack.c.bf16 %v281_v47, %v280_v43 }
  0x27   : > { %669 = vst [vmem:[%s755_s26 + $0x68] sm:$0xff] %v645_v46   ;;  %v655_v51 = vpack.c.bf16 %v283_v49, %v282_v48 }
  0x28   : > { %670 = vst [vmem:[%s755_s26 + $0x70] sm:$0xff] %v650_v50  }
  0x29   : > { %671 = vst [vmem:[%s755_s26 + $0x78] sm:$0xff] %v655_v51  }
  0x2a PF: > { %s13_s12 = sadd.s32 1, %s686_s12  }
  0x2b   : > { %p10_p4 = scmp.ge.s32.totalorder %s13_s12, 4  }
  0x2d   :  { %12 = sbr.rel (!%p10_p4) target bundleno = 1 (0x1), region = 62 }

// kernel: hourglass_forward.48
= control target key start
LH: loop header
LB: loop body
LE: loop exit
PB: predicated region body
PF: predicated region fallthrough
CT: control target
= control target key end

     0   :  { %s769_s1 = inlined_call_operand.vmem [shape: bf16[256,128], index: 1, kind: input, shape index: {}]   ;;  %s770_s0 = inlined_call_operand.vmem [shape: bf16[128,256], index: 0, kind: input, shape index: {}]   ;;  %s771_s2 = inlined_call_operand.vmem [shape: f32[128,128], index: 2, kind: output, shape index: {0}]   ;;  %s772_s3 = inlined_call_operand.vmem [shape: f32[1,8,128], index: 3, kind: output, shape index: {1}]   ;;  %s773_s4 = inlined_call_operand.vmem [shape: f32[1,8,128], index: 4, kind: output, shape index: {2}]  }
   0x1   :  { %v536_v0 = vld [vmem:[%s769_s1 + $0x40] sm:$0xff]   ;;  %v538_v2 = vld [vmem:[%s769_s1 + $0x48] sm:$0xff]   ;;  %v540_v4 = vld [vmem:[%s769_s1 + $0x50] sm:$0xff]  }
   0x2   :  { %v537_v1 = vld [vmem:[%s769_s1] sm:$0xff]   ;;  %456 = vmatprep.subr.bf16.mxu0 %v536_v0  ;;  %520 = vmatprep.subr.bf16.mxu1 %v536_v0  ;;  %v539_v3 = vld [vmem:[%s769_s1 + $0x8] sm:$0xff]   ;;  %v541_v5 = vld [vmem:[%s769_s1 + $0x10] sm:$0xff]  }
   0x3   :  { %457 = vmatpush3.bf16.msra.mxu0 %v537_v1  ;;  %528 = vmatpush3.bf16.msra.mxu1 %v537_v1  ;;  %v542_v6 = vld [vmem:[%s769_s1 + $0x58] sm:$0xff]   ;;  %v544_v8 = vld [vmem:[%s769_s1 + $0x60] sm:$0xff]   ;;  %v546_v10 = vld [vmem:[%s769_s1 + $0x68] sm:$0xff]  }
   0x4   :  { %458 = vmatprep.subr.bf16.mxu0 %v538_v2  ;;  %521 = vmatprep.subr.bf16.mxu1 %v538_v2  ;;  %v543_v7 = vld [vmem:[%s769_s1 + $0x18] sm:$0xff]   ;;  %v545_v9 = vld [vmem:[%s769_s1 + $0x20] sm:$0xff]   ;;  %v547_v12 = vld [vmem:[%s769_s1 + $0x28] sm:$0xff]  }
   0x5   :  { %v554_v11 = vld [vmem:[%s770_s0 + $0x4] ss:$8 sps:$4 sm:$0xff]   ;;  %v548_v14 = vld [vmem:[%s769_s1 + $0x70] sm:$0xff]   ;;  %v550_v16 = vld [vmem:[%s769_s1 + $0x78] sm:$0xff]  }
   0x6   :  { %v560_v13 = vld [vmem:[%s770_s0 + $0x44] ss:$8 sps:$4 sm:$0xff]   ;;  %271 = vmatprep.mubr.bf16.mxu0 %v554_v11  ;;  %v549_v15 = vld [vmem:[%s769_s1 + $0x30] sm:$0xff]   ;;  %v551_v17 = vld [vmem:[%s769_s1 + $0x38] sm:$0xff]  }
   0x7   :  { %459 = vmatpush3.bf16.msra.mxu0 %v539_v3  ;;  %529 = vmatpush3.bf16.msra.mxu1 %v539_v3  ;;  %v552_v18 = vld [vmem:[%s770_s0] ss:$8 sps:$4 sm:$0xff]   ;;  %v555_v20 = vld [vmem:[%s770_s0 + $0x14] ss:$8 sps:$4 sm:$0xff]   ;;  %v557_v22 = vld [vmem:[%s770_s0 + $0x10] ss:$8 sps:$4 sm:$0xff]  }
   0x8   :  { %460 = vmatprep.subr.bf16.mxu0 %v540_v4  ;;  %522 = vmatprep.subr.bf16.mxu1 %v540_v4  ;;  %v558_v19 = vld [vmem:[%s770_s0 + $0x40] ss:$8 sps:$4 sm:$0xff]   ;;  %v564_v21 = vld [vmem:[%s770_s0 + $0x54] ss:$8 sps:$4 sm:$0xff]   ;;  %v566_v23 = vld [vmem:[%s770_s0 + $0x50] ss:$8 sps:$4 sm:$0xff]  }
   0x9   :  { %303 = vmatprep.mubr.bf16.mxu1 %v560_v13  ;;  %v561_v24 = vld [vmem:[%s770_s0 + $0x24] ss:$8 sps:$4 sm:$0xff]   ;;  %v563_v26 = vld [vmem:[%s770_s0 + $0x20] ss:$8 sps:$4 sm:$0xff]   ;;  %v567_v28 = vld [vmem:[%s770_s0 + $0x34] ss:$8 sps:$4 sm:$0xff]  }
   0xa   :  { %v570_v25 = vld [vmem:[%s770_s0 + $0x64] ss:$8 sps:$4 sm:$0xff]   ;;  %v572_v27 = vld [vmem:[%s770_s0 + $0x60] ss:$8 sps:$4 sm:$0xff]   ;;  %v573_v29 = vld [vmem:[%s770_s0 + $0x74] ss:$8 sps:$4 sm:$0xff]  }
   0xb   :  { %461 = vmatpush3.bf16.msra.mxu0 %v541_v5  ;;  %530 = vmatpush3.bf16.msra.mxu1 %v541_v5  ;;  %v569_v30 = vld [vmem:[%s770_s0 + $0x30] ss:$8 sps:$4 sm:$0xff]  }
   0xc   :  { %462 = vmatprep.subr.bf16.mxu0 %v542_v6  ;;  %523 = vmatprep.subr.bf16.mxu1 %v542_v6  ;;  %v575_v31 = vld [vmem:[%s770_s0 + $0x70] ss:$8 sps:$4 sm:$0xff]  }
   0xf   :  { %463 = vmatpush3.bf16.msra.mxu0 %v543_v7  ;;  %531 = vmatpush3.bf16.msra.mxu1 %v543_v7 }
  0x10   :  { %464 = vmatprep.subr.bf16.mxu0 %v544_v8  ;;  %524 = vmatprep.subr.bf16.mxu1 %v544_v8 }
  0x13   :  { %465 = vmatpush3.bf16.msra.mxu0 %v545_v9  ;;  %532 = vmatpush3.bf16.msra.mxu1 %v545_v9 }
  0x14   :  { %466 = vmatprep.subr.bf16.mxu0 %v546_v10  ;;  %525 = vmatprep.subr.bf16.mxu1 %v546_v10 }
  0x17   :  { %467 = vmatpush3.bf16.msra.mxu0 %v547_v12  ;;  %533 = vmatpush3.bf16.msra.mxu1 %v547_v12 }
  0x18   :  { %468 = vmatprep.subr.bf16.mxu0 %v548_v14  ;;  %526 = vmatprep.subr.bf16.mxu1 %v548_v14 }
  0x1b   :  { %469 = vmatpush3.bf16.msra.mxu0 %v549_v15  ;;  %534 = vmatpush3.bf16.msra.mxu1 %v549_v15 }
  0x1c   :  { %470 = vmatprep.subr.bf16.mxu0 %v550_v16  ;;  %527 = vmatprep.subr.bf16.mxu1 %v550_v16 }
  0x1f   :  { %471 = vmatpush3.bf16.msra.mxu0 %v551_v17  ;;  %535 = vmatpush3.bf16.msra.mxu1 %v551_v17 }
  0x22   :  { %272 = vmatmul.mubr.bf16.vlgmr.msra.gmra.mrb[0].mxu0 %v552_v18  ;;  %304 = vmatmul.mubr.bf16.vlgmr.msra.gmra.mrb[0].mxu1 %v558_v19 }
  0x23   :  { %279 = vmatprep.mubr.bf16.mxu0 %v555_v20  ;;  %311 = vmatprep.mubr.bf16.mxu1 %v564_v21 }
  0x2a   :  { %280 = vmatmul.mubr.bf16.gmra.mrb[4].mxu0 %v557_v22  ;;  %312 = vmatmul.mubr.bf16.gmra.mrb[4].mxu1 %v566_v23 }
  0x2b   :  { %287 = vmatprep.mubr.bf16.mxu0 %v561_v24  ;;  %319 = vmatprep.mubr.bf16.mxu1 %v570_v25 }
  0x32   :  { %288 = vmatmul.mubr.bf16.gmra.mrb[8].mxu0 %v563_v26  ;;  %320 = vmatmul.mubr.bf16.gmra.mrb[8].mxu1 %v572_v27 }
  0x33   :  { %295 = vmatprep.mubr.bf16.mxu0 %v567_v28  ;;  %327 = vmatprep.mubr.bf16.mxu1 %v573_v29 }
  0x3a   :  { %296 = vmatmul.mubr.bf16.gmra.mrb[12].mxu0 %v569_v30  ;;  %328 = vmatmul.mubr.bf16.gmra.mrb[12].mxu1 %v575_v31 }
  0xf5   :  { %v472_v32 = vpop.f32.mrb[0].mxu0  ;;  %v496_v33 = vpop.f32.mrb[0].mxu1 }
  0xf6   :  { %v473_v34 = vpop.f32.mrb[1].mxu0  ;;  %v497_v35 = vpop.f32.mrb[1].mxu1 }
  0xf7   :  { %v474_v36 = vadd.f32 %v473_v34, %v472_v32  ;;  %v475_v37 = vpop.f32.mrb[2].mxu0  ;;  %v697_v38 = vadd.f32 %v497_v35, %v496_v33  ;;  %v499_v39 = vpop.f32.mrb[2].mxu1 }
  0xf8   :  { %v476_v40 = vpop.f32.mrb[3].mxu0  ;;  %v500_v41 = vpop.f32.mrb[3].mxu1 }
  0xf9   :  { %336 = vst [vmem:[%s771_s2] sm:$0xff] %v474_v36  ;;  %v477_v42 = vadd.f32 %v476_v40, %v475_v37  ;;  %344 = vst [vmem:[%s771_s2 + $0x40] sm:$0xff] %v697_v38  ;;  %v706_v43 = vadd.f32 %v500_v41, %v499_v39  ;;  %v373_v44 = vmul.f32 %v474_v36, %v474_v36 }
  0xfa   :  { %v381_v37 = vmul.f32 %v697_v38, %v697_v38 }
  0xfb   :  { %337 = vst [vmem:[%s771_s2 + $0x8] sm:$0xff] %v477_v42  ;;  %v352_v45 = vadd.f32 %v477_v42, %v474_v36  ;;  %v374_v46 = vmul.f32 %v477_v42, %v477_v42  ;;  %345 = vst [vmem:[%s771_s2 + $0x48] sm:$0xff] %v706_v43  ;;  %v382_v41 = vmul.f32 %v706_v43, %v706_v43 }
  0xfd   :  { %v389_v47 = vadd.f32 %v374_v46, %v373_v44  ;;  %v478_v48 = vpop.f32.mrb[4].mxu0  ;;  %v502_v49 = vpop.f32.mrb[4].mxu1 }
  0xfe   :  { %v479_v50 = vpop.f32.mrb[5].mxu0  ;;  %v503_v51 = vpop.f32.mrb[5].mxu1 }
  0xff   :  { %v480_v52 = vadd.f32 %v479_v50, %v478_v48  ;;  %v481_v53 = vpop.f32.mrb[6].mxu0  ;;  %v715_v54 = vadd.f32 %v503_v51, %v502_v49  ;;  %v505_v55 = vpop.f32.mrb[6].mxu1 }
 0x100   :  { %v482_v56 = vpop.f32.mrb[7].mxu0  ;;  %v506_v57 = vpop.f32.mrb[7].mxu1 }
 0x101   :  { %338 = vst [vmem:[%s771_s2 + $0x10] sm:$0xff] %v480_v52  ;;  %v353_v58 = vadd.f32 %v480_v52, %v352_v45  ;;  %v375_v59 = vmul.f32 %v480_v52, %v480_v52  ;;  %v483_v60 = vadd.f32 %v482_v56, %v481_v53  ;;  %346 = vst [vmem:[%s771_s2 + $0x50] sm:$0xff] %v715_v54 }
 0x102   :  { %v507_v61 = vadd.f32 %v506_v57, %v505_v55  ;;  %v383_v45 = vmul.f32 %v715_v54, %v715_v54 }
 0x103   :  { %v390_v62 = vadd.f32 %v389_v47, %v375_v59  ;;  %339 = vst [vmem:[%s771_s2 + $0x18] sm:$0xff] %v483_v60  ;;  %v354_v63 = vadd.f32 %v483_v60, %v353_v58  ;;  %v376_v0 = vmul.f32 %v483_v60, %v483_v60 }
 0x104   :  { %347 = vst [vmem:[%s771_s2 + $0x58] sm:$0xff] %v507_v61  ;;  %v384_v48 = vmul.f32 %v507_v61, %v507_v61 }
 0x105   :  { %v391_v1 = vadd.f32 %v390_v62, %v376_v0  ;;  %v484_v2 = vpop.f32.mrb[8].mxu0  ;;  %v508_v3 = vpop.f32.mrb[8].mxu1 }
 0x106   :  { %v485_v4 = vpop.f32.mrb[9].mxu0  ;;  %v509_v5 = vpop.f32.mrb[9].mxu1 }
 0x107   :  { %v486_v6 = vadd.f32 %v485_v4, %v484_v2  ;;  %v487_v7 = vpop.f32.mrb[10].mxu0  ;;  %v510_v8 = vadd.f32 %v509_v5, %v508_v3  ;;  %v511_v9 = vpop.f32.mrb[10].mxu1 }
 0x108   :  { %v488_v10 = vpop.f32.mrb[11].mxu0  ;;  %v512_v11 = vpop.f32.mrb[11].mxu1 }
 0x109   :  { %340 = vst [vmem:[%s771_s2 + $0x20] sm:$0xff] %v486_v6  ;;  %v355_v12 = vadd.f32 %v486_v6, %v354_v63  ;;  %v377_v13 = vmul.f32 %v486_v6, %v486_v6  ;;  %v489_v14 = vadd.f32 %v488_v10, %v487_v7  ;;  %348 = vst [vmem:[%s771_s2 + $0x60] sm:$0xff] %v510_v8 }
 0x10a   :  { %v513_v15 = vadd.f32 %v512_v11, %v511_v9  ;;  %v385_v52 = vmul.f32 %v510_v8, %v510_v8 }
 0x10b   :  { %v392_v16 = vadd.f32 %v391_v1, %v377_v13  ;;  %341 = vst [vmem:[%s771_s2 + $0x28] sm:$0xff] %v489_v14  ;;  %v356_v17 = vadd.f32 %v489_v14, %v355_v12  ;;  %v378_v18 = vmul.f32 %v489_v14, %v489_v14 }
 0x10c   :  { %349 = vst [vmem:[%s771_s2 + $0x68] sm:$0xff] %v513_v15  ;;  %v386_v56 = vmul.f32 %v513_v15, %v513_v15 }
 0x10d   :  { %v393_v19 = vadd.f32 %v392_v16, %v378_v18  ;;  %v490_v20 = vpop.f32.mrb[12].mxu0  ;;  %v514_v21 = vpop.f32.mrb[12].mxu1 }
 0x10e   :  { %v491_v22 = vpop.f32.mrb[13].mxu0  ;;  %v515_v23 = vpop.f32.mrb[13].mxu1 }
 0x10f   :  { %v492_v24 = vadd.f32 %v491_v22, %v490_v20  ;;  %v493_v25 = vpop.f32.mrb[14].mxu0  ;;  %v516_v26 = vadd.f32 %v515_v23, %v514_v21  ;;  %v517_v27 = vpop.f32.mrb[14].mxu1 }
 0x110   :  { %v494_v28 = vpop.f32.mrb[15].mxu0  ;;  %v518_v29 = vpop.f32.mrb[15].mxu1 }
 0x111   :  { %342 = vst [vmem:[%s771_s2 + $0x30] sm:$0xff] %v492_v24  ;;  %v357_v30 = vadd.f32 %v492_v24, %v356_v17  ;;  %v379_v31 = vmul.f32 %v492_v24, %v492_v24  ;;  %v495_v32 = vadd.f32 %v494_v28, %v493_v25  ;;  %350 = vst [vmem:[%s771_s2 + $0x70] sm:$0xff] %v516_v26 }
 0x112   :  { %v519_v33 = vadd.f32 %v518_v29, %v517_v27  ;;  %v387_v57 = vmul.f32 %v516_v26, %v516_v26 }
 0x113   :  { %v394_v34 = vadd.f32 %v393_v19, %v379_v31  ;;  %343 = vst [vmem:[%s771_s2 + $0x38] sm:$0xff] %v495_v32  ;;  %v358_v35 = vadd.f32 %v495_v32, %v357_v30  ;;  %v380_v36 = vmul.f32 %v495_v32, %v495_v32 }
 0x114   :  { %351 = vst [vmem:[%s771_s2 + $0x78] sm:$0xff] %v519_v33  ;;  %v388_v62 = vmul.f32 %v519_v33, %v519_v33 }
 0x115   :  { %v359_v39 = vadd.f32 %v697_v38, %v358_v35  ;;  %v395_v40 = vadd.f32 %v394_v34, %v380_v36 }
 0x117   :  { %v360_v42 = vadd.f32 %v706_v43, %v359_v39  ;;  %v396_v44 = vadd.f32 %v395_v40, %v381_v37 }
 0x119   :  { %v397_v46 = vadd.f32 %v396_v44, %v382_v41  ;;  %v361_v47 = vadd.f32 %v715_v54, %v360_v42 }
 0x11b   :  { %v362_v49 = vadd.f32 %v507_v61, %v361_v47  ;;  %v398_v50 = vadd.f32 %v397_v46, %v383_v45 }
 0x11d   :  { %v363_v51 = vadd.f32 %v510_v8, %v362_v49  ;;  %v399_v53 = vadd.f32 %v398_v50, %v384_v48 }
 0x11f   :  { %v400_v38 = vadd.f32 %v399_v53, %v385_v52  ;;  %v364_v55 = vadd.f32 %v513_v15, %v363_v51 }
 0x121   :  { %v401_v58 = vadd.f32 %v400_v38, %v386_v56  ;;  %v365_v59 = vadd.f32 %v516_v26, %v364_v55 }
 0x123   :  { %v402_v43 = vadd.f32 %v401_v58, %v387_v57  ;;  %v366_v60 = vadd.f32 %v519_v33, %v365_v59 }
 0x125   :  { %v367_v63 = vrot.slane %v366_v60, 4  ;;  %v403_v0 = vadd.f32 %v402_v43, %v388_v62 }
 0x127   :  { %v368_v1 = vadd.f32 %v367_v63, %v366_v60  ;;  %v404_v2 = vrot.slane %v403_v0, 4 }
 0x129   :  { %v369_v54 = vrot.slane %v368_v1, 2  ;;  %v405_v3 = vadd.f32 %v404_v2, %v403_v0 }
 0x12b   :  { %v370_v61 = vadd.f32 %v369_v54, %v368_v1  ;;  %v406_v4 = vrot.slane %v405_v3, 2 }
 0x12d   :  { %v371_v5 = vrot.slane %v370_v61, 1  ;;  %v407_v6 = vadd.f32 %v406_v4, %v405_v3 }
 0x12f   :  { %v372_v7 = vadd.f32 %v371_v5, %v370_v61  ;;  %v408_v8 = vrot.slane %v407_v6, 1 }
 0x131   :  { %v409_v9 = vadd.f32 %v408_v8, %v407_v6  ;;  %410 = vst [vmem:[%s772_s3] sm:$0xff] %v372_v7 }
 0x133   :  { %411 = vst [vmem:[%s773_s4] sm:$0xff] %v409_v9 }

// kernel: hourglass_forward.49
= control target key start
LH: loop header
LB: loop body
LE: loop exit
PB: predicated region body
PF: predicated region fallthrough
CT: control target
= control target key end

     0   :  { %s391_s0 = inlined_call_operand.vmem [shape: f32[128,128], index: 0, kind: input, shape index: {}]   ;;  %s392_s1 = inlined_call_operand.vmem [shape: f32[1,128], index: 1, kind: input, shape index: {}]   ;;  %s393_s2 = inlined_call_operand.vmem [shape: f32[1,128], index: 2, kind: input, shape index: {}]   ;;  %s394_s3 = inlined_call_operand.vmem [shape: bf16[128,128], index: 3, kind: output, shape index: {}]  }
   0x1   :  { %v14_v0 = vld [vmem:[%s391_s0] sm:$0xff]  ;;  %v15_v1 = vld [vmem:[%s391_s0 + $0x8] sm:$0xff]  ;;  %v16_v6 = vld [vmem:[%s391_s0 + $0x10] sm:$0xff] }
   0x2   :  { %v286_v2 = vld [vmem:[%s392_s1] ss:$0 sm:$0xff]  ;;  %v17_v7 = vld [vmem:[%s391_s0 + $0x18] sm:$0xff]  ;;  %v19_v11 = vld [vmem:[%s391_s0 + $0x28] sm:$0xff] }
   0x3   :  { %v37_v3 = vmul.f32 %v286_v2, %v14_v0  ;;  %v38_v4 = vmul.f32 %v286_v2, %v15_v1  ;;  %v293_v5 = vld [vmem:[%s393_s2] ss:$0 sm:$0xff]  ;;  %v39_v8 = vmul.f32 %v286_v2, %v16_v6  ;;  %v40_v9 = vmul.f32 %v286_v2, %v17_v7  ;;  %v20_v12 = vld [vmem:[%s391_s0 + $0x30] sm:$0xff]  ;;  %v21_v17 = vld [vmem:[%s391_s0 + $0x38] sm:$0xff] }
   0x4   :  { %v18_v10 = vld [vmem:[%s391_s0 + $0x20] sm:$0xff]  ;;  %v42_v16 = vmul.f32 %v286_v2, %v19_v11  ;;  %v43_v20 = vmul.f32 %v286_v2, %v20_v12  ;;  %v44_v21 = vmul.f32 %v286_v2, %v21_v17  ;;  %v23_v27 = vld [vmem:[%s391_s0 + $0x48] sm:$0xff]  ;;  %v24_v32 = vld [vmem:[%s391_s0 + $0x50] sm:$0xff] }
   0x5   :  { %v60_v13 = vadd.f32 %v293_v5, %v37_v3  ;;  %v61_v14 = vadd.f32 %v293_v5, %v38_v4  ;;  %v41_v15 = vmul.f32 %v286_v2, %v18_v10  ;;  %v62_v18 = vadd.f32 %v293_v5, %v39_v8  ;;  %v22_v22 = vld [vmem:[%s391_s0 + $0x40] sm:$0xff]  ;;  %v25_v33 = vld [vmem:[%s391_s0 + $0x58] sm:$0xff]  ;;  %v27_v39 = vld [vmem:[%s391_s0 + $0x68] sm:$0xff] }
   0x6   :  { %v63_v19 = vadd.f32 %v293_v5, %v40_v9  ;;  %v65_v26 = vadd.f32 %v293_v5, %v42_v16  ;;  %v66_v30 = vadd.f32 %v293_v5, %v43_v20  ;;  %v67_v31 = vadd.f32 %v293_v5, %v44_v21  ;;  %v26_v38 = vld [vmem:[%s391_s0 + $0x60] sm:$0xff]  ;;  %v28_v44 = vld [vmem:[%s391_s0 + $0x70] sm:$0xff]  ;;  %v29_v49 = vld [vmem:[%s391_s0 + $0x78] sm:$0xff] }
   0x7   :  { %v76_v23 = vmax.f32 %v60_v13, 0.0  ;;  %v77_v24 = vmax.f32 %v61_v14, 0.0  ;;  %v64_v25 = vadd.f32 %v293_v5, %v41_v15  ;;  %v78_v28 = vmax.f32 %v62_v18, 0.0 }
   0x8   :  { %v79_v29 = vmax.f32 %v63_v19, 0.0  ;;  %v81_v36 = vmax.f32 %v65_v26, 0.0  ;;  %v45_v37 = vmul.f32 %v286_v2, %v22_v22  ;;  %v82_v41 = vmax.f32 %v66_v30, 0.0 }
   0x9   :  { %v213_v34 = vpack.c.bf16 %v77_v24, %v76_v23  ;;  %v80_v35 = vmax.f32 %v64_v25, 0.0  ;;  %v83_v42 = vmax.f32 %v67_v31, 0.0  ;;  %v46_v43 = vmul.f32 %v286_v2, %v23_v27 }
   0xa   :  { %v218_v40 = vpack.c.bf16 %v79_v29, %v78_v28  ;;  %v68_v46 = vadd.f32 %v293_v5, %v45_v37  ;;  %v47_v47 = vmul.f32 %v286_v2, %v24_v32  ;;  %v48_v48 = vmul.f32 %v286_v2, %v25_v33 }
   0xb   :  { %214 = vst [vmem:[%s394_s3] sm:$0xff] %v213_v34   ;;  %v223_v45 = vpack.c.bf16 %v81_v36, %v80_v35  ;;  %v228_v50 = vpack.c.bf16 %v83_v42, %v82_v41  ;;  %v69_v51 = vadd.f32 %v293_v5, %v46_v43  ;;  %v49_v52 = vmul.f32 %v286_v2, %v26_v38 }
   0xc   :  { %250 = vst [vmem:[%s394_s3 + $0x8] sm:$0xff] %v218_v40   ;;  %v50_v53 = vmul.f32 %v286_v2, %v27_v39  ;;  %v84_v54 = vmax.f32 %v68_v46, 0.0  ;;  %v70_v55 = vadd.f32 %v293_v5, %v47_v47  ;;  %v71_v56 = vadd.f32 %v293_v5, %v48_v48 }
   0xd   :  { %251 = vst [vmem:[%s394_s3 + $0x10] sm:$0xff] %v223_v45   ;;  %v51_v57 = vmul.f32 %v286_v2, %v28_v44  ;;  %252 = vst [vmem:[%s394_s3 + $0x18] sm:$0xff] %v228_v50   ;;  %v85_v58 = vmax.f32 %v69_v51, 0.0  ;;  %v72_v59 = vadd.f32 %v293_v5, %v49_v52  ;;  %v52_v61 = vmul.f32 %v286_v2, %v29_v49 }
   0xe   :  { %v73_v60 = vadd.f32 %v293_v5, %v50_v53  ;;  %v86_v62 = vmax.f32 %v70_v55, 0.0  ;;  %v87_v63 = vmax.f32 %v71_v56, 0.0 }
   0xf   :  { %v74_v0 = vadd.f32 %v293_v5, %v51_v57  ;;  %v233_v1 = vpack.c.bf16 %v85_v58, %v84_v54  ;;  %v88_v3 = vmax.f32 %v72_v59, 0.0  ;;  %v75_v6 = vadd.f32 %v293_v5, %v52_v61 }
  0x10   :  { %v89_v4 = vmax.f32 %v73_v60, 0.0  ;;  %v238_v7 = vpack.c.bf16 %v87_v63, %v86_v62 }
  0x11   :  { %v90_v8 = vmax.f32 %v74_v0, 0.0  ;;  %253 = vst [vmem:[%s394_s3 + $0x20] sm:$0xff] %v233_v1   ;;  %v91_v10 = vmax.f32 %v75_v6, 0.0 }
  0x12   :  { %v243_v9 = vpack.c.bf16 %v89_v4, %v88_v3  ;;  %254 = vst [vmem:[%s394_s3 + $0x28] sm:$0xff] %v238_v7  }
  0x13   :  { %v248_v2 = vpack.c.bf16 %v91_v10, %v90_v8 }
  0x14   :  { %255 = vst [vmem:[%s394_s3 + $0x30] sm:$0xff] %v243_v9  }
  0x15   :  { %256 = vst [vmem:[%s394_s3 + $0x38] sm:$0xff] %v248_v2  }

// kernel: hourglass_forward.50
= control target key start
LH: loop header
LB: loop body
LE: loop exit
PB: predicated region body
PF: predicated region fallthrough
CT: control target
= control target key end

     0   :  { %s1288_s1 = inlined_call_operand.vmem [shape: bf16[512,128], index: 1, kind: input, shape index: {}]   ;;  %s1289_s0 = inlined_call_operand.vmem [shape: bf16[128,512], index: 0, kind: input, shape index: {}]   ;;  %s1290_s2 = inlined_call_operand.vmem [shape: f32[128,128], index: 2, kind: output, shape index: {0}]   ;;  %s1291_s3 = inlined_call_operand.vmem [shape: f32[1,8,128], index: 3, kind: output, shape index: {1}]   ;;  %s1292_s4 = inlined_call_operand.vmem [shape: f32[1,8,128], index: 4, kind: output, shape index: {2}]  }
   0x1   :  { %v937_v0 = vld [vmem:[%s1288_s1 + $0x40] sm:$0xff]   ;;  %v941_v4 = vld [vmem:[%s1288_s1 + $0x48] sm:$0xff]   ;;  %v945_v8 = vld [vmem:[%s1288_s1 + $0x50] sm:$0xff]  }
   0x2   :  { %v938_v1 = vld [vmem:[%s1288_s1 + $0xc0] sm:$0xff]   ;;  %809 = vmatprep.subr.bf16.mxu0 %v937_v0  ;;  %v942_v5 = vld [vmem:[%s1288_s1 + $0xc8] sm:$0xff]   ;;  %v946_v9 = vld [vmem:[%s1288_s1 + $0xd0] sm:$0xff]  }
   0x3   :  { %v939_v2 = vld [vmem:[%s1288_s1] sm:$0xff]   ;;  %873 = vmatprep.subr.bf16.mxu1 %v938_v1  ;;  %v943_v6 = vld [vmem:[%s1288_s1 + $0x8] sm:$0xff]   ;;  %v947_v10 = vld [vmem:[%s1288_s1 + $0x10] sm:$0xff]  }
   0x4   :  { %v940_v3 = vld [vmem:[%s1288_s1 + $0x80] sm:$0xff]   ;;  %810 = vmatpush3.bf16.msra.mxu0 %v939_v2  ;;  %v944_v7 = vld [vmem:[%s1288_s1 + $0x88] sm:$0xff]   ;;  %v948_v11 = vld [vmem:[%s1288_s1 + $0x90] sm:$0xff]  }
   0x5   :  { %874 = vmatpush3.bf16.msra.mxu1 %v940_v3  ;;  %811 = vmatprep.subr.bf16.mxu0 %v941_v4  ;;  %v949_v12 = vld [vmem:[%s1288_s1 + $0x58] sm:$0xff]   ;;  %v953_v16 = vld [vmem:[%s1288_s1 + $0x60] sm:$0xff]   ;;  %v957_v20 = vld [vmem:[%s1288_s1 + $0x68] sm:$0xff]  }
   0x6   :  { %875 = vmatprep.subr.bf16.mxu1 %v942_v5  ;;  %v950_v13 = vld [vmem:[%s1288_s1 + $0xd8] sm:$0xff]   ;;  %v954_v17 = vld [vmem:[%s1288_s1 + $0xe0] sm:$0xff]   ;;  %v958_v21 = vld [vmem:[%s1288_s1 + $0xe8] sm:$0xff]  }
   0x7   :  { %v951_v14 = vld [vmem:[%s1288_s1 + $0x18] sm:$0xff]   ;;  %v955_v18 = vld [vmem:[%s1288_s1 + $0x20] sm:$0xff]   ;;  %v959_v22 = vld [vmem:[%s1288_s1 + $0x28] sm:$0xff]  }
   0x8   :  { %812 = vmatpush3.bf16.msra.mxu0 %v943_v6  ;;  %v952_v15 = vld [vmem:[%s1288_s1 + $0x98] sm:$0xff]   ;;  %v956_v19 = vld [vmem:[%s1288_s1 + $0xa0] sm:$0xff]   ;;  %v960_v23 = vld [vmem:[%s1288_s1 + $0xa8] sm:$0xff]  }
   0x9   :  { %876 = vmatpush3.bf16.msra.mxu1 %v944_v7  ;;  %813 = vmatprep.subr.bf16.mxu0 %v945_v8  ;;  %v961_v24 = vld [vmem:[%s1288_s1 + $0x70] sm:$0xff]   ;;  %v965_v28 = vld [vmem:[%s1288_s1 + $0x78] sm:$0xff]  }
   0xa   :  { %877 = vmatprep.subr.bf16.mxu1 %v946_v9  ;;  %v962_v25 = vld [vmem:[%s1288_s1 + $0xf0] sm:$0xff]   ;;  %v966_v29 = vld [vmem:[%s1288_s1 + $0xf8] sm:$0xff]  }
   0xb   :  { %v963_v26 = vld [vmem:[%s1288_s1 + $0x30] sm:$0xff]   ;;  %v967_v30 = vld [vmem:[%s1288_s1 + $0x38] sm:$0xff]  }
   0xc   :  { %814 = vmatpush3.bf16.msra.mxu0 %v947_v10  ;;  %v964_v27 = vld [vmem:[%s1288_s1 + $0xb0] sm:$0xff]   ;;  %v968_v31 = vld [vmem:[%s1288_s1 + $0xb8] sm:$0xff]  }
   0xd   :  { %878 = vmatpush3.bf16.msra.mxu1 %v948_v11  ;;  %815 = vmatprep.subr.bf16.mxu0 %v949_v12  ;;  %v969_v32 = vld [vmem:[%s1289_s0] ss:$16 sps:$4 sm:$0xff]   ;;  %v971_v33 = vld [vmem:[%s1289_s0 + $0x4] ss:$16 sps:$4 sm:$0xff]   ;;  %v972_v34 = vld [vmem:[%s1289_s0 + $0x8] ss:$16 sps:$4 sm:$0xff]  }
   0xe   :  { %879 = vmatprep.subr.bf16.mxu1 %v950_v13  ;;  %v974_v35 = vld [vmem:[%s1289_s0 + $0xc] ss:$16 sps:$4 sm:$0xff]   ;;  %495 = vmatprep.mubr.bf16.mxu0 %v971_v33  ;;  %v975_v36 = vld [vmem:[%s1289_s0 + $0x24] ss:$16 sps:$4 sm:$0xff]   ;;  %v979_v38 = vld [vmem:[%s1289_s0 + $0x20] ss:$16 sps:$4 sm:$0xff]  }
   0xf   :  { %592 = vmatprep.mubr.bf16.mxu1 %v974_v35  ;;  %v977_v37 = vld [vmem:[%s1289_s0 + $0x2c] ss:$16 sps:$4 sm:$0xff]   ;;  %v980_v39 = vld [vmem:[%s1289_s0 + $0x28] ss:$16 sps:$4 sm:$0xff]   ;;  %v981_v40 = vld [vmem:[%s1289_s0 + $0x44] ss:$16 sps:$4 sm:$0xff]  }
  0x10   :  { %816 = vmatpush3.bf16.msra.mxu0 %v951_v14  ;;  %v983_v41 = vld [vmem:[%s1289_s0 + $0x4c] ss:$16 sps:$4 sm:$0xff]   ;;  %v985_v42 = vld [vmem:[%s1289_s0 + $0x40] ss:$16 sps:$4 sm:$0xff]   ;;  %v986_v43 = vld [vmem:[%s1289_s0 + $0x48] ss:$16 sps:$4 sm:$0xff]  }
  0x11   :  { %880 = vmatpush3.bf16.msra.mxu1 %v952_v15  ;;  %817 = vmatprep.subr.bf16.mxu0 %v953_v16  ;;  %v987_v44 = vld [vmem:[%s1289_s0 + $0x64] ss:$16 sps:$4 sm:$0xff]   ;;  %v989_v45 = vld [vmem:[%s1289_s0 + $0x6c] ss:$16 sps:$4 sm:$0xff]   ;;  %v991_v46 = vld [vmem:[%s1289_s0 + $0x60] ss:$16 sps:$4 sm:$0xff]  }
  0x12   :  { %881 = vmatprep.subr.bf16.mxu1 %v954_v17  ;;  %v992_v47 = vld [vmem:[%s1289_s0 + $0x68] ss:$16 sps:$4 sm:$0xff]   ;;  %v993_v48 = vld [vmem:[%s1289_s0 + $0x84] ss:$16 sps:$4 sm:$0xff]   ;;  %v995_v49 = vld [vmem:[%s1289_s0 + $0x8c] ss:$16 sps:$4 sm:$0xff]  }
  0x13   :  { %v997_v50 = vld [vmem:[%s1289_s0 + $0x80] ss:$16 sps:$4 sm:$0xff]   ;;  %v998_v51 = vld [vmem:[%s1289_s0 + $0x88] ss:$16 sps:$4 sm:$0xff]   ;;  %v999_v52 = vld [vmem:[%s1289_s0 + $0xa4] ss:$16 sps:$4 sm:$0xff]  }
  0x14   :  { %818 = vmatpush3.bf16.msra.mxu0 %v955_v18  ;;  %v1001_v53 = vld [vmem:[%s1289_s0 + $0xac] ss:$16 sps:$4 sm:$0xff]   ;;  %v1003_v54 = vld [vmem:[%s1289_s0 + $0xa0] ss:$16 sps:$4 sm:$0xff]   ;;  %v1004_v55 = vld [vmem:[%s1289_s0 + $0xa8] ss:$16 sps:$4 sm:$0xff]  }
  0x15   :  { %882 = vmatpush3.bf16.msra.mxu1 %v956_v19  ;;  %819 = vmatprep.subr.bf16.mxu0 %v957_v20  ;;  %v1005_v56 = vld [vmem:[%s1289_s0 + $0xc4] ss:$16 sps:$4 sm:$0xff]   ;;  %v1007_v57 = vld [vmem:[%s1289_s0 + $0xcc] ss:$16 sps:$4 sm:$0xff]   ;;  %v1009_v58 = vld [vmem:[%s1289_s0 + $0xc0] ss:$16 sps:$4 sm:$0xff]  }
  0x16   :  { %883 = vmatprep.subr.bf16.mxu1 %v958_v21  ;;  %v1010_v59 = vld [vmem:[%s1289_s0 + $0xc8] ss:$16 sps:$4 sm:$0xff]   ;;  %v1011_v60 = vld [vmem:[%s1289_s0 + $0xe4] ss:$16 sps:$4 sm:$0xff]   ;;  %v1013_v61 = vld [vmem:[%s1289_s0 + $0xec] ss:$16 sps:$4 sm:$0xff]  }
  0x17   :  { %v1015_v62 = vld [vmem:[%s1289_s0 + $0xe0] ss:$16 sps:$4 sm:$0xff]   ;;  %v1016_v63 = vld [vmem:[%s1289_s0 + $0xe8] ss:$16 sps:$4 sm:$0xff]  }
  0x18   :  { %820 = vmatpush3.bf16.msra.mxu0 %v959_v22 }
  0x19   :  { %884 = vmatpush3.bf16.msra.mxu1 %v960_v23  ;;  %821 = vmatprep.subr.bf16.mxu0 %v961_v24 }
  0x1a   :  { %885 = vmatprep.subr.bf16.mxu1 %v962_v25 }
  0x1c   :  { %822 = vmatpush3.bf16.msra.mxu0 %v963_v26 }
  0x1d   :  { %886 = vmatpush3.bf16.msra.mxu1 %v964_v27  ;;  %823 = vmatprep.subr.bf16.mxu0 %v965_v28 }
  0x1e   :  { %887 = vmatprep.subr.bf16.mxu1 %v966_v29 }
  0x20   :  { %824 = vmatpush3.bf16.msra.mxu0 %v967_v30 }
  0x21   :  { %888 = vmatpush3.bf16.msra.mxu1 %v968_v31 }
  0x23   :  { %496 = vmatmul.mubr.bf16.vlgmr.msra.gmra.mrb[0].mxu0 %v969_v32 }
  0x24   :  { %593 = vmatmul.mubr.bf16.vlgmr.msra.gmra.mrb[0].mxu1 %v972_v34  ;;  %503 = vmatprep.mubr.bf16.mxu0 %v975_v36 }
  0x25   :  { %600 = vmatprep.mubr.bf16.mxu1 %v977_v37 }
  0x2b   :  { %504 = vmatmul.mubr.bf16.gmra.mrb[4].mxu0 %v979_v38 }
  0x2c   :  { %601 = vmatmul.mubr.bf16.gmra.mrb[4].mxu1 %v980_v39  ;;  %511 = vmatprep.mubr.bf16.mxu0 %v981_v40 }
  0x2d   :  { %608 = vmatprep.mubr.bf16.mxu1 %v983_v41 }
  0x33   :  { %512 = vmatmul.mubr.bf16.gmra.mrb[8].mxu0 %v985_v42 }
  0x34   :  { %609 = vmatmul.mubr.bf16.gmra.mrb[8].mxu1 %v986_v43  ;;  %519 = vmatprep.mubr.bf16.mxu0 %v987_v44 }
  0x35   :  { %616 = vmatprep.mubr.bf16.mxu1 %v989_v45 }
  0x3b   :  { %520 = vmatmul.mubr.bf16.gmra.mrb[12].mxu0 %v991_v46 }
  0x3c   :  { %617 = vmatmul.mubr.bf16.gmra.mrb[12].mxu1 %v992_v47  ;;  %527 = vmatprep.mubr.bf16.mxu0 %v993_v48 }
  0x3d   :  { %624 = vmatprep.mubr.bf16.mxu1 %v995_v49 }
  0x43   :  { %528 = vmatmul.mubr.bf16.gmra.mrb[16].mxu0 %v997_v50 }
  0x44   :  { %625 = vmatmul.mubr.bf16.gmra.mrb[16].mxu1 %v998_v51  ;;  %535 = vmatprep.mubr.bf16.mxu0 %v999_v52 }
  0x45   :  { %632 = vmatprep.mubr.bf16.mxu1 %v1001_v53 }
  0x4b   :  { %536 = vmatmul.mubr.bf16.gmra.mrb[20].mxu0 %v1003_v54 }
  0x4c   :  { %633 = vmatmul.mubr.bf16.gmra.mrb[20].mxu1 %v1004_v55  ;;  %543 = vmatprep.mubr.bf16.mxu0 %v1005_v56 }
  0x4d   :  { %640 = vmatprep.mubr.bf16.mxu1 %v1007_v57 }
  0x53   :  { %544 = vmatmul.mubr.bf16.gmra.mrb[24].mxu0 %v1009_v58 }
  0x54   :  { %641 = vmatmul.mubr.bf16.gmra.mrb[24].mxu1 %v1010_v59  ;;  %551 = vmatprep.mubr.bf16.mxu0 %v1011_v60 }
  0x55   :  { %648 = vmatprep.mubr.bf16.mxu1 %v1013_v61 }
  0x5b   :  { %552 = vmatmul.mubr.bf16.gmra.mrb[28].mxu0 %v1015_v62 }
  0x5c   :  { %649 = vmatmul.mubr.bf16.gmra.mrb[28].mxu1 %v1016_v63 }
  0xf6   :  { %v825_v0 = vpop.f32.mrb[0].mxu0 }
  0xf7   :  { %v889_v1 = vpop.f32.mrb[0].mxu1  ;;  %v826_v2 = vpop.f32.mrb[1].mxu0 }
  0xf8   :  { %v827_v3 = vadd.f32 %v826_v2, %v825_v0  ;;  %v890_v4 = vpop.f32.mrb[1].mxu1  ;;  %v828_v5 = vpop.f32.mrb[2].mxu0 }
  0xf9   :  { %v891_v6 = vadd.f32 %v890_v4, %v889_v1  ;;  %v892_v7 = vpop.f32.mrb[2].mxu1  ;;  %v829_v8 = vpop.f32.mrb[3].mxu0 }
  0xfa   :  { %v830_v9 = vadd.f32 %v829_v8, %v828_v5  ;;  %v893_v10 = vpop.f32.mrb[3].mxu1 }
  0xfb   :  { %v595_v11 = vadd.f32 %v891_v6, %v827_v3  ;;  %v894_v12 = vadd.f32 %v893_v10, %v892_v7 }
  0xfd   :  { %657 = vst [vmem:[%s1290_s2] sm:$0xff] %v595_v11  ;;  %v598_v13 = vadd.f32 %v894_v12, %v830_v9  ;;  %v694_v15 = vmul.f32 %v595_v11, %v595_v11 }
  0xfe   :  { %v831_v14 = vpop.f32.mrb[4].mxu0 }
  0xff   :  { %658 = vst [vmem:[%s1290_s2 + $0x8] sm:$0xff] %v598_v13  ;;  %v673_v16 = vadd.f32 %v598_v13, %v595_v11  ;;  %v695_v17 = vmul.f32 %v598_v13, %v598_v13  ;;  %v895_v18 = vpop.f32.mrb[4].mxu1  ;;  %v832_v19 = vpop.f32.mrb[5].mxu0 }
 0x100   :  { %v833_v20 = vadd.f32 %v832_v19, %v831_v14  ;;  %v896_v21 = vpop.f32.mrb[5].mxu1  ;;  %v834_v22 = vpop.f32.mrb[6].mxu0 }
 0x101   :  { %v710_v23 = vadd.f32 %v695_v17, %v694_v15  ;;  %v897_v24 = vadd.f32 %v896_v21, %v895_v18  ;;  %v898_v25 = vpop.f32.mrb[6].mxu1  ;;  %v835_v26 = vpop.f32.mrb[7].mxu0 }
 0x102   :  { %v836_v27 = vadd.f32 %v835_v26, %v834_v22  ;;  %v899_v28 = vpop.f32.mrb[7].mxu1 }
 0x103   :  { %v603_v29 = vadd.f32 %v897_v24, %v833_v20  ;;  %v900_v30 = vadd.f32 %v899_v28, %v898_v25 }
 0x105   :  { %659 = vst [vmem:[%s1290_s2 + $0x10] sm:$0xff] %v603_v29  ;;  %v674_v31 = vadd.f32 %v673_v16, %v603_v29  ;;  %v696_v32 = vmul.f32 %v603_v29, %v603_v29  ;;  %v606_v33 = vadd.f32 %v900_v30, %v836_v27 }
 0x106   :  { %v837_v34 = vpop.f32.mrb[8].mxu0 }
 0x107   :  { %v711_v35 = vadd.f32 %v710_v23, %v696_v32  ;;  %660 = vst [vmem:[%s1290_s2 + $0x18] sm:$0xff] %v606_v33  ;;  %v675_v36 = vadd.f32 %v674_v31, %v606_v33  ;;  %v697_v37 = vmul.f32 %v606_v33, %v606_v33  ;;  %v901_v38 = vpop.f32.mrb[8].mxu1  ;;  %v838_v39 = vpop.f32.mrb[9].mxu0 }
 0x108   :  { %v839_v40 = vadd.f32 %v838_v39, %v837_v34  ;;  %v902_v41 = vpop.f32.mrb[9].mxu1  ;;  %v840_v42 = vpop.f32.mrb[10].mxu0 }
 0x109   :  { %v712_v43 = vadd.f32 %v711_v35, %v697_v37  ;;  %v903_v44 = vadd.f32 %v902_v41, %v901_v38  ;;  %v904_v45 = vpop.f32.mrb[10].mxu1  ;;  %v841_v46 = vpop.f32.mrb[11].mxu0 }
 0x10a   :  { %v842_v47 = vadd.f32 %v841_v46, %v840_v42  ;;  %v905_v48 = vpop.f32.mrb[11].mxu1 }
 0x10b   :  { %v611_v49 = vadd.f32 %v903_v44, %v839_v40  ;;  %v906_v50 = vadd.f32 %v905_v48, %v904_v45 }
 0x10d   :  { %661 = vst [vmem:[%s1290_s2 + $0x20] sm:$0xff] %v611_v49  ;;  %v676_v51 = vadd.f32 %v675_v36, %v611_v49  ;;  %v698_v52 = vmul.f32 %v611_v49, %v611_v49  ;;  %v614_v53 = vadd.f32 %v906_v50, %v842_v47 }
 0x10e   :  { %v843_v54 = vpop.f32.mrb[12].mxu0 }
 0x10f   :  { %v713_v55 = vadd.f32 %v712_v43, %v698_v52  ;;  %662 = vst [vmem:[%s1290_s2 + $0x28] sm:$0xff] %v614_v53  ;;  %v677_v56 = vadd.f32 %v676_v51, %v614_v53  ;;  %v699_v57 = vmul.f32 %v614_v53, %v614_v53  ;;  %v907_v58 = vpop.f32.mrb[12].mxu1  ;;  %v844_v59 = vpop.f32.mrb[13].mxu0 }
 0x110   :  { %v845_v60 = vadd.f32 %v844_v59, %v843_v54  ;;  %v908_v61 = vpop.f32.mrb[13].mxu1  ;;  %v846_v62 = vpop.f32.mrb[14].mxu0 }
 0x111   :  { %v714_v63 = vadd.f32 %v713_v55, %v699_v57  ;;  %v909_v0 = vadd.f32 %v908_v61, %v907_v58  ;;  %v910_v1 = vpop.f32.mrb[14].mxu1  ;;  %v847_v2 = vpop.f32.mrb[15].mxu0 }
 0x112   :  { %v848_v3 = vadd.f32 %v847_v2, %v846_v62  ;;  %v911_v4 = vpop.f32.mrb[15].mxu1 }
 0x113   :  { %v619_v5 = vadd.f32 %v909_v0, %v845_v60  ;;  %v912_v6 = vadd.f32 %v911_v4, %v910_v1 }
 0x115   :  { %663 = vst [vmem:[%s1290_s2 + $0x30] sm:$0xff] %v619_v5  ;;  %v678_v7 = vadd.f32 %v677_v56, %v619_v5  ;;  %v700_v8 = vmul.f32 %v619_v5, %v619_v5  ;;  %v622_v9 = vadd.f32 %v912_v6, %v848_v3 }
 0x116   :  { %v849_v10 = vpop.f32.mrb[16].mxu0 }
 0x117   :  { %v715_v11 = vadd.f32 %v714_v63, %v700_v8  ;;  %664 = vst [vmem:[%s1290_s2 + $0x38] sm:$0xff] %v622_v9  ;;  %v679_v12 = vadd.f32 %v678_v7, %v622_v9  ;;  %v701_v13 = vmul.f32 %v622_v9, %v622_v9  ;;  %v913_v14 = vpop.f32.mrb[16].mxu1  ;;  %v850_v15 = vpop.f32.mrb[17].mxu0 }
 0x118   :  { %v851_v16 = vadd.f32 %v850_v15, %v849_v10  ;;  %v914_v17 = vpop.f32.mrb[17].mxu1  ;;  %v852_v18 = vpop.f32.mrb[18].mxu0 }
 0x119   :  { %v716_v19 = vadd.f32 %v715_v11, %v701_v13  ;;  %v915_v20 = vadd.f32 %v914_v17, %v913_v14  ;;  %v916_v21 = vpop.f32.mrb[18].mxu1  ;;  %v853_v22 = vpop.f32.mrb[19].mxu0 }
 0x11a   :  { %v854_v23 = vadd.f32 %v853_v22, %v852_v18  ;;  %v917_v24 = vpop.f32.mrb[19].mxu1 }
 0x11b   :  { %v627_v25 = vadd.f32 %v915_v20, %v851_v16  ;;  %v918_v26 = vadd.f32 %v917_v24, %v916_v21 }
 0x11d   :  { %665 = vst [vmem:[%s1290_s2 + $0x40] sm:$0xff] %v627_v25  ;;  %v680_v27 = vadd.f32 %v679_v12, %v627_v25  ;;  %v702_v28 = vmul.f32 %v627_v25, %v627_v25  ;;  %v630_v29 = vadd.f32 %v918_v26, %v854_v23 }
 0x11e   :  { %v855_v30 = vpop.f32.mrb[20].mxu0 }
 0x11f   :  { %v717_v31 = vadd.f32 %v716_v19, %v702_v28  ;;  %666 = vst [vmem:[%s1290_s2 + $0x48] sm:$0xff] %v630_v29  ;;  %v681_v32 = vadd.f32 %v680_v27, %v630_v29  ;;  %v703_v33 = vmul.f32 %v630_v29, %v630_v29  ;;  %v919_v34 = vpop.f32.mrb[20].mxu1  ;;  %v856_v35 = vpop.f32.mrb[21].mxu0 }
 0x120   :  { %v857_v36 = vadd.f32 %v856_v35, %v855_v30  ;;  %v920_v37 = vpop.f32.mrb[21].mxu1  ;;  %v858_v38 = vpop.f32.mrb[22].mxu0 }
 0x121   :  { %v718_v39 = vadd.f32 %v717_v31, %v703_v33  ;;  %v921_v40 = vadd.f32 %v920_v37, %v919_v34  ;;  %v922_v41 = vpop.f32.mrb[22].mxu1  ;;  %v859_v42 = vpop.f32.mrb[23].mxu0 }
 0x122   :  { %v860_v43 = vadd.f32 %v859_v42, %v858_v38  ;;  %v923_v44 = vpop.f32.mrb[23].mxu1 }
 0x123   :  { %v635_v45 = vadd.f32 %v921_v40, %v857_v36  ;;  %v924_v46 = vadd.f32 %v923_v44, %v922_v41 }
 0x125   :  { %667 = vst [vmem:[%s1290_s2 + $0x50] sm:$0xff] %v635_v45  ;;  %v682_v47 = vadd.f32 %v681_v32, %v635_v45  ;;  %v704_v48 = vmul.f32 %v635_v45, %v635_v45  ;;  %v638_v49 = vadd.f32 %v924_v46, %v860_v43 }
 0x126   :  { %v861_v50 = vpop.f32.mrb[24].mxu0 }
 0x127   :  { %v719_v51 = vadd.f32 %v718_v39, %v704_v48  ;;  %668 = vst [vmem:[%s1290_s2 + $0x58] sm:$0xff] %v638_v49  ;;  %v683_v52 = vadd.f32 %v682_v47, %v638_v49  ;;  %v705_v53 = vmul.f32 %v638_v49, %v638_v49  ;;  %v925_v54 = vpop.f32.mrb[24].mxu1  ;;  %v862_v55 = vpop.f32.mrb[25].mxu0 }
 0x128   :  { %v863_v56 = vadd.f32 %v862_v55, %v861_v50  ;;  %v926_v57 = vpop.f32.mrb[25].mxu1  ;;  %v864_v58 = vpop.f32.mrb[26].mxu0 }
 0x129   :  { %v720_v59 = vadd.f32 %v719_v51, %v705_v53  ;;  %v927_v60 = vadd.f32 %v926_v57, %v925_v54  ;;  %v928_v61 = vpop.f32.mrb[26].mxu1  ;;  %v865_v62 = vpop.f32.mrb[27].mxu0 }
 0x12a   :  { %v866_v63 = vadd.f32 %v865_v62, %v864_v58  ;;  %v929_v0 = vpop.f32.mrb[27].mxu1 }
 0x12b   :  { %v643_v1 = vadd.f32 %v927_v60, %v863_v56  ;;  %v930_v2 = vadd.f32 %v929_v0, %v928_v61 }
 0x12d   :  { %669 = vst [vmem:[%s1290_s2 + $0x60] sm:$0xff] %v643_v1  ;;  %v684_v3 = vadd.f32 %v683_v52, %v643_v1  ;;  %v706_v4 = vmul.f32 %v643_v1, %v643_v1  ;;  %v646_v5 = vadd.f32 %v930_v2, %v866_v63 }
 0x12e   :  { %v867_v6 = vpop.f32.mrb[28].mxu0 }
 0x12f   :  { %v721_v7 = vadd.f32 %v720_v59, %v706_v4  ;;  %670 = vst [vmem:[%s1290_s2 + $0x68] sm:$0xff] %v646_v5  ;;  %v685_v8 = vadd.f32 %v684_v3, %v646_v5  ;;  %v707_v9 = vmul.f32 %v646_v5, %v646_v5  ;;  %v931_v10 = vpop.f32.mrb[28].mxu1  ;;  %v868_v11 = vpop.f32.mrb[29].mxu0 }
 0x130   :  { %v869_v12 = vadd.f32 %v868_v11, %v867_v6  ;;  %v932_v13 = vpop.f32.mrb[29].mxu1  ;;  %v870_v14 = vpop.f32.mrb[30].mxu0 }
 0x131   :  { %v722_v15 = vadd.f32 %v721_v7, %v707_v9  ;;  %v933_v16 = vadd.f32 %v932_v13, %v931_v10  ;;  %v934_v17 = vpop.f32.mrb[30].mxu1  ;;  %v871_v18 = vpop.f32.mrb[31].mxu0 }
 0x132   :  { %v872_v19 = vadd.f32 %v871_v18, %v870_v14  ;;  %v935_v20 = vpop.f32.mrb[31].mxu1 }
 0x133   :  { %v651_v21 = vadd.f32 %v933_v16, %v869_v12  ;;  %v936_v22 = vadd.f32 %v935_v20, %v934_v17 }
 0x135   :  { %671 = vst [vmem:[%s1290_s2 + $0x70] sm:$0xff] %v651_v21  ;;  %v686_v23 = vadd.f32 %v685_v8, %v651_v21  ;;  %v708_v24 = vmul.f32 %v651_v21, %v651_v21  ;;  %v654_v25 = vadd.f32 %v936_v22, %v872_v19 }
 0x137   :  { %v723_v26 = vadd.f32 %v722_v15, %v708_v24  ;;  %672 = vst [vmem:[%s1290_s2 + $0x78] sm:$0xff] %v654_v25  ;;  %v687_v27 = vadd.f32 %v686_v23, %v654_v25  ;;  %v709_v28 = vmul.f32 %v654_v25, %v654_v25 }
 0x139   :  { %v688_v29 = vrot.slane %v687_v27, 4  ;;  %v724_v30 = vadd.f32 %v723_v26, %v709_v28 }
 0x13b   :  { %v689_v31 = vadd.f32 %v688_v29, %v687_v27  ;;  %v725_v32 = vrot.slane %v724_v30, 4 }
 0x13d   :  { %v690_v33 = vrot.slane %v689_v31, 2  ;;  %v726_v34 = vadd.f32 %v725_v32, %v724_v30 }
 0x13f   :  { %v691_v35 = vadd.f32 %v690_v33, %v689_v31  ;;  %v727_v36 = vrot.slane %v726_v34, 2 }
 0x141   :  { %v692_v37 = vrot.slane %v691_v35, 1  ;;  %v728_v38 = vadd.f32 %v727_v36, %v726_v34 }
 0x143   :  { %v693_v39 = vadd.f32 %v692_v37, %v691_v35  ;;  %v729_v40 = vrot.slane %v728_v38, 1 }
 0x145   :  { %v730_v41 = vadd.f32 %v729_v40, %v728_v38  ;;  %731 = vst [vmem:[%s1291_s3] sm:$0xff] %v693_v39 }
 0x147   :  { %732 = vst [vmem:[%s1292_s4] sm:$0xff] %v730_v41 }

// kernel: hourglass_forward.57
= control target key start
LH: loop header
LB: loop body
LE: loop exit
PB: predicated region body
PF: predicated region fallthrough
CT: control target
= control target key end

     0   :  { %s551_s1 = inlined_call_operand.vmem [shape: bf16[128,128], index: 1, kind: input, shape index: {}]   ;;  %s552_s0 = inlined_call_operand.vmem [shape: bf16[128,128], index: 0, kind: input, shape index: {}]   ;;  %s553_s2 = inlined_call_operand.vmem [shape: f32[128,128], index: 2, kind: output, shape index: {0}]   ;;  %s554_s3 = inlined_call_operand.vmem [shape: f32[1,8,128], index: 3, kind: output, shape index: {1}]   ;;  %s555_s4 = inlined_call_operand.vmem [shape: f32[1,8,128], index: 4, kind: output, shape index: {2}]  }
   0x1   :  { %v408_v0 = vld [vmem:[%s551_s1] sm:$0xff]   ;;  %v409_v1 = vld [vmem:[%s551_s1 + $0x8] sm:$0xff]   ;;  %v410_v2 = vld [vmem:[%s551_s1 + $0x10] sm:$0xff]  }
   0x2   :  { %360 = vmatprep.subr.bf16.mxu0 %v408_v0  ;;  %392 = vmatprep.subr.bf16.mxu1 %v408_v0  ;;  %v411_v3 = vld [vmem:[%s551_s1 + $0x18] sm:$0xff]   ;;  %v416_v4 = vld [vmem:[%s552_s0] sm:$0xff]   ;;  %v413_v7 = vld [vmem:[%s551_s1 + $0x28] sm:$0xff]  }
   0x3   :  { %361 = vmatpush3.bf16.msra.mxu0 %v408_v0  ;;  %400 = vmatpush3.bf16.msra.mxu1 %v408_v0  ;;  %v412_v5 = vld [vmem:[%s551_s1 + $0x20] sm:$0xff]   ;;  %v414_v8 = vld [vmem:[%s551_s1 + $0x30] sm:$0xff]   ;;  %v415_v9 = vld [vmem:[%s551_s1 + $0x38] sm:$0xff]  }
   0x4   :  { %362 = vmatprep.subr.bf16.mxu0 %v409_v1  ;;  %393 = vmatprep.subr.bf16.mxu1 %v409_v1  ;;  %v420_v6 = vld [vmem:[%s552_s0 + $0x20] sm:$0xff]   ;;  %v417_v10 = vld [vmem:[%s552_s0 + $0x8] sm:$0xff]   ;;  %v418_v12 = vld [vmem:[%s552_s0 + $0x10] sm:$0xff]  }
   0x5   :  { %376 = vmatprep.mubr.bf16.mxu0 %v416_v4  ;;  %384 = vmatprep.mubr.bf16.mxu1 %v420_v6  ;;  %v421_v11 = vld [vmem:[%s552_s0 + $0x28] sm:$0xff]   ;;  %v422_v13 = vld [vmem:[%s552_s0 + $0x30] sm:$0xff]   ;;  %v419_v14 = vld [vmem:[%s552_s0 + $0x18] sm:$0xff]  }
   0x6   :  { %v423_v15 = vld [vmem:[%s552_s0 + $0x38] sm:$0xff]  }
   0x7   :  { %363 = vmatpush3.bf16.msra.mxu0 %v409_v1  ;;  %401 = vmatpush3.bf16.msra.mxu1 %v409_v1 }
   0x8   :  { %364 = vmatprep.subr.bf16.mxu0 %v410_v2  ;;  %394 = vmatprep.subr.bf16.mxu1 %v410_v2 }
   0xb   :  { %365 = vmatpush3.bf16.msra.mxu0 %v410_v2  ;;  %402 = vmatpush3.bf16.msra.mxu1 %v410_v2 }
   0xc   :  { %366 = vmatprep.subr.bf16.mxu0 %v411_v3  ;;  %395 = vmatprep.subr.bf16.mxu1 %v411_v3 }
   0xf   :  { %367 = vmatpush3.bf16.msra.mxu0 %v411_v3  ;;  %403 = vmatpush3.bf16.msra.mxu1 %v411_v3 }
  0x10   :  { %368 = vmatprep.subr.bf16.mxu0 %v412_v5  ;;  %396 = vmatprep.subr.bf16.mxu1 %v412_v5 }
  0x13   :  { %369 = vmatpush3.bf16.msra.mxu0 %v412_v5  ;;  %404 = vmatpush3.bf16.msra.mxu1 %v412_v5 }
  0x14   :  { %370 = vmatprep.subr.bf16.mxu0 %v413_v7  ;;  %397 = vmatprep.subr.bf16.mxu1 %v413_v7 }
  0x17   :  { %371 = vmatpush3.bf16.msra.mxu0 %v413_v7  ;;  %405 = vmatpush3.bf16.msra.mxu1 %v413_v7 }
  0x18   :  { %372 = vmatprep.subr.bf16.mxu0 %v414_v8  ;;  %398 = vmatprep.subr.bf16.mxu1 %v414_v8 }
  0x1b   :  { %373 = vmatpush3.bf16.msra.mxu0 %v414_v8  ;;  %406 = vmatpush3.bf16.msra.mxu1 %v414_v8 }
  0x1c   :  { %374 = vmatprep.subr.bf16.mxu0 %v415_v9  ;;  %399 = vmatprep.subr.bf16.mxu1 %v415_v9 }
  0x1f   :  { %375 = vmatpush3.bf16.msra.mxu0 %v415_v9  ;;  %407 = vmatpush3.bf16.msra.mxu1 %v415_v9 }
  0x22   :  { %377 = vmatmul.mubr.bf16.vlgmr.msra.gmra.mrb[0].mxu0 %v417_v10  ;;  %385 = vmatmul.mubr.bf16.vlgmr.msra.gmra.mrb[0].mxu1 %v421_v11 }
  0x23   :  { %380 = vmatprep.mubr.bf16.mxu0 %v418_v12  ;;  %388 = vmatprep.mubr.bf16.mxu1 %v422_v13 }
  0x2a   :  { %381 = vmatmul.mubr.bf16.gmra.mrb[4].mxu0 %v419_v14  ;;  %389 = vmatmul.mubr.bf16.gmra.mrb[4].mxu1 %v423_v15 }
  0xf5   :  { %v378_v16 = vpop.f32.mrb[0].mxu0  ;;  %v386_v17 = vpop.f32.mrb[0].mxu1 }
  0xf6   :  { %242 = vst [vmem:[%s553_s2 + $0x10] sm:$0xff] %v378_v16  ;;  %v177_v18 = vpop.f32.mrb[1].mxu0  ;;  %250 = vst [vmem:[%s553_s2 + $0x50] sm:$0xff] %v386_v17  ;;  %v209_v19 = vpop.f32.mrb[1].mxu1  ;;  %v279_v27 = vmul.f32 %v378_v16, %v378_v16  ;;  %v287_v59 = vmul.f32 %v386_v17, %v386_v17 }
  0xf7   :  { %240 = vst [vmem:[%s553_s2] sm:$0xff] %v177_v18  ;;  %v379_v20 = vpop.f32.mrb[2].mxu0  ;;  %248 = vst [vmem:[%s553_s2 + $0x40] sm:$0xff] %v209_v19  ;;  %v387_v21 = vpop.f32.mrb[2].mxu1  ;;  %v277_v24 = vmul.f32 %v177_v18, %v177_v18  ;;  %v285_v53 = vmul.f32 %v209_v19, %v209_v19 }
  0xf8   :  { %243 = vst [vmem:[%s553_s2 + $0x18] sm:$0xff] %v379_v20  ;;  %v180_v22 = vpop.f32.mrb[3].mxu0  ;;  %251 = vst [vmem:[%s553_s2 + $0x58] sm:$0xff] %v387_v21  ;;  %v212_v23 = vpop.f32.mrb[3].mxu1  ;;  %v280_v30 = vmul.f32 %v379_v20, %v379_v20  ;;  %v288_v62 = vmul.f32 %v387_v21, %v387_v21 }
  0xf9   :  { %241 = vst [vmem:[%s553_s2 + $0x8] sm:$0xff] %v180_v22  ;;  %v256_v25 = vadd.f32 %v180_v22, %v177_v18  ;;  %v278_v26 = vmul.f32 %v180_v22, %v180_v22  ;;  %249 = vst [vmem:[%s553_s2 + $0x48] sm:$0xff] %v212_v23  ;;  %v286_v58 = vmul.f32 %v212_v23, %v212_v23 }
  0xfb   :  { %v257_v28 = vadd.f32 %v378_v16, %v256_v25  ;;  %v293_v29 = vadd.f32 %v278_v26, %v277_v24 }
  0xfd   :  { %v294_v31 = vadd.f32 %v293_v29, %v279_v27  ;;  %v382_v32 = vpop.f32.mrb[4].mxu0  ;;  %v258_v33 = vadd.f32 %v379_v20, %v257_v28  ;;  %v390_v34 = vpop.f32.mrb[4].mxu1 }
  0xfe   :  { %246 = vst [vmem:[%s553_s2 + $0x30] sm:$0xff] %v382_v32  ;;  %v193_v35 = vpop.f32.mrb[5].mxu0  ;;  %254 = vst [vmem:[%s553_s2 + $0x70] sm:$0xff] %v390_v34  ;;  %v225_v36 = vpop.f32.mrb[5].mxu1  ;;  %v283_v47 = vmul.f32 %v382_v32, %v382_v32  ;;  %v291_v7 = vmul.f32 %v390_v34, %v390_v34 }
  0xff   :  { %244 = vst [vmem:[%s553_s2 + $0x20] sm:$0xff] %v193_v35  ;;  %v259_v37 = vadd.f32 %v258_v33, %v193_v35  ;;  %v281_v38 = vmul.f32 %v193_v35, %v193_v35  ;;  %v295_v39 = vadd.f32 %v294_v31, %v280_v30  ;;  %v383_v40 = vpop.f32.mrb[6].mxu0  ;;  %252 = vst [vmem:[%s553_s2 + $0x60] sm:$0xff] %v225_v36  ;;  %v391_v41 = vpop.f32.mrb[6].mxu1 }
 0x100   :  { %247 = vst [vmem:[%s553_s2 + $0x38] sm:$0xff] %v383_v40  ;;  %v196_v42 = vpop.f32.mrb[7].mxu0  ;;  %255 = vst [vmem:[%s553_s2 + $0x78] sm:$0xff] %v391_v41  ;;  %v228_v43 = vpop.f32.mrb[7].mxu1  ;;  %v284_v50 = vmul.f32 %v383_v40, %v383_v40  ;;  %v289_v1 = vmul.f32 %v225_v36, %v225_v36  ;;  %v292_v10 = vmul.f32 %v391_v41, %v391_v41 }
 0x101   :  { %v296_v44 = vadd.f32 %v295_v39, %v281_v38  ;;  %245 = vst [vmem:[%s553_s2 + $0x28] sm:$0xff] %v196_v42  ;;  %v260_v45 = vadd.f32 %v259_v37, %v196_v42  ;;  %v282_v46 = vmul.f32 %v196_v42, %v196_v42  ;;  %253 = vst [vmem:[%s553_s2 + $0x68] sm:$0xff] %v228_v43 }
 0x102   :  { %v290_v6 = vmul.f32 %v228_v43, %v228_v43 }
 0x103   :  { %v261_v48 = vadd.f32 %v382_v32, %v260_v45  ;;  %v297_v49 = vadd.f32 %v296_v44, %v282_v46 }
 0x105   :  { %v298_v51 = vadd.f32 %v297_v49, %v283_v47  ;;  %v262_v52 = vadd.f32 %v383_v40, %v261_v48 }
 0x107   :  { %v263_v54 = vadd.f32 %v262_v52, %v209_v19  ;;  %v299_v55 = vadd.f32 %v298_v51, %v284_v50 }
 0x109   :  { %v300_v56 = vadd.f32 %v299_v55, %v285_v53  ;;  %v264_v57 = vadd.f32 %v263_v54, %v212_v23 }
 0x10b   :  { %v265_v60 = vadd.f32 %v386_v17, %v264_v57  ;;  %v301_v61 = vadd.f32 %v300_v56, %v286_v58 }
 0x10d   :  { %v302_v63 = vadd.f32 %v301_v61, %v287_v59  ;;  %v266_v0 = vadd.f32 %v387_v21, %v265_v60 }
 0x10f   :  { %v267_v2 = vadd.f32 %v266_v0, %v225_v36  ;;  %v303_v3 = vadd.f32 %v302_v63, %v288_v62 }
 0x111   :  { %v304_v4 = vadd.f32 %v303_v3, %v289_v1  ;;  %v268_v5 = vadd.f32 %v267_v2, %v228_v43 }
 0x113   :  { %v269_v8 = vadd.f32 %v390_v34, %v268_v5  ;;  %v305_v9 = vadd.f32 %v304_v4, %v290_v6 }
 0x115   :  { %v270_v11 = vadd.f32 %v391_v41, %v269_v8  ;;  %v306_v12 = vadd.f32 %v305_v9, %v291_v7 }
 0x117   :  { %v271_v13 = vrot.slane %v270_v11, 4  ;;  %v307_v14 = vadd.f32 %v306_v12, %v292_v10 }
 0x119   :  { %v272_v15 = vadd.f32 %v271_v13, %v270_v11  ;;  %v308_v16 = vrot.slane %v307_v14, 4 }
 0x11b   :  { %v273_v17 = vrot.slane %v272_v15, 2  ;;  %v309_v18 = vadd.f32 %v308_v16, %v307_v14 }
 0x11d   :  { %v274_v19 = vadd.f32 %v273_v17, %v272_v15  ;;  %v310_v20 = vrot.slane %v309_v18, 2 }
 0x11f   :  { %v275_v21 = vrot.slane %v274_v19, 1  ;;  %v311_v22 = vadd.f32 %v310_v20, %v309_v18 }
 0x121   :  { %v276_v23 = vadd.f32 %v275_v21, %v274_v19  ;;  %v312_v24 = vrot.slane %v311_v22, 1 }
 0x123   :  { %v313_v25 = vadd.f32 %v312_v24, %v311_v22  ;;  %314 = vst [vmem:[%s554_s3] sm:$0xff] %v276_v23 }
 0x125   :  { %315 = vst [vmem:[%s555_s4] sm:$0xff] %v313_v25 }

// kernel: hourglass_forward.71
= control target key start
LH: loop header
LB: loop body
LE: loop exit
PB: predicated region body
PF: predicated region fallthrough
CT: control target
= control target key end

     0   :  { %s510_s0 = inlined_call_operand.vmem [shape: f32[128,128], index: 0, kind: input, shape index: {}]   ;;  %s511_s1 = inlined_call_operand.vmem [shape: f32[1,128], index: 1, kind: input, shape index: {}]   ;;  %s512_s2 = inlined_call_operand.vmem [shape: f32[1,128], index: 2, kind: input, shape index: {}]   ;;  %s513_s3 = inlined_call_operand.vmem [shape: bf16[128,128], index: 3, kind: input, shape index: {}]   ;;  %s514_s4 = inlined_call_operand.vmem [shape: bf16[128,128], index: 4, kind: output, shape index: {}]  }
   0x1   :  { %v17_v0 = vld [vmem:[%s510_s0] sm:$0xff]  ;;  %v18_v1 = vld [vmem:[%s510_s0 + $0x8] sm:$0xff]  ;;  %v19_v7 = vld [vmem:[%s510_s0 + $0x10] sm:$0xff] }
   0x2   :  { %v381_v2 = vld [vmem:[%s511_s1] ss:$0 sm:$0xff]  ;;  %v20_v10 = vld [vmem:[%s510_s0 + $0x18] sm:$0xff]  ;;  %v333_v12 = vld [vmem:[%s513_s3 + $0x8] sm:$0xff]  }
   0x3   :  { %v40_v3 = vmul.f32 %v381_v2, %v17_v0  ;;  %v41_v4 = vmul.f32 %v381_v2, %v18_v1  ;;  %v388_v5 = vld [vmem:[%s512_s2] ss:$0 sm:$0xff]  ;;  %v42_v11 = vmul.f32 %v381_v2, %v19_v7  ;;  %v43_v16 = vmul.f32 %v381_v2, %v20_v10  ;;  %v22_v18 = vld [vmem:[%s510_s0 + $0x28] sm:$0xff]  ;;  %v334_v19 = vld [vmem:[%s513_s3 + $0x10] sm:$0xff]  }
   0x4   :  { %v262_v6 = vld [vmem:[%s513_s3] sm:$0xff]   ;;  %v267_v17 = vunpack.c.l.bf16 %v333_v12  ;;  %v268_v21 = vunpack.c.h.bf16 %v333_v12  ;;  %v45_v23 = vmul.f32 %v381_v2, %v22_v18  ;;  %v23_v24 = vld [vmem:[%s510_s0 + $0x30] sm:$0xff]  ;;  %v271_v28 = vunpack.c.l.bf16 %v334_v19  ;;  %v24_v29 = vld [vmem:[%s510_s0 + $0x38] sm:$0xff] }
   0x5   :  { %v263_v8 = vunpack.c.l.bf16 %v262_v6  ;;  %v264_v9 = vunpack.c.h.bf16 %v262_v6  ;;  %v21_v13 = vld [vmem:[%s510_s0 + $0x20] sm:$0xff]  ;;  %v63_v14 = vadd.f32 %v388_v5, %v40_v3  ;;  %v64_v15 = vadd.f32 %v388_v5, %v41_v4  ;;  %v335_v34 = vld [vmem:[%s513_s3 + $0x18] sm:$0xff]   ;;  %v26_v44 = vld [vmem:[%s510_s0 + $0x48] sm:$0xff] }
   0x6   :  { %v65_v20 = vadd.f32 %v388_v5, %v42_v11  ;;  %v44_v22 = vmul.f32 %v381_v2, %v21_v13  ;;  %v66_v27 = vadd.f32 %v388_v5, %v43_v16  ;;  %v68_v32 = vadd.f32 %v388_v5, %v45_v23  ;;  %v25_v43 = vld [vmem:[%s510_s0 + $0x40] sm:$0xff]  ;;  %v27_v54 = vld [vmem:[%s510_s0 + $0x50] sm:$0xff]  ;;  %v28_v59 = vld [vmem:[%s510_s0 + $0x58] sm:$0xff] }
   0x7   :  { %v111_v25 = vadd.f32 %v263_v8, %v63_v14  ;;  %v112_v26 = vadd.f32 %v264_v9, %v64_v15  ;;  %v272_v33 = vunpack.c.h.bf16 %v334_v19  ;;  %v46_v38 = vmul.f32 %v381_v2, %v23_v24  ;;  %v336_v49 = vld [vmem:[%s513_s3 + $0x20] sm:$0xff]   ;;  %v337_v60 = vld [vmem:[%s513_s3 + $0x28] sm:$0xff]   ;;  %v338_v9 = vld [vmem:[%s513_s3 + $0x30] sm:$0xff]  }
   0x8   :  { %v113_v30 = vadd.f32 %v267_v17, %v65_v20  ;;  %v67_v31 = vadd.f32 %v388_v5, %v44_v22  ;;  %v114_v37 = vadd.f32 %v268_v21, %v66_v27  ;;  %v47_v42 = vmul.f32 %v381_v2, %v24_v29  ;;  %v29_v1 = vld [vmem:[%s510_s0 + $0x60] sm:$0xff]  ;;  %v30_v8 = vld [vmem:[%s510_s0 + $0x68] sm:$0xff]  ;;  %v31_v18 = vld [vmem:[%s510_s0 + $0x70] sm:$0xff] }
   0x9   :  { %v127_v35 = vmax.f32 %v111_v25, 0.0  ;;  %v128_v36 = vmax.f32 %v112_v26, 0.0  ;;  %v116_v41 = vadd.f32 %v272_v33, %v68_v32  ;;  %v69_v47 = vadd.f32 %v388_v5, %v46_v38  ;;  %v32_v23 = vld [vmem:[%s510_s0 + $0x78] sm:$0xff] }
   0xa   :  { %v129_v39 = vmax.f32 %v113_v30, 0.0  ;;  %v115_v40 = vadd.f32 %v271_v28, %v67_v31  ;;  %v130_v46 = vmax.f32 %v114_v37, 0.0  ;;  %v275_v48 = vunpack.c.l.bf16 %v335_v34  ;;  %v339_v28 = vld [vmem:[%s513_s3 + $0x38] sm:$0xff]  }
   0xb   :  { %v296_v45 = vpack.c.bf16 %v128_v36, %v127_v35  ;;  %v132_v51 = vmax.f32 %v116_v41, 0.0  ;;  %v70_v52 = vadd.f32 %v388_v5, %v47_v42  ;;  %v276_v53 = vunpack.c.h.bf16 %v335_v34 }
   0xc   :  { %v131_v50 = vmax.f32 %v115_v40, 0.0  ;;  %v301_v55 = vpack.c.bf16 %v130_v46, %v129_v39  ;;  %v117_v56 = vadd.f32 %v275_v48, %v69_v47  ;;  %v48_v57 = vmul.f32 %v381_v2, %v25_v43 }
   0xd   :  { %297 = vst [vmem:[%s514_s4] sm:$0xff] %v296_v45   ;;  %v49_v58 = vmul.f32 %v381_v2, %v26_v44  ;;  %v118_v62 = vadd.f32 %v276_v53, %v70_v52  ;;  %v279_v63 = vunpack.c.l.bf16 %v336_v49  ;;  %v280_v0 = vunpack.c.h.bf16 %v336_v49 }
   0xe   :  { %v306_v61 = vpack.c.bf16 %v132_v51, %v131_v50  ;;  %340 = vst [vmem:[%s514_s4 + $0x8] sm:$0xff] %v301_v55   ;;  %v133_v3 = vmax.f32 %v117_v56, 0.0  ;;  %v71_v4 = vadd.f32 %v388_v5, %v48_v57  ;;  %v50_v7 = vmul.f32 %v381_v2, %v27_v54 }
   0xf   :  { %v72_v6 = vadd.f32 %v388_v5, %v49_v58  ;;  %v134_v10 = vmax.f32 %v118_v62, 0.0  ;;  %v51_v11 = vmul.f32 %v381_v2, %v28_v59  ;;  %v283_v12 = vunpack.c.l.bf16 %v337_v60 }
  0x10   :  { %341 = vst [vmem:[%s514_s4 + $0x10] sm:$0xff] %v306_v61   ;;  %v284_v13 = vunpack.c.h.bf16 %v337_v60  ;;  %v119_v14 = vadd.f32 %v279_v63, %v71_v4  ;;  %v73_v16 = vadd.f32 %v388_v5, %v50_v7  ;;  %v52_v17 = vmul.f32 %v381_v2, %v29_v1 }
  0x11   :  { %v120_v15 = vadd.f32 %v280_v0, %v72_v6  ;;  %v311_v19 = vpack.c.bf16 %v134_v10, %v133_v3  ;;  %v74_v20 = vadd.f32 %v388_v5, %v51_v11  ;;  %v53_v21 = vmul.f32 %v381_v2, %v30_v8 }
  0x12   :  { %v287_v22 = vunpack.c.l.bf16 %v338_v9  ;;  %v135_v24 = vmax.f32 %v119_v14, 0.0  ;;  %v121_v26 = vadd.f32 %v283_v12, %v73_v16  ;;  %v75_v27 = vadd.f32 %v388_v5, %v52_v17 }
  0x13   :  { %v136_v25 = vmax.f32 %v120_v15, 0.0  ;;  %342 = vst [vmem:[%s514_s4 + $0x18] sm:$0xff] %v311_v19   ;;  %v122_v29 = vadd.f32 %v284_v13, %v74_v20  ;;  %v76_v30 = vadd.f32 %v388_v5, %v53_v21  ;;  %v288_v31 = vunpack.c.h.bf16 %v338_v9 }
  0x14   :  { %v54_v32 = vmul.f32 %v381_v2, %v31_v18  ;;  %v137_v34 = vmax.f32 %v121_v26, 0.0  ;;  %v123_v35 = vadd.f32 %v287_v22, %v75_v27  ;;  %v55_v36 = vmul.f32 %v381_v2, %v32_v23 }
  0x15   :  { %v316_v33 = vpack.c.bf16 %v136_v25, %v135_v24  ;;  %v138_v37 = vmax.f32 %v122_v29, 0.0  ;;  %v124_v38 = vadd.f32 %v288_v31, %v76_v30  ;;  %v291_v40 = vunpack.c.l.bf16 %v339_v28 }
  0x16   :  { %v77_v39 = vadd.f32 %v388_v5, %v54_v32  ;;  %v139_v41 = vmax.f32 %v123_v35, 0.0  ;;  %v78_v42 = vadd.f32 %v388_v5, %v55_v36  ;;  %v292_v43 = vunpack.c.h.bf16 %v339_v28 }
  0x17   :  { %343 = vst [vmem:[%s514_s4 + $0x20] sm:$0xff] %v316_v33   ;;  %v321_v44 = vpack.c.bf16 %v138_v37, %v137_v34  ;;  %v140_v45 = vmax.f32 %v124_v38, 0.0 }
  0x18   :  { %v125_v46 = vadd.f32 %v291_v40, %v77_v39  ;;  %v126_v47 = vadd.f32 %v292_v43, %v78_v42 }
  0x19   :  { %344 = vst [vmem:[%s514_s4 + $0x28] sm:$0xff] %v321_v44   ;;  %v326_v2 = vpack.c.bf16 %v140_v45, %v139_v41 }
  0x1a   :  { %v141_v48 = vmax.f32 %v125_v46, 0.0  ;;  %v142_v49 = vmax.f32 %v126_v47, 0.0 }
  0x1b   :  { %345 = vst [vmem:[%s514_s4 + $0x30] sm:$0xff] %v326_v2  }
  0x1c   :  { %v331_v50 = vpack.c.bf16 %v142_v49, %v141_v48 }
  0x1e   :  { %346 = vst [vmem:[%s514_s4 + $0x38] sm:$0xff] %v331_v50  }

// kernel: hourglass_forward.54
= control target key start
LH: loop header
LB: loop body
LE: loop exit
PB: predicated region body
PF: predicated region fallthrough
CT: control target
= control target key end

     0   :  { %s1488_s15 = smov 0   ;;  %s1836_s0 = inlined_call_operand.vmem [shape: bf16[4096,128], index: 0, kind: input, shape index: {}]   ;;  %s1837_s1 = inlined_call_operand.vmem [shape: bf16[128,128], index: 1, kind: input, shape index: {}]   ;;  %s1838_s2 = inlined_call_operand.vmem [shape: f32[4096,128], index: 2, kind: output, shape index: {0}]   ;;  %s1839_s3 = inlined_call_operand.vmem [shape: f32[8,8,128], index: 3, kind: output, shape index: {1}]   ;;  %s1840_s4 = inlined_call_operand.vmem [shape: f32[8,8,128], index: 4, kind: output, shape index: {2}]  }
   0x1 LB: > { %s1494_s16 = sadd.s32 4294967295, %s1461_s15   ;;  %p1222_p0 = scmp.ge.s32.totalorder %s1461_s15, 1  ;;  %s1461_s15 = sphi %s1488_s15, %s15_s15  }
   0x2   : > { %p168_p1 = scmp.lt.s32.totalorder %s1461_s15, 9 }
   0x4   : > { %p169_p2 = pnand %p1222_p0, %p168_p1 }
   0x5   : > { %v1415_v0 = vld [vmem:[%s1837_s1] sm:$0xff] (!%p169_p2)   ;;  %s1223_s19 = sshll.u32 (!%p169_p2), %s1494_s16, 6  ;;  %v1416_v1 = vld [vmem:[%s1837_s1 + $0x8] sm:$0xff] (!%p169_p2)   ;;  %v1417_v2 = vld [vmem:[%s1837_s1 + $0x10] sm:$0xff] (!%p169_p2)   ;;  %p214_p4 = scmp.lt.s32.totalorder (!%p169_p2), %s1494_s16, 7 }
   0x6   : > { %172 = sbr.rel (%p169_p2) target bundleno = 394 (0x18a), region = 28  ;;  %p203_p3 = scmp.lt.s32.totalorder (!%p169_p2), %s1223_s19, 511  ;;  %1311 = vmatprep.subr.bf16.mxu0 (!%p169_p2), %v1415_v0  ;;  %1391 = vmatprep.subr.bf16.mxu1 (!%p169_p2), %v1415_v0  ;;  %v1418_v3 = vld [vmem:[%s1837_s1 + $0x18] sm:$0xff] (!%p169_p2)   ;;  %v1419_v5 = vld [vmem:[%s1837_s1 + $0x20] sm:$0xff] (!%p169_p2)   ;;  %v1420_v6 = vld [vmem:[%s1837_s1 + $0x28] sm:$0xff] (!%p169_p2)  }
   0x7   : > { %1312 = vmatpush3.bf16.msra.mxu0 (!%p169_p2), %v1415_v0  ;;  %1399 = vmatpush3.bf16.msra.mxu1 (!%p169_p2), %v1415_v0  ;;  %v1421_v7 = vld [vmem:[%s1837_s1 + $0x30] sm:$0xff] (!%p169_p2)   ;;  %v1422_v8 = vld [vmem:[%s1837_s1 + $0x38] sm:$0xff] (!%p169_p2)  }
   0x8   : > { %1313 = vmatprep.subr.bf16.mxu0 (!%p169_p2), %v1416_v1  ;;  %1392 = vmatprep.subr.bf16.mxu1 (!%p169_p2), %v1416_v1 }
   0xb   : > { %1314 = vmatpush3.bf16.msra.mxu0 (!%p169_p2), %v1416_v1  ;;  %1400 = vmatpush3.bf16.msra.mxu1 (!%p169_p2), %v1416_v1 }
   0xc   : > { %1315 = vmatprep.subr.bf16.mxu0 (!%p169_p2), %v1417_v2  ;;  %1393 = vmatprep.subr.bf16.mxu1 (!%p169_p2), %v1417_v2 }
   0xd   : > { %s1842_s19 = smov (!%p203_p3, %s1223_s19), 511  ;;  %s1844_s16 = smov (!%p214_p4, %s1494_s16), 7 }
   0xe   : > { %s1224_s24 = sshll.u32 %s1842_s19, 2  ;;  %s1226_s12 = sshll.u32 %s1842_s19, 3 }
   0xf   : > { %s1514_s27 = scalar_lea.vmem %s1836_s0, %s1224_s24  ;;  %1316 = vmatpush3.bf16.msra.mxu0 %v1417_v2  ;;  %1401 = vmatpush3.bf16.msra.mxu1 %v1417_v2  ;;  %s1567_s17 = scalar_lea.vmem %s1838_s2, %s1226_s12 }
  0x10   : > { %v1423_v4 = vld [vmem:[%s1514_s27] sm:$0xff]   ;;  %1317 = vmatprep.subr.bf16.mxu0 %v1418_v3  ;;  %1394 = vmatprep.subr.bf16.mxu1 %v1418_v3  ;;  %v1424_v10 = vld [vmem:[%s1514_s27 + $0x8] sm:$0xff]   ;;  %v1425_v11 = vld [vmem:[%s1514_s27 + $0x10] sm:$0xff]   ;;  %s1227_s18 = sshll.u32 %s1844_s16, 3 }
  0x11   : > { %1327 = vmatprep.mubr.bf16.mxu0 %v1423_v4  ;;  %v1439_v9 = vld [vmem:[%s1514_s27 + $0x80] sm:$0xff]   ;;  %v1440_v12 = vld [vmem:[%s1514_s27 + $0x88] sm:$0xff]   ;;  %v1441_v13 = vld [vmem:[%s1514_s27 + $0x90] sm:$0xff]   ;;  %s217_s21 = scalar_lea.vmem %s1839_s3, %s1227_s18  ;;  %s221_s24 = scalar_lea.vmem %s1840_s4, %s1227_s18 }
  0x12   : > { %1359 = vmatprep.mubr.bf16.mxu1 %v1439_v9  ;;  %v1426_v14 = vld [vmem:[%s1514_s27 + $0x18] sm:$0xff]   ;;  %v1427_v15 = vld [vmem:[%s1514_s27 + $0x20] sm:$0xff]   ;;  %v1428_v18 = vld [vmem:[%s1514_s27 + $0x28] sm:$0xff]  }
  0x13   : > { %1318 = vmatpush3.bf16.msra.mxu0 %v1418_v3  ;;  %1402 = vmatpush3.bf16.msra.mxu1 %v1418_v3  ;;  %v1442_v16 = vld [vmem:[%s1514_s27 + $0x98] sm:$0xff]   ;;  %v1443_v17 = vld [vmem:[%s1514_s27 + $0xa0] sm:$0xff]   ;;  %v1444_v19 = vld [vmem:[%s1514_s27 + $0xa8] sm:$0xff]  }
  0x14   : > { %1319 = vmatprep.subr.bf16.mxu0 %v1419_v5  ;;  %1395 = vmatprep.subr.bf16.mxu1 %v1419_v5  ;;  %v1429_v20 = vld [vmem:[%s1514_s27 + $0x30] sm:$0xff]   ;;  %v1430_v22 = vld [vmem:[%s1514_s27 + $0x38] sm:$0xff]   ;;  %v1431_v24 = vld [vmem:[%s1514_s27 + $0x40] sm:$0xff]  }
  0x15   : > { %v1445_v21 = vld [vmem:[%s1514_s27 + $0xb0] sm:$0xff]   ;;  %v1446_v23 = vld [vmem:[%s1514_s27 + $0xb8] sm:$0xff]   ;;  %v1447_v25 = vld [vmem:[%s1514_s27 + $0xc0] sm:$0xff]  }
  0x16   : > { %v1432_v26 = vld [vmem:[%s1514_s27 + $0x48] sm:$0xff]   ;;  %v1433_v28 = vld [vmem:[%s1514_s27 + $0x50] sm:$0xff]   ;;  %v1434_v30 = vld [vmem:[%s1514_s27 + $0x58] sm:$0xff]  }
  0x17   : > { %1320 = vmatpush3.bf16.msra.mxu0 %v1419_v5  ;;  %1403 = vmatpush3.bf16.msra.mxu1 %v1419_v5  ;;  %v1448_v27 = vld [vmem:[%s1514_s27 + $0xc8] sm:$0xff]   ;;  %v1449_v29 = vld [vmem:[%s1514_s27 + $0xd0] sm:$0xff]   ;;  %v1450_v31 = vld [vmem:[%s1514_s27 + $0xd8] sm:$0xff]  }
  0x18   : > { %1321 = vmatprep.subr.bf16.mxu0 %v1420_v6  ;;  %1396 = vmatprep.subr.bf16.mxu1 %v1420_v6  ;;  %v1435_v32 = vld [vmem:[%s1514_s27 + $0x60] sm:$0xff]   ;;  %v1436_v34 = vld [vmem:[%s1514_s27 + $0x68] sm:$0xff]   ;;  %v1437_v36 = vld [vmem:[%s1514_s27 + $0x70] sm:$0xff]  }
  0x19   : > { %v1451_v33 = vld [vmem:[%s1514_s27 + $0xe0] sm:$0xff]   ;;  %v1452_v35 = vld [vmem:[%s1514_s27 + $0xe8] sm:$0xff]   ;;  %v1453_v37 = vld [vmem:[%s1514_s27 + $0xf0] sm:$0xff]  }
  0x1a   : > { %v1438_v38 = vld [vmem:[%s1514_s27 + $0x78] sm:$0xff]  }
  0x1b   : > { %1322 = vmatpush3.bf16.msra.mxu0 %v1420_v6  ;;  %1404 = vmatpush3.bf16.msra.mxu1 %v1420_v6  ;;  %v1454_v39 = vld [vmem:[%s1514_s27 + $0xf8] sm:$0xff]  }
  0x1c   : > { %1323 = vmatprep.subr.bf16.mxu0 %v1421_v7  ;;  %1397 = vmatprep.subr.bf16.mxu1 %v1421_v7 }
  0x1f   : > { %1324 = vmatpush3.bf16.msra.mxu0 %v1421_v7  ;;  %1405 = vmatpush3.bf16.msra.mxu1 %v1421_v7 }
  0x20   : > { %1325 = vmatprep.subr.bf16.mxu0 %v1422_v8  ;;  %1398 = vmatprep.subr.bf16.mxu1 %v1422_v8 }
  0x23   : > { %1326 = vmatpush3.bf16.msra.mxu0 %v1422_v8  ;;  %1406 = vmatpush3.bf16.msra.mxu1 %v1422_v8 }
  0x26   : > { %1328 = vmatmul.mubr.bf16.vlgmr.msra.gmra.mrb[0].mxu0 %v1424_v10  ;;  %1360 = vmatmul.mubr.bf16.vlgmr.msra.gmra.mrb[0].mxu1 %v1440_v12 }
  0x27   : > { %1331 = vmatprep.mubr.bf16.mxu0 %v1425_v11  ;;  %1363 = vmatprep.mubr.bf16.mxu1 %v1441_v13 }
  0x2e   : > { %1332 = vmatmul.mubr.bf16.gmra.mrb[4].mxu0 %v1426_v14  ;;  %1364 = vmatmul.mubr.bf16.gmra.mrb[4].mxu1 %v1442_v16 }
  0x2f   : > { %1335 = vmatprep.mubr.bf16.mxu0 %v1427_v15  ;;  %1367 = vmatprep.mubr.bf16.mxu1 %v1443_v17 }
  0x36   : > { %1336 = vmatmul.mubr.bf16.gmra.mrb[8].mxu0 %v1428_v18  ;;  %1368 = vmatmul.mubr.bf16.gmra.mrb[8].mxu1 %v1444_v19 }
  0x37   : > { %1339 = vmatprep.mubr.bf16.mxu0 %v1429_v20  ;;  %1371 = vmatprep.mubr.bf16.mxu1 %v1445_v21 }
  0x3e   : > { %1340 = vmatmul.mubr.bf16.gmra.mrb[12].mxu0 %v1430_v22  ;;  %1372 = vmatmul.mubr.bf16.gmra.mrb[12].mxu1 %v1446_v23 }
  0x3f   : > { %1343 = vmatprep.mubr.bf16.mxu0 %v1431_v24  ;;  %1375 = vmatprep.mubr.bf16.mxu1 %v1447_v25 }
  0x46   : > { %1344 = vmatmul.mubr.bf16.gmra.mrb[16].mxu0 %v1432_v26  ;;  %1376 = vmatmul.mubr.bf16.gmra.mrb[16].mxu1 %v1448_v27 }
  0x47   : > { %1347 = vmatprep.mubr.bf16.mxu0 %v1433_v28  ;;  %1379 = vmatprep.mubr.bf16.mxu1 %v1449_v29 }
  0x4e   : > { %1348 = vmatmul.mubr.bf16.gmra.mrb[20].mxu0 %v1434_v30  ;;  %1380 = vmatmul.mubr.bf16.gmra.mrb[20].mxu1 %v1450_v31 }
  0x4f   : > { %1351 = vmatprep.mubr.bf16.mxu0 %v1435_v32  ;;  %1383 = vmatprep.mubr.bf16.mxu1 %v1451_v33 }
  0x56   : > { %1352 = vmatmul.mubr.bf16.gmra.mrb[24].mxu0 %v1436_v34  ;;  %1384 = vmatmul.mubr.bf16.gmra.mrb[24].mxu1 %v1452_v35 }
  0x57   : > { %1355 = vmatprep.mubr.bf16.mxu0 %v1437_v36  ;;  %1387 = vmatprep.mubr.bf16.mxu1 %v1453_v37 }
  0x5e   : > { %1356 = vmatmul.mubr.bf16.gmra.mrb[28].mxu0 %v1438_v38  ;;  %1388 = vmatmul.mubr.bf16.gmra.mrb[28].mxu1 %v1454_v39 }
  0xf9   : > { %v1329_v40 = vpop.f32.mrb[0].mxu0  ;;  %v1569_v41 = vpop.f32.mrb[0].mxu1 }
  0xfa   : > { %834 = vst [vmem:[%s1567_s17 + $0x10] sm:$0xff] %v1329_v40  ;;  %v577_v42 = vpop.f32.mrb[1].mxu0  ;;  %866 = vst [vmem:[%s1567_s17 + $0x110] sm:$0xff] %v1569_v41  ;;  %v1574_v43 = vpop.f32.mrb[1].mxu1  ;;  %v967_v51 = vmul.f32 %v1329_v40, %v1329_v40 }
  0xfb   : > { %832 = vst [vmem:[%s1567_s17] sm:$0xff] %v577_v42  ;;  %v1330_v44 = vpop.f32.mrb[2].mxu0  ;;  %864 = vst [vmem:[%s1567_s17 + $0x100] sm:$0xff] %v1574_v43  ;;  %v1579_v45 = vpop.f32.mrb[2].mxu1  ;;  %v965_v48 = vmul.f32 %v577_v42, %v577_v42 }
  0xfc   : > { %835 = vst [vmem:[%s1567_s17 + $0x18] sm:$0xff] %v1330_v44  ;;  %v580_v46 = vpop.f32.mrb[3].mxu0  ;;  %867 = vst [vmem:[%s1567_s17 + $0x118] sm:$0xff] %v1579_v45  ;;  %v1584_v47 = vpop.f32.mrb[3].mxu1  ;;  %v968_v54 = vmul.f32 %v1330_v44, %v1330_v44 }
  0xfd   : > { %833 = vst [vmem:[%s1567_s17 + $0x8] sm:$0xff] %v580_v46  ;;  %v896_v49 = vadd.f32 %v580_v46, %v577_v42  ;;  %v966_v50 = vmul.f32 %v580_v46, %v580_v46  ;;  %865 = vst [vmem:[%s1567_s17 + $0x108] sm:$0xff] %v1584_v47 }
  0xff   : > { %v897_v52 = vadd.f32 %v1329_v40, %v896_v49  ;;  %v1029_v53 = vadd.f32 %v966_v50, %v965_v48 }
 0x101   : > { %v1030_v55 = vadd.f32 %v1029_v53, %v967_v51  ;;  %v1333_v56 = vpop.f32.mrb[4].mxu0  ;;  %v898_v57 = vadd.f32 %v1330_v44, %v897_v52  ;;  %v1589_v58 = vpop.f32.mrb[4].mxu1 }
 0x102   : > { %838 = vst [vmem:[%s1567_s17 + $0x30] sm:$0xff] %v1333_v56  ;;  %v593_v59 = vpop.f32.mrb[5].mxu0  ;;  %870 = vst [vmem:[%s1567_s17 + $0x130] sm:$0xff] %v1589_v58  ;;  %v1594_v60 = vpop.f32.mrb[5].mxu1  ;;  %v971_v7 = vmul.f32 %v1333_v56, %v1333_v56 }
 0x103   : > { %836 = vst [vmem:[%s1567_s17 + $0x20] sm:$0xff] %v593_v59  ;;  %v899_v61 = vadd.f32 %v898_v57, %v593_v59  ;;  %v969_v62 = vmul.f32 %v593_v59, %v593_v59  ;;  %v1031_v63 = vadd.f32 %v1030_v55, %v968_v54  ;;  %v1334_v0 = vpop.f32.mrb[6].mxu0  ;;  %868 = vst [vmem:[%s1567_s17 + $0x120] sm:$0xff] %v1594_v60  ;;  %v1599_v1 = vpop.f32.mrb[6].mxu1 }
 0x104   : > { %839 = vst [vmem:[%s1567_s17 + $0x38] sm:$0xff] %v1334_v0  ;;  %v596_v2 = vpop.f32.mrb[7].mxu0  ;;  %871 = vst [vmem:[%s1567_s17 + $0x138] sm:$0xff] %v1599_v1  ;;  %v1604_v3 = vpop.f32.mrb[7].mxu1  ;;  %v972_v10 = vmul.f32 %v1334_v0, %v1334_v0 }
 0x105   : > { %v1032_v4 = vadd.f32 %v1031_v63, %v969_v62  ;;  %837 = vst [vmem:[%s1567_s17 + $0x28] sm:$0xff] %v596_v2  ;;  %v900_v5 = vadd.f32 %v899_v61, %v596_v2  ;;  %v970_v6 = vmul.f32 %v596_v2, %v596_v2  ;;  %869 = vst [vmem:[%s1567_s17 + $0x128] sm:$0xff] %v1604_v3 }
 0x107   : > { %v901_v8 = vadd.f32 %v1333_v56, %v900_v5  ;;  %v1033_v9 = vadd.f32 %v1032_v4, %v970_v6 }
 0x109   : > { %v1034_v11 = vadd.f32 %v1033_v9, %v971_v7  ;;  %v1337_v12 = vpop.f32.mrb[8].mxu0  ;;  %v902_v13 = vadd.f32 %v1334_v0, %v901_v8  ;;  %v1609_v14 = vpop.f32.mrb[8].mxu1 }
 0x10a   : > { %842 = vst [vmem:[%s1567_s17 + $0x50] sm:$0xff] %v1337_v12  ;;  %v609_v15 = vpop.f32.mrb[9].mxu0  ;;  %874 = vst [vmem:[%s1567_s17 + $0x150] sm:$0xff] %v1609_v14  ;;  %v1614_v16 = vpop.f32.mrb[9].mxu1  ;;  %v975_v27 = vmul.f32 %v1337_v12, %v1337_v12 }
 0x10b   : > { %840 = vst [vmem:[%s1567_s17 + $0x40] sm:$0xff] %v609_v15  ;;  %v903_v17 = vadd.f32 %v902_v13, %v609_v15  ;;  %v973_v18 = vmul.f32 %v609_v15, %v609_v15  ;;  %v1035_v19 = vadd.f32 %v1034_v11, %v972_v10  ;;  %v1338_v20 = vpop.f32.mrb[10].mxu0  ;;  %872 = vst [vmem:[%s1567_s17 + $0x140] sm:$0xff] %v1614_v16  ;;  %v1619_v21 = vpop.f32.mrb[10].mxu1 }
 0x10c   : > { %843 = vst [vmem:[%s1567_s17 + $0x58] sm:$0xff] %v1338_v20  ;;  %v612_v22 = vpop.f32.mrb[11].mxu0  ;;  %875 = vst [vmem:[%s1567_s17 + $0x158] sm:$0xff] %v1619_v21  ;;  %v1624_v23 = vpop.f32.mrb[11].mxu1  ;;  %v976_v30 = vmul.f32 %v1338_v20, %v1338_v20 }
 0x10d   : > { %v1036_v24 = vadd.f32 %v1035_v19, %v973_v18  ;;  %841 = vst [vmem:[%s1567_s17 + $0x48] sm:$0xff] %v612_v22  ;;  %v904_v25 = vadd.f32 %v903_v17, %v612_v22  ;;  %v974_v26 = vmul.f32 %v612_v22, %v612_v22  ;;  %873 = vst [vmem:[%s1567_s17 + $0x148] sm:$0xff] %v1624_v23 }
 0x10f   : > { %v905_v28 = vadd.f32 %v1337_v12, %v904_v25  ;;  %v1037_v29 = vadd.f32 %v1036_v24, %v974_v26 }
 0x111   : > { %v1038_v31 = vadd.f32 %v1037_v29, %v975_v27  ;;  %v1341_v32 = vpop.f32.mrb[12].mxu0  ;;  %v906_v33 = vadd.f32 %v1338_v20, %v905_v28  ;;  %v1629_v34 = vpop.f32.mrb[12].mxu1 }
 0x112   : > { %846 = vst [vmem:[%s1567_s17 + $0x70] sm:$0xff] %v1341_v32  ;;  %v625_v35 = vpop.f32.mrb[13].mxu0  ;;  %878 = vst [vmem:[%s1567_s17 + $0x170] sm:$0xff] %v1629_v34  ;;  %v1634_v36 = vpop.f32.mrb[13].mxu1  ;;  %v979_v51 = vmul.f32 %v1341_v32, %v1341_v32 }
 0x113   : > { %844 = vst [vmem:[%s1567_s17 + $0x60] sm:$0xff] %v625_v35  ;;  %v907_v37 = vadd.f32 %v906_v33, %v625_v35  ;;  %v977_v38 = vmul.f32 %v625_v35, %v625_v35  ;;  %v1039_v39 = vadd.f32 %v1038_v31, %v976_v30  ;;  %v1342_v40 = vpop.f32.mrb[14].mxu0  ;;  %876 = vst [vmem:[%s1567_s17 + $0x160] sm:$0xff] %v1634_v36  ;;  %v1639_v42 = vpop.f32.mrb[14].mxu1 }
 0x114   : > { %847 = vst [vmem:[%s1567_s17 + $0x78] sm:$0xff] %v1342_v40  ;;  %v628_v44 = vpop.f32.mrb[15].mxu0  ;;  %879 = vst [vmem:[%s1567_s17 + $0x178] sm:$0xff] %v1639_v42  ;;  %v1644_v46 = vpop.f32.mrb[15].mxu1  ;;  %v980_v54 = vmul.f32 %v1342_v40, %v1342_v40 }
 0x115   : > { %v1040_v48 = vadd.f32 %v1039_v39, %v977_v38  ;;  %845 = vst [vmem:[%s1567_s17 + $0x68] sm:$0xff] %v628_v44  ;;  %v908_v49 = vadd.f32 %v907_v37, %v628_v44  ;;  %v978_v50 = vmul.f32 %v628_v44, %v628_v44  ;;  %877 = vst [vmem:[%s1567_s17 + $0x168] sm:$0xff] %v1644_v46 }
 0x117   : > { %v909_v52 = vadd.f32 %v1341_v32, %v908_v49  ;;  %v1041_v53 = vadd.f32 %v1040_v48, %v978_v50 }
 0x119   : > { %v1042_v55 = vadd.f32 %v1041_v53, %v979_v51  ;;  %v1345_v56 = vpop.f32.mrb[16].mxu0  ;;  %v910_v57 = vadd.f32 %v1342_v40, %v909_v52  ;;  %v1649_v59 = vpop.f32.mrb[16].mxu1 }
 0x11a   : > { %850 = vst [vmem:[%s1567_s17 + $0x90] sm:$0xff] %v1345_v56  ;;  %v641_v61 = vpop.f32.mrb[17].mxu0  ;;  %882 = vst [vmem:[%s1567_s17 + $0x190] sm:$0xff] %v1649_v59  ;;  %v1654_v62 = vpop.f32.mrb[17].mxu1  ;;  %v983_v11 = vmul.f32 %v1345_v56, %v1345_v56 }
 0x11b   : > { %848 = vst [vmem:[%s1567_s17 + $0x80] sm:$0xff] %v641_v61  ;;  %v911_v63 = vadd.f32 %v910_v57, %v641_v61  ;;  %v981_v0 = vmul.f32 %v641_v61, %v641_v61  ;;  %v1043_v2 = vadd.f32 %v1042_v55, %v980_v54  ;;  %v1346_v4 = vpop.f32.mrb[18].mxu0  ;;  %880 = vst [vmem:[%s1567_s17 + $0x180] sm:$0xff] %v1654_v62  ;;  %v1659_v5 = vpop.f32.mrb[18].mxu1 }
 0x11c   : > { %851 = vst [vmem:[%s1567_s17 + $0x98] sm:$0xff] %v1346_v4  ;;  %v644_v6 = vpop.f32.mrb[19].mxu0  ;;  %883 = vst [vmem:[%s1567_s17 + $0x198] sm:$0xff] %v1659_v5  ;;  %v1664_v7 = vpop.f32.mrb[19].mxu1  ;;  %v984_v15 = vmul.f32 %v1346_v4, %v1346_v4 }
 0x11d   : > { %v1044_v8 = vadd.f32 %v1043_v2, %v981_v0  ;;  %849 = vst [vmem:[%s1567_s17 + $0x88] sm:$0xff] %v644_v6  ;;  %v912_v9 = vadd.f32 %v911_v63, %v644_v6  ;;  %v982_v10 = vmul.f32 %v644_v6, %v644_v6  ;;  %881 = vst [vmem:[%s1567_s17 + $0x188] sm:$0xff] %v1664_v7 }
 0x11f   : > { %v913_v12 = vadd.f32 %v1345_v56, %v912_v9  ;;  %v1045_v13 = vadd.f32 %v1044_v8, %v982_v10 }
 0x121   : > { %v1046_v17 = vadd.f32 %v1045_v13, %v983_v11  ;;  %v1349_v18 = vpop.f32.mrb[20].mxu0  ;;  %v914_v19 = vadd.f32 %v1346_v4, %v913_v12  ;;  %v1669_v20 = vpop.f32.mrb[20].mxu1 }
 0x122   : > { %854 = vst [vmem:[%s1567_s17 + $0xb0] sm:$0xff] %v1349_v18  ;;  %v657_v22 = vpop.f32.mrb[21].mxu0  ;;  %886 = vst [vmem:[%s1567_s17 + $0x1b0] sm:$0xff] %v1669_v20  ;;  %v1674_v24 = vpop.f32.mrb[21].mxu1  ;;  %v987_v37 = vmul.f32 %v1349_v18, %v1349_v18 }
 0x123   : > { %852 = vst [vmem:[%s1567_s17 + $0xa0] sm:$0xff] %v657_v22  ;;  %v915_v25 = vadd.f32 %v914_v19, %v657_v22  ;;  %v985_v26 = vmul.f32 %v657_v22, %v657_v22  ;;  %v1047_v27 = vadd.f32 %v1046_v17, %v984_v15  ;;  %v1350_v28 = vpop.f32.mrb[22].mxu0  ;;  %884 = vst [vmem:[%s1567_s17 + $0x1a0] sm:$0xff] %v1674_v24  ;;  %v1679_v29 = vpop.f32.mrb[22].mxu1 }
 0x124   : > { %855 = vst [vmem:[%s1567_s17 + $0xb8] sm:$0xff] %v1350_v28  ;;  %v660_v30 = vpop.f32.mrb[23].mxu0  ;;  %887 = vst [vmem:[%s1567_s17 + $0x1b8] sm:$0xff] %v1679_v29  ;;  %v1684_v31 = vpop.f32.mrb[23].mxu1  ;;  %v988_v40 = vmul.f32 %v1350_v28, %v1350_v28 }
 0x125   : > { %v1048_v32 = vadd.f32 %v1047_v27, %v985_v26  ;;  %853 = vst [vmem:[%s1567_s17 + $0xa8] sm:$0xff] %v660_v30  ;;  %v916_v33 = vadd.f32 %v915_v25, %v660_v30  ;;  %v986_v35 = vmul.f32 %v660_v30, %v660_v30  ;;  %885 = vst [vmem:[%s1567_s17 + $0x1a8] sm:$0xff] %v1684_v31 }
 0x127   : > { %v917_v38 = vadd.f32 %v1349_v18, %v916_v33  ;;  %v1049_v39 = vadd.f32 %v1048_v32, %v986_v35 }
 0x129   : > { %v1050_v44 = vadd.f32 %v1049_v39, %v987_v37  ;;  %v1353_v48 = vpop.f32.mrb[24].mxu0  ;;  %v918_v49 = vadd.f32 %v1350_v28, %v917_v38  ;;  %v1689_v50 = vpop.f32.mrb[24].mxu1 }
 0x12a   : > { %858 = vst [vmem:[%s1567_s17 + $0xd0] sm:$0xff] %v1353_v48  ;;  %v673_v51 = vpop.f32.mrb[25].mxu0  ;;  %890 = vst [vmem:[%s1567_s17 + $0x1d0] sm:$0xff] %v1689_v50  ;;  %v1694_v52 = vpop.f32.mrb[25].mxu1  ;;  %v991_v6 = vmul.f32 %v1353_v48, %v1353_v48 }
 0x12b   : > { %856 = vst [vmem:[%s1567_s17 + $0xc0] sm:$0xff] %v673_v51  ;;  %v919_v53 = vadd.f32 %v918_v49, %v673_v51  ;;  %v989_v54 = vmul.f32 %v673_v51, %v673_v51  ;;  %v1051_v55 = vadd.f32 %v1050_v44, %v988_v40  ;;  %v1354_v56 = vpop.f32.mrb[26].mxu0  ;;  %888 = vst [vmem:[%s1567_s17 + $0x1c0] sm:$0xff] %v1694_v52  ;;  %v1699_v57 = vpop.f32.mrb[26].mxu1 }
 0x12c   : > { %859 = vst [vmem:[%s1567_s17 + $0xd8] sm:$0xff] %v1354_v56  ;;  %v676_v61 = vpop.f32.mrb[27].mxu0  ;;  %891 = vst [vmem:[%s1567_s17 + $0x1d8] sm:$0xff] %v1699_v57  ;;  %v1704_v63 = vpop.f32.mrb[27].mxu1  ;;  %v992_v10 = vmul.f32 %v1354_v56, %v1354_v56  ;;  %v997_v49 = vmul.f32 %v1574_v43, %v1574_v43 }
 0x12d   : > { %v1052_v0 = vadd.f32 %v1051_v55, %v989_v54  ;;  %857 = vst [vmem:[%s1567_s17 + $0xc8] sm:$0xff] %v676_v61  ;;  %v920_v2 = vadd.f32 %v919_v53, %v676_v61  ;;  %v990_v4 = vmul.f32 %v676_v61, %v676_v61  ;;  %889 = vst [vmem:[%s1567_s17 + $0x1c8] sm:$0xff] %v1704_v63 }
 0x12e   : > { %v999_v61 = vmul.f32 %v1569_v41, %v1569_v41 }
 0x12f   : > { %v921_v8 = vadd.f32 %v1353_v48, %v920_v2  ;;  %v1053_v9 = vadd.f32 %v1052_v0, %v990_v4  ;;  %v1000_v4 = vmul.f32 %v1579_v45, %v1579_v45 }
 0x131   : > { %v1054_v11 = vadd.f32 %v1053_v9, %v991_v6  ;;  %v1357_v12 = vpop.f32.mrb[28].mxu0  ;;  %v922_v13 = vadd.f32 %v1354_v56, %v921_v8  ;;  %v1709_v15 = vpop.f32.mrb[28].mxu1  ;;  %v998_v56 = vmul.f32 %v1584_v47, %v1584_v47 }
 0x132   : > { %862 = vst [vmem:[%s1567_s17 + $0xf0] sm:$0xff] %v1357_v12  ;;  %v689_v17 = vpop.f32.mrb[29].mxu0  ;;  %894 = vst [vmem:[%s1567_s17 + $0x1f0] sm:$0xff] %v1709_v15  ;;  %v1714_v18 = vpop.f32.mrb[29].mxu1  ;;  %v995_v37 = vmul.f32 %v1357_v12, %v1357_v12 }
 0x133   : > { %860 = vst [vmem:[%s1567_s17 + $0xe0] sm:$0xff] %v689_v17  ;;  %v923_v19 = vadd.f32 %v922_v13, %v689_v17  ;;  %v993_v22 = vmul.f32 %v689_v17, %v689_v17  ;;  %v1055_v25 = vadd.f32 %v1054_v11, %v992_v10  ;;  %v1358_v26 = vpop.f32.mrb[30].mxu0  ;;  %892 = vst [vmem:[%s1567_s17 + $0x1e0] sm:$0xff] %v1714_v18  ;;  %v1719_v27 = vpop.f32.mrb[30].mxu1 }
 0x134   : > { %863 = vst [vmem:[%s1567_s17 + $0xf8] sm:$0xff] %v1358_v26  ;;  %v692_v28 = vpop.f32.mrb[31].mxu0  ;;  %895 = vst [vmem:[%s1567_s17 + $0x1f8] sm:$0xff] %v1719_v27  ;;  %v1724_v30 = vpop.f32.mrb[31].mxu1  ;;  %v996_v40 = vmul.f32 %v1358_v26, %v1358_v26 }
 0x135   : > { %v1056_v32 = vadd.f32 %v1055_v25, %v993_v22  ;;  %861 = vst [vmem:[%s1567_s17 + $0xe8] sm:$0xff] %v692_v28  ;;  %v924_v33 = vadd.f32 %v923_v19, %v692_v28  ;;  %v994_v35 = vmul.f32 %v692_v28, %v692_v28  ;;  %893 = vst [vmem:[%s1567_s17 + $0x1e8] sm:$0xff] %v1724_v30 }
 0x137   : > { %v925_v38 = vadd.f32 %v1357_v12, %v924_v33  ;;  %v1057_v39 = vadd.f32 %v1056_v32, %v994_v35  ;;  %v1002_v12 = vmul.f32 %v1604_v3, %v1604_v3  ;;  %v1006_v32 = vmul.f32 %v1624_v23, %v1624_v23 }
 0x139   : > { %v1058_v44 = vadd.f32 %v1057_v39, %v995_v37  ;;  %v926_v48 = vadd.f32 %v1358_v26, %v925_v38 }
 0x13b   : > { %v927_v51 = vadd.f32 %v926_v48, %v1574_v43  ;;  %v1059_v53 = vadd.f32 %v1058_v44, %v996_v40  ;;  %v1001_v43 = vmul.f32 %v1594_v60, %v1594_v60  ;;  %v1010_v48 = vmul.f32 %v1644_v46, %v1644_v46 }
 0x13d   : > { %v1060_v54 = vadd.f32 %v1059_v53, %v997_v49  ;;  %v928_v55 = vadd.f32 %v927_v51, %v1584_v47 }
 0x13f   : > { %v929_v0 = vadd.f32 %v1569_v41, %v928_v55  ;;  %v1061_v2 = vadd.f32 %v1060_v54, %v998_v56  ;;  %v1003_v41 = vmul.f32 %v1589_v58, %v1589_v58 }
 0x141   : > { %v1062_v6 = vadd.f32 %v1061_v2, %v999_v61  ;;  %v930_v8 = vadd.f32 %v1579_v45, %v929_v0  ;;  %v1004_v45 = vmul.f32 %v1599_v1, %v1599_v1  ;;  %v1014_v0 = vmul.f32 %v1664_v7, %v1664_v7 }
 0x143   : > { %v931_v9 = vadd.f32 %v930_v8, %v1594_v60  ;;  %v1063_v10 = vadd.f32 %v1062_v6, %v1000_v4  ;;  %v1005_v60 = vmul.f32 %v1614_v16, %v1614_v16 }
 0x145   : > { %v1064_v11 = vadd.f32 %v1063_v10, %v1001_v43  ;;  %v932_v47 = vadd.f32 %v931_v9, %v1604_v3 }
 0x147   : > { %v933_v13 = vadd.f32 %v1589_v58, %v932_v47  ;;  %v1065_v17 = vadd.f32 %v1064_v11, %v1002_v12  ;;  %v1007_v58 = vmul.f32 %v1609_v14, %v1609_v14  ;;  %v1018_v11 = vmul.f32 %v1684_v31, %v1684_v31 }
 0x149   : > { %v1066_v19 = vadd.f32 %v1065_v17, %v1003_v41  ;;  %v934_v22 = vadd.f32 %v1599_v1, %v933_v13  ;;  %v1008_v1 = vmul.f32 %v1619_v21, %v1619_v21 }
 0x14b   : > { %v935_v25 = vadd.f32 %v934_v22, %v1614_v16  ;;  %v1067_v26 = vadd.f32 %v1066_v19, %v1004_v45  ;;  %v1009_v16 = vmul.f32 %v1634_v36, %v1634_v36  ;;  %v1022_v22 = vmul.f32 %v1704_v63, %v1704_v63 }
 0x14d   : > { %v1068_v28 = vadd.f32 %v1067_v26, %v1005_v60  ;;  %v936_v3 = vadd.f32 %v935_v25, %v1624_v23 }
 0x14f   : > { %v937_v33 = vadd.f32 %v1609_v14, %v936_v3  ;;  %v1069_v35 = vadd.f32 %v1068_v28, %v1006_v32  ;;  %v1011_v14 = vmul.f32 %v1629_v34, %v1629_v34  ;;  %v1025_v28 = vmul.f32 %v1714_v18, %v1714_v18 }
 0x151   : > { %v1070_v37 = vadd.f32 %v1069_v35, %v1007_v58  ;;  %v938_v38 = vadd.f32 %v1619_v21, %v937_v33  ;;  %v1012_v21 = vmul.f32 %v1639_v42, %v1639_v42  ;;  %v1027_v33 = vmul.f32 %v1709_v15, %v1709_v15 }
 0x153   : > { %v939_v39 = vadd.f32 %v938_v38, %v1634_v36  ;;  %v1071_v40 = vadd.f32 %v1070_v37, %v1008_v1  ;;  %v1013_v36 = vmul.f32 %v1654_v62, %v1654_v62 }
 0x155   : > { %v1072_v44 = vadd.f32 %v1071_v40, %v1009_v16  ;;  %v940_v23 = vadd.f32 %v939_v39, %v1644_v46 }
 0x157   : > { %v941_v49 = vadd.f32 %v1629_v34, %v940_v23  ;;  %v1073_v51 = vadd.f32 %v1072_v44, %v1010_v48  ;;  %v1015_v34 = vmul.f32 %v1649_v59, %v1649_v59 }
 0x159   : > { %v1074_v53 = vadd.f32 %v1073_v51, %v1011_v14  ;;  %v942_v54 = vadd.f32 %v1639_v42, %v941_v49  ;;  %v1016_v42 = vmul.f32 %v1659_v5, %v1659_v5 }
 0x15b   : > { %v943_v55 = vadd.f32 %v942_v54, %v1654_v62  ;;  %v1075_v56 = vadd.f32 %v1074_v53, %v1012_v21  ;;  %v1017_v62 = vmul.f32 %v1674_v24, %v1674_v24 }
 0x15d   : > { %v1076_v61 = vadd.f32 %v1075_v56, %v1013_v36  ;;  %v944_v46 = vadd.f32 %v943_v55, %v1664_v7 }
 0x15f   : > { %v945_v2 = vadd.f32 %v1649_v59, %v944_v46  ;;  %v1077_v4 = vadd.f32 %v1076_v61, %v1014_v0  ;;  %v1019_v59 = vmul.f32 %v1669_v20, %v1669_v20 }
 0x161   : > { %v1078_v6 = vadd.f32 %v1077_v4, %v1015_v34  ;;  %v946_v8 = vadd.f32 %v1659_v5, %v945_v2  ;;  %v1020_v5 = vmul.f32 %v1679_v29, %v1679_v29 }
 0x163   : > { %v947_v43 = vadd.f32 %v946_v8, %v1674_v24  ;;  %v1079_v9 = vadd.f32 %v1078_v6, %v1016_v42  ;;  %v1021_v24 = vmul.f32 %v1694_v52, %v1694_v52 }
 0x165   : > { %v1080_v10 = vadd.f32 %v1079_v9, %v1017_v62  ;;  %v948_v7 = vadd.f32 %v947_v43, %v1684_v31 }
 0x167   : > { %v949_v47 = vadd.f32 %v1669_v20, %v948_v7  ;;  %v1081_v12 = vadd.f32 %v1080_v10, %v1018_v11  ;;  %v1023_v20 = vmul.f32 %v1689_v50, %v1689_v50 }
 0x169   : > { %v1082_v41 = vadd.f32 %v1081_v12, %v1019_v59  ;;  %v950_v13 = vadd.f32 %v1679_v29, %v949_v47  ;;  %v1024_v29 = vmul.f32 %v1699_v57, %v1699_v57 }
 0x16b   : > { %v951_v17 = vadd.f32 %v950_v13, %v1694_v52  ;;  %v1083_v45 = vadd.f32 %v1082_v41, %v1020_v5 }
 0x16d   : > { %v1084_v19 = vadd.f32 %v1083_v45, %v1021_v24  ;;  %v952_v31 = vadd.f32 %v951_v17, %v1704_v63 }
 0x16f   : > { %v953_v60 = vadd.f32 %v1689_v50, %v952_v31  ;;  %v1085_v25 = vadd.f32 %v1084_v19, %v1022_v22  ;;  %v1026_v50 = vmul.f32 %v1724_v30, %v1724_v30 }
 0x171   : > { %v1086_v26 = vadd.f32 %v1085_v25, %v1023_v20  ;;  %v954_v52 = vadd.f32 %v1699_v57, %v953_v60  ;;  %v1028_v57 = vmul.f32 %v1719_v27, %v1719_v27 }
 0x173   : > { %v955_v3 = vadd.f32 %v954_v52, %v1714_v18  ;;  %v1087_v63 = vadd.f32 %v1086_v26, %v1024_v29 }
 0x175   : > { %v1088_v32 = vadd.f32 %v1087_v63, %v1025_v28  ;;  %v956_v58 = vadd.f32 %v955_v3, %v1724_v30 }
 0x177   : > { %v957_v35 = vadd.f32 %v1709_v15, %v956_v58  ;;  %v1089_v1 = vadd.f32 %v1088_v32, %v1026_v50 }
 0x179   : > { %v958_v37 = vadd.f32 %v1719_v27, %v957_v35  ;;  %v1090_v18 = vadd.f32 %v1089_v1, %v1027_v33 }
 0x17b   : > { %v959_v38 = vrot.slane %v958_v37, 4  ;;  %v1091_v16 = vadd.f32 %v1090_v18, %v1028_v57 }
 0x17d   : > { %v960_v39 = vadd.f32 %v959_v38, %v958_v37  ;;  %v1092_v40 = vrot.slane %v1091_v16, 4 }
 0x17f   : > { %v961_v44 = vrot.slane %v960_v39, 2  ;;  %v1093_v30 = vadd.f32 %v1092_v40, %v1091_v16 }
 0x181   : > { %v962_v23 = vadd.f32 %v961_v44, %v960_v39  ;;  %v1094_v48 = vrot.slane %v1093_v30, 2 }
 0x183   : > { %v963_v14 = vrot.slane %v962_v23, 1  ;;  %v1095_v15 = vadd.f32 %v1094_v48, %v1093_v30 }
 0x185   : > { %v964_v49 = vadd.f32 %v963_v14, %v962_v23  ;;  %v1096_v51 = vrot.slane %v1095_v15, 1 }
 0x187   : > { %v1097_v27 = vadd.f32 %v1096_v51, %v1095_v15  ;;  %1098 = vst [vmem:[%s217_s21] sm:$0xff] %v964_v49 }
 0x189   : > { %1099 = vst [vmem:[%s221_s24] sm:$0xff] %v1097_v27 }
 0x18a PF: > { %s15_s15 = sadd.s32 1, %s1461_s15  }
 0x18b   : > { %p12_p5 = scmp.ge.s32.totalorder %s15_s15, 10  }
 0x18d   :  { %14 = sbr.rel (!%p12_p5) target bundleno = 1 (0x1), region = 82 }

// kernel: hourglass_forward.55
= control target key start
LH: loop header
LB: loop body
LE: loop exit
PB: predicated region body
PF: predicated region fallthrough
CT: control target
= control target key end

     0   :  { %s1124_s12 = smov 0   ;;  %s1379_s0 = inlined_call_operand.vmem [shape: f32[4096,128], index: 0, kind: input, shape index: {}]   ;;  %s1380_s1 = inlined_call_operand.vmem [shape: f32[1,128], index: 1, kind: input, shape index: {}]   ;;  %s1381_s2 = inlined_call_operand.vmem [shape: f32[1,128], index: 2, kind: input, shape index: {}]   ;;  %s1382_s3 = inlined_call_operand.vmem [shape: bf16[4096,128], index: 3, kind: output, shape index: {}]  }
   0x1 LB: > { %s756_s13 = sadd.s32 4294967295, %s1102_s12   ;;  %p760_p0 = scmp.ge.s32.totalorder %s1102_s12, 1  ;;  %s1102_s12 = sphi %s1124_s12, %s13_s12  }
   0x2   : > { %p138_p1 = scmp.lt.s32.totalorder %s1102_s12, 9 }
   0x4   : > { %p139_p2 = pnand %p760_p0, %p138_p1 }
   0x5   : > { %s761_s14 = sshll.u32 (!%p139_p2), %s756_s13, 6  ;;  %v1135_v0 = vld [vmem:[%s1380_s1] ss:$0 sm:$0xff] (!%p139_p2) }
   0x6   : > { %142 = sbr.rel (%p139_p2) target bundleno = 62 (0x3e), region = 32  ;;  %p163_p3 = scmp.lt.s32.totalorder (!%p139_p2), %s761_s14, 511  ;;  %v1145_v1 = vld [vmem:[%s1381_s2] ss:$0 sm:$0xff] (!%p139_p2) }
   0xd   : > { %s1384_s14 = smov (!%p163_p3, %s761_s14), 511 }
   0xe   : > { %s762_s15 = sshll.u32 %s1384_s14, 3  ;;  %s764_s23 = sshll.u32 %s1384_s14, 2 }
   0xf   : > { %s1140_s20 = scalar_lea.vmem %s1379_s0, %s762_s15  ;;  %s1171_s26 = scalar_lea.vmem %s1382_s3, %s764_s23 }
  0x10   : > { %v174_v2 = vld [vmem:[%s1140_s20] sm:$0xff]  ;;  %v175_v3 = vld [vmem:[%s1140_s20 + $0x8] sm:$0xff]  ;;  %v176_v4 = vld [vmem:[%s1140_s20 + $0x10] sm:$0xff] }
  0x11   : > { %v245_v5 = vmul.f32 %v1135_v0, %v174_v2  ;;  %v246_v6 = vmul.f32 %v1135_v0, %v175_v3  ;;  %v177_v7 = vld [vmem:[%s1140_s20 + $0x18] sm:$0xff]  ;;  %v247_v8 = vmul.f32 %v1135_v0, %v176_v4  ;;  %v178_v9 = vld [vmem:[%s1140_s20 + $0x20] sm:$0xff]  ;;  %v179_v10 = vld [vmem:[%s1140_s20 + $0x28] sm:$0xff] }
  0x12   : > { %v248_v11 = vmul.f32 %v1135_v0, %v177_v7  ;;  %v249_v12 = vmul.f32 %v1135_v0, %v178_v9  ;;  %v250_v13 = vmul.f32 %v1135_v0, %v179_v10  ;;  %v180_v14 = vld [vmem:[%s1140_s20 + $0x30] sm:$0xff]  ;;  %v181_v15 = vld [vmem:[%s1140_s20 + $0x38] sm:$0xff]  ;;  %v182_v16 = vld [vmem:[%s1140_s20 + $0x40] sm:$0xff] }
  0x13   : > { %v316_v17 = vadd.f32 %v1145_v1, %v245_v5  ;;  %v317_v18 = vadd.f32 %v1145_v1, %v246_v6  ;;  %v318_v19 = vadd.f32 %v1145_v1, %v247_v8  ;;  %v251_v20 = vmul.f32 %v1135_v0, %v180_v14  ;;  %v183_v21 = vld [vmem:[%s1140_s20 + $0x48] sm:$0xff]  ;;  %v184_v22 = vld [vmem:[%s1140_s20 + $0x50] sm:$0xff]  ;;  %v185_v27 = vld [vmem:[%s1140_s20 + $0x58] sm:$0xff] }
  0x14   : > { %v319_v23 = vadd.f32 %v1145_v1, %v248_v11  ;;  %v320_v24 = vadd.f32 %v1145_v1, %v249_v12  ;;  %v321_v25 = vadd.f32 %v1145_v1, %v250_v13  ;;  %v252_v26 = vmul.f32 %v1135_v0, %v181_v15  ;;  %v186_v28 = vld [vmem:[%s1140_s20 + $0x60] sm:$0xff]  ;;  %v187_v33 = vld [vmem:[%s1140_s20 + $0x68] sm:$0xff]  ;;  %v188_v34 = vld [vmem:[%s1140_s20 + $0x70] sm:$0xff] }
  0x15   : > { %v900_v29 = vpack.c.bf16 %v317_v18, %v316_v17  ;;  %v322_v30 = vadd.f32 %v1145_v1, %v251_v20  ;;  %v253_v31 = vmul.f32 %v1135_v0, %v182_v16  ;;  %v254_v32 = vmul.f32 %v1135_v0, %v183_v21  ;;  %v189_v39 = vld [vmem:[%s1140_s20 + $0x78] sm:$0xff]  ;;  %v190_v44 = vld [vmem:[%s1140_s20 + $0x80] sm:$0xff]  ;;  %v191_v45 = vld [vmem:[%s1140_s20 + $0x88] sm:$0xff] }
  0x16   : > { %v905_v35 = vpack.c.bf16 %v319_v23, %v318_v19  ;;  %v910_v36 = vpack.c.bf16 %v321_v25, %v320_v24  ;;  %v323_v37 = vadd.f32 %v1145_v1, %v252_v26  ;;  %v255_v38 = vmul.f32 %v1135_v0, %v184_v22  ;;  %v192_v50 = vld [vmem:[%s1140_s20 + $0x90] sm:$0xff]  ;;  %v193_v51 = vld [vmem:[%s1140_s20 + $0x98] sm:$0xff]  ;;  %v194_v56 = vld [vmem:[%s1140_s20 + $0xa0] sm:$0xff] }
  0x17   : > { %901 = vst [vmem:[%s1171_s26] sm:$0xff] %v900_v29   ;;  %v324_v40 = vadd.f32 %v1145_v1, %v253_v31  ;;  %v325_v41 = vadd.f32 %v1145_v1, %v254_v32  ;;  %v256_v42 = vmul.f32 %v1135_v0, %v185_v27  ;;  %v257_v43 = vmul.f32 %v1135_v0, %v186_v28  ;;  %v195_v61 = vld [vmem:[%s1140_s20 + $0xa8] sm:$0xff]  ;;  %v196_v4 = vld [vmem:[%s1140_s20 + $0xb0] sm:$0xff]  ;;  %v197_v5 = vld [vmem:[%s1140_s20 + $0xb8] sm:$0xff] }
  0x18   : > { %1057 = vst [vmem:[%s1171_s26 + $0x8] sm:$0xff] %v905_v35   ;;  %1058 = vst [vmem:[%s1171_s26 + $0x10] sm:$0xff] %v910_v36   ;;  %v915_v46 = vpack.c.bf16 %v323_v37, %v322_v30  ;;  %v326_v47 = vadd.f32 %v1145_v1, %v255_v38  ;;  %v258_v48 = vmul.f32 %v1135_v0, %v187_v33  ;;  %v198_v10 = vld [vmem:[%s1140_s20 + $0xc0] sm:$0xff]  ;;  %v199_v11 = vld [vmem:[%s1140_s20 + $0xc8] sm:$0xff] }
  0x19   : > { %v259_v49 = vmul.f32 %v1135_v0, %v188_v34  ;;  %v920_v52 = vpack.c.bf16 %v325_v41, %v324_v40  ;;  %v327_v53 = vadd.f32 %v1145_v1, %v256_v42  ;;  %v328_v54 = vadd.f32 %v1145_v1, %v257_v43  ;;  %v200_v16 = vld [vmem:[%s1140_s20 + $0xd0] sm:$0xff]  ;;  %v201_v17 = vld [vmem:[%s1140_s20 + $0xd8] sm:$0xff]  ;;  %v202_v22 = vld [vmem:[%s1140_s20 + $0xe0] sm:$0xff] }
  0x1a   : > { %v260_v55 = vmul.f32 %v1135_v0, %v189_v39  ;;  %1059 = vst [vmem:[%s1171_s26 + $0x18] sm:$0xff] %v915_v46   ;;  %v329_v57 = vadd.f32 %v1145_v1, %v258_v48  ;;  %v261_v59 = vmul.f32 %v1135_v0, %v190_v44  ;;  %v262_v60 = vmul.f32 %v1135_v0, %v191_v45  ;;  %v203_v27 = vld [vmem:[%s1140_s20 + $0xe8] sm:$0xff]  ;;  %v204_v32 = vld [vmem:[%s1140_s20 + $0xf0] sm:$0xff]  ;;  %v205_v33 = vld [vmem:[%s1140_s20 + $0xf8] sm:$0xff] }
  0x1b   : > { %v330_v58 = vadd.f32 %v1145_v1, %v259_v49  ;;  %1060 = vst [vmem:[%s1171_s26 + $0x20] sm:$0xff] %v920_v52   ;;  %v925_v62 = vpack.c.bf16 %v327_v53, %v326_v47  ;;  %v263_v2 = vmul.f32 %v1135_v0, %v192_v50  ;;  %v264_v3 = vmul.f32 %v1135_v0, %v193_v51  ;;  %v206_v38 = vld [vmem:[%s1140_s20 + $0x100] sm:$0xff]  ;;  %v207_v39 = vld [vmem:[%s1140_s20 + $0x108] sm:$0xff]  ;;  %v208_v44 = vld [vmem:[%s1140_s20 + $0x110] sm:$0xff] }
  0x1c   : > { %v331_v63 = vadd.f32 %v1145_v1, %v260_v55  ;;  %v930_v6 = vpack.c.bf16 %v329_v57, %v328_v54  ;;  %v332_v7 = vadd.f32 %v1145_v1, %v261_v59  ;;  %v333_v8 = vadd.f32 %v1145_v1, %v262_v60  ;;  %v209_v45 = vld [vmem:[%s1140_s20 + $0x118] sm:$0xff]  ;;  %v210_v50 = vld [vmem:[%s1140_s20 + $0x120] sm:$0xff]  ;;  %v211_v55 = vld [vmem:[%s1140_s20 + $0x128] sm:$0xff] }
  0x1d   : > { %v265_v9 = vmul.f32 %v1135_v0, %v194_v56  ;;  %1061 = vst [vmem:[%s1171_s26 + $0x28] sm:$0xff] %v925_v62   ;;  %v334_v13 = vadd.f32 %v1145_v1, %v263_v2  ;;  %v335_v14 = vadd.f32 %v1145_v1, %v264_v3  ;;  %v266_v15 = vmul.f32 %v1135_v0, %v195_v61  ;;  %v212_v60 = vld [vmem:[%s1140_s20 + $0x130] sm:$0xff]  ;;  %v213_v61 = vld [vmem:[%s1140_s20 + $0x138] sm:$0xff] }
  0x1e   : > { %v935_v12 = vpack.c.bf16 %v331_v63, %v330_v58  ;;  %1062 = vst [vmem:[%s1171_s26 + $0x30] sm:$0xff] %v930_v6   ;;  %v940_v18 = vpack.c.bf16 %v333_v8, %v332_v7  ;;  %v267_v20 = vmul.f32 %v1135_v0, %v196_v4  ;;  %v268_v21 = vmul.f32 %v1135_v0, %v197_v5  ;;  %v214_v4 = vld [vmem:[%s1140_s20 + $0x140] sm:$0xff]  ;;  %v215_v5 = vld [vmem:[%s1140_s20 + $0x148] sm:$0xff] }
  0x1f   : > { %v336_v19 = vadd.f32 %v1145_v1, %v265_v9  ;;  %v945_v23 = vpack.c.bf16 %v335_v14, %v334_v13  ;;  %v337_v24 = vadd.f32 %v1145_v1, %v266_v15  ;;  %v269_v25 = vmul.f32 %v1135_v0, %v198_v10  ;;  %v216_v10 = vld [vmem:[%s1140_s20 + $0x150] sm:$0xff] }
  0x20   : > { %1063 = vst [vmem:[%s1171_s26 + $0x38] sm:$0xff] %v935_v12   ;;  %v270_v26 = vmul.f32 %v1135_v0, %v199_v11  ;;  %1064 = vst [vmem:[%s1171_s26 + $0x40] sm:$0xff] %v940_v18   ;;  %v338_v28 = vadd.f32 %v1145_v1, %v267_v20  ;;  %v339_v29 = vadd.f32 %v1145_v1, %v268_v21  ;;  %v217_v11 = vld [vmem:[%s1140_s20 + $0x158] sm:$0xff]  ;;  %v219_v21 = vld [vmem:[%s1140_s20 + $0x168] sm:$0xff] }
  0x21   : > { %v271_v30 = vmul.f32 %v1135_v0, %v200_v16  ;;  %v272_v31 = vmul.f32 %v1135_v0, %v201_v17  ;;  %1065 = vst [vmem:[%s1171_s26 + $0x48] sm:$0xff] %v945_v23   ;;  %v950_v34 = vpack.c.bf16 %v337_v24, %v336_v19  ;;  %v340_v35 = vadd.f32 %v1145_v1, %v269_v25  ;;  %v218_v16 = vld [vmem:[%s1140_s20 + $0x160] sm:$0xff] }
  0x22   : > { %v341_v36 = vadd.f32 %v1145_v1, %v270_v26  ;;  %v273_v37 = vmul.f32 %v1135_v0, %v202_v22  ;;  %v955_v40 = vpack.c.bf16 %v339_v29, %v338_v28  ;;  %v274_v43 = vmul.f32 %v1135_v0, %v203_v27  ;;  %v220_v26 = vld [vmem:[%s1140_s20 + $0x170] sm:$0xff]  ;;  %v221_v27 = vld [vmem:[%s1140_s20 + $0x178] sm:$0xff] }
  0x23   : > { %v342_v41 = vadd.f32 %v1145_v1, %v271_v30  ;;  %v343_v42 = vadd.f32 %v1145_v1, %v272_v31  ;;  %1066 = vst [vmem:[%s1171_s26 + $0x50] sm:$0xff] %v950_v34   ;;  %v275_v48 = vmul.f32 %v1135_v0, %v204_v32  ;;  %v276_v49 = vmul.f32 %v1135_v0, %v205_v33  ;;  %v222_v32 = vld [vmem:[%s1140_s20 + $0x180] sm:$0xff]  ;;  %v223_v33 = vld [vmem:[%s1140_s20 + $0x188] sm:$0xff] }
  0x24   : > { %v960_v46 = vpack.c.bf16 %v341_v36, %v340_v35  ;;  %v344_v47 = vadd.f32 %v1145_v1, %v273_v37  ;;  %1067 = vst [vmem:[%s1171_s26 + $0x58] sm:$0xff] %v955_v40   ;;  %v345_v52 = vadd.f32 %v1145_v1, %v274_v43  ;;  %v277_v53 = vmul.f32 %v1135_v0, %v206_v38  ;;  %v224_v38 = vld [vmem:[%s1140_s20 + $0x190] sm:$0xff] }
  0x25   : > { %v965_v51 = vpack.c.bf16 %v343_v42, %v342_v41  ;;  %v278_v54 = vmul.f32 %v1135_v0, %v207_v39  ;;  %v346_v56 = vadd.f32 %v1145_v1, %v275_v48  ;;  %v347_v57 = vadd.f32 %v1145_v1, %v276_v49  ;;  %v225_v39 = vld [vmem:[%s1140_s20 + $0x198] sm:$0xff]  ;;  %v227_v49 = vld [vmem:[%s1140_s20 + $0x1a8] sm:$0xff] }
  0x26   : > { %1068 = vst [vmem:[%s1171_s26 + $0x60] sm:$0xff] %v960_v46   ;;  %v279_v58 = vmul.f32 %v1135_v0, %v208_v44  ;;  %v280_v59 = vmul.f32 %v1135_v0, %v209_v45  ;;  %v970_v62 = vpack.c.bf16 %v345_v52, %v344_v47  ;;  %v348_v63 = vadd.f32 %v1145_v1, %v277_v53  ;;  %v226_v44 = vld [vmem:[%s1140_s20 + $0x1a0] sm:$0xff] }
  0x27   : > { %1069 = vst [vmem:[%s1171_s26 + $0x68] sm:$0xff] %v965_v51   ;;  %v349_v2 = vadd.f32 %v1145_v1, %v278_v54  ;;  %v281_v3 = vmul.f32 %v1135_v0, %v210_v50  ;;  %v975_v6 = vpack.c.bf16 %v347_v57, %v346_v56  ;;  %v282_v9 = vmul.f32 %v1135_v0, %v211_v55  ;;  %v228_v54 = vld [vmem:[%s1140_s20 + $0x1b0] sm:$0xff]  ;;  %v229_v55 = vld [vmem:[%s1140_s20 + $0x1b8] sm:$0xff] }
  0x28   : > { %v350_v7 = vadd.f32 %v1145_v1, %v279_v58  ;;  %v351_v8 = vadd.f32 %v1145_v1, %v280_v59  ;;  %1070 = vst [vmem:[%s1171_s26 + $0x70] sm:$0xff] %v970_v62   ;;  %v283_v14 = vmul.f32 %v1135_v0, %v212_v60  ;;  %v284_v15 = vmul.f32 %v1135_v0, %v213_v61  ;;  %v230_v60 = vld [vmem:[%s1140_s20 + $0x1c0] sm:$0xff]  ;;  %v231_v61 = vld [vmem:[%s1140_s20 + $0x1c8] sm:$0xff] }
  0x29   : > { %v980_v12 = vpack.c.bf16 %v349_v2, %v348_v63  ;;  %v352_v13 = vadd.f32 %v1145_v1, %v281_v3  ;;  %1071 = vst [vmem:[%s1171_s26 + $0x78] sm:$0xff] %v975_v6   ;;  %v353_v18 = vadd.f32 %v1145_v1, %v282_v9  ;;  %v285_v19 = vmul.f32 %v1135_v0, %v214_v4  ;;  %v232_v4 = vld [vmem:[%s1140_s20 + $0x1d0] sm:$0xff] }
  0x2a   : > { %v985_v17 = vpack.c.bf16 %v351_v8, %v350_v7  ;;  %v286_v20 = vmul.f32 %v1135_v0, %v215_v5  ;;  %v354_v22 = vadd.f32 %v1145_v1, %v283_v14  ;;  %v355_v23 = vadd.f32 %v1145_v1, %v284_v15  ;;  %v233_v5 = vld [vmem:[%s1140_s20 + $0x1d8] sm:$0xff]  ;;  %v235_v15 = vld [vmem:[%s1140_s20 + $0x1e8] sm:$0xff] }
  0x2b   : > { %1072 = vst [vmem:[%s1171_s26 + $0x80] sm:$0xff] %v980_v12   ;;  %v287_v24 = vmul.f32 %v1135_v0, %v216_v10  ;;  %v288_v25 = vmul.f32 %v1135_v0, %v217_v11  ;;  %v990_v28 = vpack.c.bf16 %v353_v18, %v352_v13  ;;  %v356_v29 = vadd.f32 %v1145_v1, %v285_v19  ;;  %v234_v10 = vld [vmem:[%s1140_s20 + $0x1e0] sm:$0xff] }
  0x2c   : > { %1073 = vst [vmem:[%s1171_s26 + $0x88] sm:$0xff] %v985_v17   ;;  %v357_v30 = vadd.f32 %v1145_v1, %v286_v20  ;;  %v289_v31 = vmul.f32 %v1135_v0, %v218_v16  ;;  %v995_v34 = vpack.c.bf16 %v355_v23, %v354_v22  ;;  %v290_v37 = vmul.f32 %v1135_v0, %v219_v21  ;;  %v236_v20 = vld [vmem:[%s1140_s20 + $0x1f0] sm:$0xff]  ;;  %v237_v21 = vld [vmem:[%s1140_s20 + $0x1f8] sm:$0xff] }
  0x2d   : > { %v358_v35 = vadd.f32 %v1145_v1, %v287_v24  ;;  %v359_v36 = vadd.f32 %v1145_v1, %v288_v25  ;;  %1074 = vst [vmem:[%s1171_s26 + $0x90] sm:$0xff] %v990_v28   ;;  %v291_v42 = vmul.f32 %v1135_v0, %v220_v26  ;;  %v292_v43 = vmul.f32 %v1135_v0, %v221_v27 }
  0x2e   : > { %v1000_v40 = vpack.c.bf16 %v357_v30, %v356_v29  ;;  %v360_v41 = vadd.f32 %v1145_v1, %v289_v31  ;;  %1075 = vst [vmem:[%s1171_s26 + $0x98] sm:$0xff] %v995_v34   ;;  %v361_v46 = vadd.f32 %v1145_v1, %v290_v37  ;;  %v293_v47 = vmul.f32 %v1135_v0, %v222_v32 }
  0x2f   : > { %v1005_v45 = vpack.c.bf16 %v359_v36, %v358_v35  ;;  %v294_v48 = vmul.f32 %v1135_v0, %v223_v33  ;;  %v362_v50 = vadd.f32 %v1145_v1, %v291_v42  ;;  %v363_v51 = vadd.f32 %v1145_v1, %v292_v43 }
  0x30   : > { %1076 = vst [vmem:[%s1171_s26 + $0xa0] sm:$0xff] %v1000_v40   ;;  %v295_v52 = vmul.f32 %v1135_v0, %v224_v38  ;;  %v296_v53 = vmul.f32 %v1135_v0, %v225_v39  ;;  %v1010_v56 = vpack.c.bf16 %v361_v46, %v360_v41  ;;  %v364_v57 = vadd.f32 %v1145_v1, %v293_v47 }
  0x31   : > { %1077 = vst [vmem:[%s1171_s26 + $0xa8] sm:$0xff] %v1005_v45   ;;  %v365_v58 = vadd.f32 %v1145_v1, %v294_v48  ;;  %v297_v59 = vmul.f32 %v1135_v0, %v226_v44  ;;  %v1015_v62 = vpack.c.bf16 %v363_v51, %v362_v50  ;;  %v298_v3 = vmul.f32 %v1135_v0, %v227_v49 }
  0x32   : > { %v366_v63 = vadd.f32 %v1145_v1, %v295_v52  ;;  %v367_v2 = vadd.f32 %v1145_v1, %v296_v53  ;;  %1078 = vst [vmem:[%s1171_s26 + $0xb0] sm:$0xff] %v1010_v56   ;;  %v299_v8 = vmul.f32 %v1135_v0, %v228_v54  ;;  %v300_v9 = vmul.f32 %v1135_v0, %v229_v55 }
  0x33   : > { %v1020_v6 = vpack.c.bf16 %v365_v58, %v364_v57  ;;  %v368_v7 = vadd.f32 %v1145_v1, %v297_v59  ;;  %1079 = vst [vmem:[%s1171_s26 + $0xb8] sm:$0xff] %v1015_v62   ;;  %v369_v12 = vadd.f32 %v1145_v1, %v298_v3  ;;  %v301_v13 = vmul.f32 %v1135_v0, %v230_v60 }
  0x34   : > { %v1025_v11 = vpack.c.bf16 %v367_v2, %v366_v63  ;;  %v302_v14 = vmul.f32 %v1135_v0, %v231_v61  ;;  %v370_v16 = vadd.f32 %v1145_v1, %v299_v8  ;;  %v371_v17 = vadd.f32 %v1145_v1, %v300_v9 }
  0x35   : > { %1080 = vst [vmem:[%s1171_s26 + $0xc0] sm:$0xff] %v1020_v6   ;;  %v303_v18 = vmul.f32 %v1135_v0, %v232_v4  ;;  %v304_v19 = vmul.f32 %v1135_v0, %v233_v5  ;;  %v1030_v22 = vpack.c.bf16 %v369_v12, %v368_v7  ;;  %v372_v23 = vadd.f32 %v1145_v1, %v301_v13 }
  0x36   : > { %1081 = vst [vmem:[%s1171_s26 + $0xc8] sm:$0xff] %v1025_v11   ;;  %v373_v24 = vadd.f32 %v1145_v1, %v302_v14  ;;  %v305_v25 = vmul.f32 %v1135_v0, %v234_v10  ;;  %v1035_v26 = vpack.c.bf16 %v371_v17, %v370_v16  ;;  %v306_v29 = vmul.f32 %v1135_v0, %v235_v15 }
  0x37   : > { %v374_v27 = vadd.f32 %v1145_v1, %v303_v18  ;;  %v375_v28 = vadd.f32 %v1145_v1, %v304_v19  ;;  %1082 = vst [vmem:[%s1171_s26 + $0xd0] sm:$0xff] %v1030_v22   ;;  %v307_v32 = vmul.f32 %v1135_v0, %v236_v20  ;;  %v308_v33 = vmul.f32 %v1135_v0, %v237_v21 }
  0x38   : > { %v1040_v30 = vpack.c.bf16 %v373_v24, %v372_v23  ;;  %v376_v31 = vadd.f32 %v1145_v1, %v305_v25  ;;  %1083 = vst [vmem:[%s1171_s26 + $0xd8] sm:$0xff] %v1035_v26   ;;  %v377_v35 = vadd.f32 %v1145_v1, %v306_v29 }
  0x39   : > { %v1045_v34 = vpack.c.bf16 %v375_v28, %v374_v27  ;;  %v378_v36 = vadd.f32 %v1145_v1, %v307_v32  ;;  %v379_v37 = vadd.f32 %v1145_v1, %v308_v33 }
  0x3a   : > { %1084 = vst [vmem:[%s1171_s26 + $0xe0] sm:$0xff] %v1040_v30   ;;  %v1050_v38 = vpack.c.bf16 %v377_v35, %v376_v31 }
  0x3b   : > { %1085 = vst [vmem:[%s1171_s26 + $0xe8] sm:$0xff] %v1045_v34   ;;  %v1055_v39 = vpack.c.bf16 %v379_v37, %v378_v36 }
  0x3c   : > { %1086 = vst [vmem:[%s1171_s26 + $0xf0] sm:$0xff] %v1050_v38  }
  0x3d   : > { %1087 = vst [vmem:[%s1171_s26 + $0xf8] sm:$0xff] %v1055_v39  }
  0x3e PF: > { %s13_s12 = sadd.s32 1, %s1102_s12  }
  0x3f   : > { %p10_p4 = scmp.ge.s32.totalorder %s13_s12, 10  }
  0x41   :  { %12 = sbr.rel (!%p10_p4) target bundleno = 1 (0x1), region = 62 }

// kernel: hourglass_forward.87
= control target key start
LH: loop header
LB: loop body
LE: loop exit
PB: predicated region body
PF: predicated region fallthrough
CT: control target
= control target key end

     0   :  { %s696_s15 = smov 0   ;;  %s884_s0 = inlined_call_operand.vmem [shape: f32[512,128], index: 0, kind: input, shape index: {}]   ;;  %s885_s1 = inlined_call_operand.vmem [shape: f32[1,128], index: 1, kind: input, shape index: {}]   ;;  %s886_s2 = inlined_call_operand.vmem [shape: f32[1,128], index: 2, kind: input, shape index: {}]   ;;  %s887_s3 = inlined_call_operand.vmem [shape: bf16[512,128], index: 3, kind: input, shape index: {}]   ;;  %s888_s4 = inlined_call_operand.vmem [shape: f32[512,128], index: 4, kind: output, shape index: {}]  }
   0x1 LB: > { %s561_s16 = sadd.s32 4294967295, %s669_s15   ;;  %p565_p0 = scmp.ge.s32.totalorder %s669_s15, 1  ;;  %s669_s15 = sphi %s696_s15, %s14_s15  }
   0x2   : > { %p174_p1 = scmp.lt.s32.totalorder %s669_s15, 3 }
   0x4   : > { %p175_p2 = pnand %p565_p0, %p174_p1 }
   0x5   : > { %s566_s17 = sshll.u32 (!%p175_p2), %s561_s16, 5  ;;  %v711_v0 = vld [vmem:[%s885_s1] ss:$0 sm:$0xff] (!%p175_p2) }
   0x6   : > { %178 = sbr.rel (%p175_p2) target bundleno = 63 (0x3f), region = 36  ;;  %p206_p3 = scmp.lt.s32.totalorder (!%p175_p2), %s566_s17, 63  ;;  %v728_v1 = vld [vmem:[%s886_s2] ss:$0 sm:$0xff] (!%p175_p2) }
   0xd   : > { %s890_s17 = smov (!%p206_p3, %s566_s17), 63 }
   0xe   : > { %s567_s18 = sshll.u32 %s890_s17, 3  ;;  %s569_s19 = sshll.u32 %s890_s17, 2 }
   0xf   : > { %s718_s24 = scalar_lea.vmem %s884_s0, %s567_s18  ;;  %s723_s27 = scalar_lea.vmem %s887_s3, %s569_s19 }
  0x10   : > { %v223_v2 = vld [vmem:[%s718_s24] sm:$0xff]  ;;  %v224_v4 = vld [vmem:[%s718_s24 + $0x8] sm:$0xff]  ;;  %v225_v9 = vld [vmem:[%s718_s24 + $0x10] sm:$0xff]  ;;  %s759_s6 = scalar_lea.vmem %s888_s4, %s567_s18 }
  0x11   : > { %v577_v3 = vld [vmem:[%s723_s27] sm:$0xff]   ;;  %v262_v5 = vmul.f32 %v711_v0, %v223_v2  ;;  %v263_v7 = vmul.f32 %v711_v0, %v224_v4  ;;  %v640_v10 = vld [vmem:[%s723_s27 + $0x8] sm:$0xff]   ;;  %v226_v11 = vld [vmem:[%s718_s24 + $0x18] sm:$0xff]  ;;  %v264_v12 = vmul.f32 %v711_v0, %v225_v9 }
  0x12   : > { %v578_v6 = vunpack.c.l.bf16 %v577_v3  ;;  %v579_v8 = vunpack.c.h.bf16 %v577_v3  ;;  %v582_v13 = vunpack.c.l.bf16 %v640_v10  ;;  %v265_v14 = vmul.f32 %v711_v0, %v226_v11  ;;  %v227_v16 = vld [vmem:[%s718_s24 + $0x20] sm:$0xff]  ;;  %v641_v17 = vld [vmem:[%s723_s27 + $0x10] sm:$0xff]   ;;  %v228_v18 = vld [vmem:[%s718_s24 + $0x28] sm:$0xff] }
  0x13   : > { %v583_v15 = vunpack.c.h.bf16 %v640_v10  ;;  %v301_v19 = vadd.f32 %v728_v1, %v262_v5  ;;  %v302_v20 = vadd.f32 %v728_v1, %v263_v7  ;;  %v266_v21 = vmul.f32 %v711_v0, %v227_v16  ;;  %v229_v23 = vld [vmem:[%s718_s24 + $0x30] sm:$0xff]  ;;  %v642_v24 = vld [vmem:[%s723_s27 + $0x18] sm:$0xff]   ;;  %v231_v38 = vld [vmem:[%s718_s24 + $0x40] sm:$0xff] }
  0x14   : > { %v586_v22 = vunpack.c.l.bf16 %v641_v17  ;;  %v303_v25 = vadd.f32 %v728_v1, %v264_v12  ;;  %v304_v26 = vadd.f32 %v728_v1, %v265_v14  ;;  %v267_v27 = vmul.f32 %v711_v0, %v228_v18  ;;  %v230_v33 = vld [vmem:[%s718_s24 + $0x38] sm:$0xff]  ;;  %v643_v43 = vld [vmem:[%s723_s27 + $0x20] sm:$0xff]   ;;  %v232_v44 = vld [vmem:[%s718_s24 + $0x48] sm:$0xff] }
  0x15   : > { %v587_v28 = vunpack.c.h.bf16 %v641_v17  ;;  %v397_v29 = vadd.f32 %v578_v6, %v301_v19  ;;  %v398_v30 = vadd.f32 %v579_v8, %v302_v20  ;;  %v305_v31 = vadd.f32 %v728_v1, %v266_v21  ;;  %v233_v49 = vld [vmem:[%s718_s24 + $0x50] sm:$0xff]  ;;  %v644_v54 = vld [vmem:[%s723_s27 + $0x28] sm:$0xff]   ;;  %v234_v55 = vld [vmem:[%s718_s24 + $0x58] sm:$0xff] }
  0x16   : > { %v268_v32 = vmul.f32 %v711_v0, %v229_v23  ;;  %v399_v34 = vadd.f32 %v582_v13, %v303_v25  ;;  %v400_v35 = vadd.f32 %v583_v15, %v304_v26  ;;  %v306_v36 = vadd.f32 %v728_v1, %v267_v27  ;;  %v235_v60 = vld [vmem:[%s718_s24 + $0x60] sm:$0xff]  ;;  %v645_v3 = vld [vmem:[%s723_s27 + $0x30] sm:$0xff]   ;;  %v236_v8 = vld [vmem:[%s718_s24 + $0x68] sm:$0xff] }
  0x17   : > { %v590_v37 = vunpack.c.l.bf16 %v642_v24  ;;  %v429_v39 = vmax.f32 %v397_v29, 0.0  ;;  %v430_v40 = vmax.f32 %v398_v30, 0.0  ;;  %v401_v41 = vadd.f32 %v586_v22, %v305_v31  ;;  %v237_v13 = vld [vmem:[%s718_s24 + $0x70] sm:$0xff]  ;;  %v646_v18 = vld [vmem:[%s723_s27 + $0x38] sm:$0xff]   ;;  %v647_v29 = vld [vmem:[%s723_s27 + $0x40] sm:$0xff]  }
  0x18   : > { %v307_v42 = vadd.f32 %v728_v1, %v268_v32  ;;  %v431_v45 = vmax.f32 %v399_v34, 0.0  ;;  %v432_v46 = vmax.f32 %v400_v35, 0.0  ;;  %v402_v47 = vadd.f32 %v587_v28, %v306_v36  ;;  %v238_v23 = vld [vmem:[%s718_s24 + $0x78] sm:$0xff]  ;;  %v239_v28 = vld [vmem:[%s718_s24 + $0x80] sm:$0xff]  ;;  %v240_v34 = vld [vmem:[%s718_s24 + $0x88] sm:$0xff] }
  0x19   : > { %v269_v48 = vmul.f32 %v711_v0, %v230_v33  ;;  %461 = vst [vmem:[%s759_s6] sm:$0xff] %v429_v39  ;;  %462 = vst [vmem:[%s759_s6 + $0x8] sm:$0xff] %v430_v40  ;;  %v433_v50 = vmax.f32 %v401_v41, 0.0  ;;  %v591_v52 = vunpack.c.h.bf16 %v642_v24  ;;  %v270_v53 = vmul.f32 %v711_v0, %v231_v38  ;;  %v241_v39 = vld [vmem:[%s718_s24 + $0x90] sm:$0xff]  ;;  %v648_v40 = vld [vmem:[%s723_s27 + $0x48] sm:$0xff]  }
  0x1a   : > { %v403_v51 = vadd.f32 %v590_v37, %v307_v42  ;;  %463 = vst [vmem:[%s759_s6 + $0x10] sm:$0xff] %v431_v45  ;;  %464 = vst [vmem:[%s759_s6 + $0x18] sm:$0xff] %v432_v46  ;;  %v434_v56 = vmax.f32 %v402_v47, 0.0  ;;  %v594_v58 = vunpack.c.l.bf16 %v643_v43  ;;  %v271_v59 = vmul.f32 %v711_v0, %v232_v44  ;;  %v242_v45 = vld [vmem:[%s718_s24 + $0x98] sm:$0xff] }
  0x1b   : > { %v308_v57 = vadd.f32 %v728_v1, %v269_v48  ;;  %465 = vst [vmem:[%s759_s6 + $0x20] sm:$0xff] %v433_v50  ;;  %v309_v62 = vadd.f32 %v728_v1, %v270_v53  ;;  %v595_v63 = vunpack.c.h.bf16 %v643_v43  ;;  %v272_v2 = vmul.f32 %v711_v0, %v233_v49  ;;  %v243_v50 = vld [vmem:[%s718_s24 + $0xa0] sm:$0xff] }
  0x1c   : > { %v435_v61 = vmax.f32 %v403_v51, 0.0  ;;  %466 = vst [vmem:[%s759_s6 + $0x28] sm:$0xff] %v434_v56  ;;  %v310_v5 = vadd.f32 %v728_v1, %v271_v59  ;;  %v598_v6 = vunpack.c.l.bf16 %v644_v54  ;;  %v273_v7 = vmul.f32 %v711_v0, %v234_v55  ;;  %v649_v55 = vld [vmem:[%s723_s27 + $0x50] sm:$0xff]  }
  0x1d   : > { %v404_v4 = vadd.f32 %v591_v52, %v308_v57  ;;  %v405_v9 = vadd.f32 %v594_v58, %v309_v62  ;;  %v311_v10 = vadd.f32 %v728_v1, %v272_v2  ;;  %v599_v11 = vunpack.c.h.bf16 %v644_v54 }
  0x1e   : > { %467 = vst [vmem:[%s759_s6 + $0x30] sm:$0xff] %v435_v61  ;;  %v274_v12 = vmul.f32 %v711_v0, %v235_v60  ;;  %v406_v15 = vadd.f32 %v595_v63, %v310_v5  ;;  %v312_v16 = vadd.f32 %v728_v1, %v273_v7  ;;  %v602_v17 = vunpack.c.l.bf16 %v645_v3  ;;  %v244_v60 = vld [vmem:[%s718_s24 + $0xa8] sm:$0xff] }
  0x1f   : > { %v436_v14 = vmax.f32 %v404_v4, 0.0  ;;  %v437_v19 = vmax.f32 %v405_v9, 0.0  ;;  %v407_v20 = vadd.f32 %v598_v6, %v311_v10  ;;  %v275_v22 = vmul.f32 %v711_v0, %v236_v8  ;;  %v650_v8 = vld [vmem:[%s723_s27 + $0x58] sm:$0xff]  }
  0x20   : > { %v313_v21 = vadd.f32 %v728_v1, %v274_v12  ;;  %v438_v24 = vmax.f32 %v406_v15, 0.0  ;;  %v408_v25 = vadd.f32 %v599_v11, %v312_v16  ;;  %v603_v26 = vunpack.c.h.bf16 %v645_v3  ;;  %v245_v3 = vld [vmem:[%s718_s24 + $0xb0] sm:$0xff] }
  0x21   : > { %468 = vst [vmem:[%s759_s6 + $0x38] sm:$0xff] %v436_v14  ;;  %v276_v27 = vmul.f32 %v711_v0, %v237_v13  ;;  %469 = vst [vmem:[%s759_s6 + $0x40] sm:$0xff] %v437_v19  ;;  %v439_v30 = vmax.f32 %v407_v20, 0.0  ;;  %v314_v32 = vadd.f32 %v728_v1, %v275_v22  ;;  %v606_v33 = vunpack.c.l.bf16 %v646_v18  ;;  %v246_v13 = vld [vmem:[%s718_s24 + $0xb8] sm:$0xff]  ;;  %v651_v19 = vld [vmem:[%s723_s27 + $0x60] sm:$0xff]  }
  0x22   : > { %v409_v31 = vadd.f32 %v602_v17, %v313_v21  ;;  %470 = vst [vmem:[%s759_s6 + $0x48] sm:$0xff] %v438_v24  ;;  %v440_v35 = vmax.f32 %v408_v25, 0.0  ;;  %v277_v37 = vmul.f32 %v711_v0, %v238_v23  ;;  %v607_v38 = vunpack.c.h.bf16 %v646_v18  ;;  %v247_v18 = vld [vmem:[%s718_s24 + $0xc0] sm:$0xff]  ;;  %v248_v24 = vld [vmem:[%s718_s24 + $0xc8] sm:$0xff] }
  0x23   : > { %v315_v36 = vadd.f32 %v728_v1, %v276_v27  ;;  %471 = vst [vmem:[%s759_s6 + $0x50] sm:$0xff] %v439_v30  ;;  %v410_v42 = vadd.f32 %v603_v26, %v314_v32  ;;  %v278_v43 = vmul.f32 %v711_v0, %v239_v28  ;;  %v610_v44 = vunpack.c.l.bf16 %v647_v29  ;;  %v652_v30 = vld [vmem:[%s723_s27 + $0x68] sm:$0xff]  }
  0x24   : > { %v441_v41 = vmax.f32 %v409_v31, 0.0  ;;  %472 = vst [vmem:[%s759_s6 + $0x58] sm:$0xff] %v440_v35  ;;  %v316_v47 = vadd.f32 %v728_v1, %v277_v37  ;;  %v279_v48 = vmul.f32 %v711_v0, %v240_v34  ;;  %v611_v49 = vunpack.c.h.bf16 %v647_v29  ;;  %v249_v29 = vld [vmem:[%s718_s24 + $0xd0] sm:$0xff]  ;;  %v250_v35 = vld [vmem:[%s718_s24 + $0xd8] sm:$0xff] }
  0x25   : > { %v411_v46 = vadd.f32 %v606_v33, %v315_v36  ;;  %v442_v51 = vmax.f32 %v410_v42, 0.0  ;;  %v317_v52 = vadd.f32 %v728_v1, %v278_v43  ;;  %v280_v53 = vmul.f32 %v711_v0, %v241_v39 }
  0x26   : > { %473 = vst [vmem:[%s759_s6 + $0x60] sm:$0xff] %v441_v41  ;;  %v614_v54 = vunpack.c.l.bf16 %v648_v40  ;;  %v412_v57 = vadd.f32 %v607_v38, %v316_v47  ;;  %v318_v58 = vadd.f32 %v728_v1, %v279_v48  ;;  %v281_v59 = vmul.f32 %v711_v0, %v242_v45  ;;  %v653_v45 = vld [vmem:[%s723_s27 + $0x70] sm:$0xff]  }
  0x27   : > { %v443_v56 = vmax.f32 %v411_v46, 0.0  ;;  %474 = vst [vmem:[%s759_s6 + $0x68] sm:$0xff] %v442_v51  ;;  %v413_v61 = vadd.f32 %v610_v44, %v317_v52  ;;  %v319_v62 = vadd.f32 %v728_v1, %v280_v53  ;;  %v615_v63 = vunpack.c.h.bf16 %v648_v40  ;;  %v251_v40 = vld [vmem:[%s718_s24 + $0xe0] sm:$0xff] }
  0x28   : > { %v282_v2 = vmul.f32 %v711_v0, %v243_v50  ;;  %v444_v4 = vmax.f32 %v412_v57, 0.0  ;;  %v414_v5 = vadd.f32 %v611_v49, %v318_v58  ;;  %v320_v6 = vadd.f32 %v728_v1, %v281_v59  ;;  %v252_v50 = vld [vmem:[%s718_s24 + $0xe8] sm:$0xff] }
  0x29   : > { %475 = vst [vmem:[%s759_s6 + $0x70] sm:$0xff] %v443_v56  ;;  %v618_v7 = vunpack.c.l.bf16 %v649_v55  ;;  %v445_v9 = vmax.f32 %v413_v61, 0.0  ;;  %v415_v10 = vadd.f32 %v614_v54, %v319_v62  ;;  %v283_v12 = vmul.f32 %v711_v0, %v244_v60  ;;  %v654_v60 = vld [vmem:[%s723_s27 + $0x78] sm:$0xff]  }
  0x2a   : > { %v321_v11 = vadd.f32 %v728_v1, %v282_v2  ;;  %476 = vst [vmem:[%s759_s6 + $0x78] sm:$0xff] %v444_v4  ;;  %v446_v14 = vmax.f32 %v414_v5, 0.0  ;;  %v416_v15 = vadd.f32 %v615_v63, %v320_v6  ;;  %v619_v16 = vunpack.c.h.bf16 %v649_v55  ;;  %v253_v55 = vld [vmem:[%s718_s24 + $0xf0] sm:$0xff] }
  0x2b   : > { %v284_v17 = vmul.f32 %v711_v0, %v245_v3  ;;  %477 = vst [vmem:[%s759_s6 + $0x80] sm:$0xff] %v445_v9  ;;  %v447_v20 = vmax.f32 %v415_v10, 0.0  ;;  %v322_v22 = vadd.f32 %v728_v1, %v283_v12  ;;  %v622_v23 = vunpack.c.l.bf16 %v650_v8  ;;  %v254_v3 = vld [vmem:[%s718_s24 + $0xf8] sm:$0xff] }
  0x2c   : > { %v417_v21 = vadd.f32 %v618_v7, %v321_v11  ;;  %478 = vst [vmem:[%s759_s6 + $0x88] sm:$0xff] %v446_v14  ;;  %v448_v25 = vmax.f32 %v416_v15, 0.0  ;;  %v285_v27 = vmul.f32 %v711_v0, %v246_v13  ;;  %v623_v28 = vunpack.c.h.bf16 %v650_v8 }
  0x2d   : > { %v323_v26 = vadd.f32 %v728_v1, %v284_v17  ;;  %479 = vst [vmem:[%s759_s6 + $0x90] sm:$0xff] %v447_v20  ;;  %v418_v32 = vadd.f32 %v619_v16, %v322_v22  ;;  %v286_v33 = vmul.f32 %v711_v0, %v247_v18  ;;  %v626_v34 = vunpack.c.l.bf16 %v651_v19 }
  0x2e   : > { %v449_v31 = vmax.f32 %v417_v21, 0.0  ;;  %480 = vst [vmem:[%s759_s6 + $0x98] sm:$0xff] %v448_v25  ;;  %v324_v37 = vadd.f32 %v728_v1, %v285_v27  ;;  %v287_v38 = vmul.f32 %v711_v0, %v248_v24  ;;  %v627_v39 = vunpack.c.h.bf16 %v651_v19 }
  0x2f   : > { %v419_v36 = vadd.f32 %v622_v23, %v323_v26  ;;  %v450_v41 = vmax.f32 %v418_v32, 0.0  ;;  %v325_v42 = vadd.f32 %v728_v1, %v286_v33  ;;  %v288_v43 = vmul.f32 %v711_v0, %v249_v29 }
  0x30   : > { %481 = vst [vmem:[%s759_s6 + $0xa0] sm:$0xff] %v449_v31  ;;  %v630_v44 = vunpack.c.l.bf16 %v652_v30  ;;  %v420_v47 = vadd.f32 %v623_v28, %v324_v37  ;;  %v326_v48 = vadd.f32 %v728_v1, %v287_v38  ;;  %v289_v49 = vmul.f32 %v711_v0, %v250_v35 }
  0x31   : > { %v451_v46 = vmax.f32 %v419_v36, 0.0  ;;  %482 = vst [vmem:[%s759_s6 + $0xa8] sm:$0xff] %v450_v41  ;;  %v421_v51 = vadd.f32 %v626_v34, %v325_v42  ;;  %v327_v52 = vadd.f32 %v728_v1, %v288_v43  ;;  %v631_v53 = vunpack.c.h.bf16 %v652_v30 }
  0x32   : > { %v290_v54 = vmul.f32 %v711_v0, %v251_v40  ;;  %v452_v56 = vmax.f32 %v420_v47, 0.0  ;;  %v422_v57 = vadd.f32 %v627_v39, %v326_v48  ;;  %v328_v58 = vadd.f32 %v728_v1, %v289_v49 }
  0x33   : > { %483 = vst [vmem:[%s759_s6 + $0xb0] sm:$0xff] %v451_v46  ;;  %v634_v59 = vunpack.c.l.bf16 %v653_v45  ;;  %v453_v61 = vmax.f32 %v421_v51, 0.0  ;;  %v423_v62 = vadd.f32 %v630_v44, %v327_v52  ;;  %v291_v2 = vmul.f32 %v711_v0, %v252_v50 }
  0x34   : > { %v329_v63 = vadd.f32 %v728_v1, %v290_v54  ;;  %484 = vst [vmem:[%s759_s6 + $0xb8] sm:$0xff] %v452_v56  ;;  %v454_v4 = vmax.f32 %v422_v57, 0.0  ;;  %v424_v5 = vadd.f32 %v631_v53, %v328_v58  ;;  %v635_v6 = vunpack.c.h.bf16 %v653_v45 }
  0x35   : > { %v292_v7 = vmul.f32 %v711_v0, %v253_v55  ;;  %485 = vst [vmem:[%s759_s6 + $0xc0] sm:$0xff] %v453_v61  ;;  %v455_v8 = vmax.f32 %v423_v62, 0.0  ;;  %v330_v10 = vadd.f32 %v728_v1, %v291_v2  ;;  %v638_v11 = vunpack.c.l.bf16 %v654_v60 }
  0x36   : > { %v425_v9 = vadd.f32 %v634_v59, %v329_v63  ;;  %486 = vst [vmem:[%s759_s6 + $0xc8] sm:$0xff] %v454_v4  ;;  %v456_v12 = vmax.f32 %v424_v5, 0.0  ;;  %v293_v14 = vmul.f32 %v711_v0, %v254_v3  ;;  %v639_v15 = vunpack.c.h.bf16 %v654_v60 }
  0x37   : > { %v331_v13 = vadd.f32 %v728_v1, %v292_v7  ;;  %487 = vst [vmem:[%s759_s6 + $0xd0] sm:$0xff] %v455_v8  ;;  %v426_v17 = vadd.f32 %v635_v6, %v330_v10 }
  0x38   : > { %v457_v16 = vmax.f32 %v425_v9, 0.0  ;;  %488 = vst [vmem:[%s759_s6 + $0xd8] sm:$0xff] %v456_v12  ;;  %v332_v19 = vadd.f32 %v728_v1, %v293_v14 }
  0x39   : > { %v427_v18 = vadd.f32 %v638_v11, %v331_v13  ;;  %v458_v20 = vmax.f32 %v426_v17, 0.0 }
  0x3a   : > { %489 = vst [vmem:[%s759_s6 + $0xe0] sm:$0xff] %v457_v16  ;;  %v428_v22 = vadd.f32 %v639_v15, %v332_v19 }
  0x3b   : > { %v459_v21 = vmax.f32 %v427_v18, 0.0  ;;  %490 = vst [vmem:[%s759_s6 + $0xe8] sm:$0xff] %v458_v20 }
  0x3c   : > { %v460_v23 = vmax.f32 %v428_v22, 0.0 }
  0x3d   : > { %491 = vst [vmem:[%s759_s6 + $0xf0] sm:$0xff] %v459_v21 }
  0x3e   : > { %492 = vst [vmem:[%s759_s6 + $0xf8] sm:$0xff] %v460_v23 }
  0x3f PF: > { %s14_s15 = sadd.s32 1, %s669_s15  }
  0x40   : > { %p11_p4 = scmp.ge.s32.totalorder %s14_s15, 4  }
  0x42   :  { %13 = sbr.rel (!%p11_p4) target bundleno = 1 (0x1), region = 69 }

</bundles_post_ra>
